<compile_context>
chip_gen: v5e
topology: v5e:2x2
jax: 0.10.0
libtpu: 0.0.40
codegen_flags: <defaults>
</compile_context>

<pallas_src>
import functools

import jax
import jax.numpy as jnp
from jax import lax
from jax.experimental import pallas as pl
from jax.experimental.pallas import tpu as pltpu

EPS = 1e-6  # LayerNorm eps (partial(nn.LayerNorm, eps=1e-06))


# ----------------------------- in-kernel math ------------------------------

def _layernorm(x, g, b):
    mean = jnp.mean(x, axis=-1, keepdims=True)
    var = jnp.mean((x - mean) ** 2, axis=-1, keepdims=True)
    return (x - mean) * lax.rsqrt(var + EPS) * g + b


def _gelu_exact(x):
    # nn.GELU default = exact (erf) gelu.  A tanh-approx GELU would move this to
    # the EUP if the VALU saturates at production sizes, but it changes numerics
    # vs nn.GELU(approximate='none'), so the exact form is kept.
    return 0.5 * x * (1.0 + lax.erf(x * 0.7071067811865475))


def _row_offset(i, tile):
    if isinstance(i, int):
        return i * tile
    return pl.multiple_of(i * tile, tile)


def _loop(n, body):
    """Unrolled for tiny static trip counts; scf.for otherwise (bounds live ranges)."""
    if n <= 8:
        for i in range(n):
            body(i)
    else:
        def _body(i, carry):
            body(i)
            return carry
        lax.fori_loop(0, n, _body, 0)


# ------------------------------- fused kernel -------------------------------

def encoder_fused_kernel(x_ref, pos_ref,
                         ln1g_ref, ln1b_ref, wqkv_ref, bqkv_ref,
                         wo_ref, bo_ref, ln2g_ref, ln2b_ref,
                         w1_ref, b1_ref, w2_ref, b2_ref,
                         lnfg_ref, lnfb_ref,
                         o_ref, acc_ref, *,
                         num_heads, seq_len, row_tile, compute_dtype, approx_softmax):
    l = pl.program_id(1)
    num_layers = pl.num_programs(1)

    N, D = acc_ref.shape          # N = bb * S rows of the resident residual stream
    S = seq_len
    bb = N // S
    H = num_heads
    dh = D // H
    scale = 1.0 / (dh ** 0.5)
    cd = compute_dtype

    # ---- first layer step for this batch block: residual stream <- x + pos ----
    @pl.when(l == 0)
    def _init():
        pos = pos_ref[0].astype(jnp.float32)              # (S, D)
        def init_one_item(b):
            r0 = _row_offset(b, S)
            acc_ref[pl.ds(r0, S), :] = x_ref[b].astype(jnp.float32) + pos
        _loop(bb, init_one_item)

    # Per-layer parameters (weights streamed through the layer-axis pipeline).
    # Matmul weights stay in compute_dtype (bf16 in production); LN params and
    # biases are tiny and kept f32 so all non-MXU math is f32.
    ln1_g, ln1_b = ln1g_ref[0], ln1b_ref[0]
    w_qkv, b_qkv = wqkv_ref[0], bqkv_ref[0]
    w_o, b_o = wo_ref[0], bo_ref[0]
    ln2_g, ln2_b = ln2g_ref[0], ln2b_ref[0]
    w1, b1 = w1_ref[0], b1_ref[0]
    w2, b2 = w2_ref[0], b2_ref[0]

    # ---------------- attention branch: x <- x + MHA(LN1(x)) ----------------
    # One batch item at a time so the qkv temporary is (S, 3D), not (N, 3D).
    def attn_one_item(b):
        r0 = _row_offset(b, S)
        xb = acc_ref[pl.ds(r0, S), :]                      # (S, D) f32 residual
        xn = _layernorm(xb, ln1_g, ln1_b)
        # ONE qkv projection per item: (S, D) x (D, 3D) on the MXU.
        qkv = jnp.dot(xn.astype(cd), w_qkv,
                      preferred_element_type=jnp.float32) + b_qkv
        head_outs = []
        for h in range(H):                                  # per-head (S, S) attention
            # fold the 1/sqrt(dh) scale into q (S*dh mults instead of S*S)
            qh = (qkv[:, h * dh:(h + 1) * dh] * scale).astype(cd)
            kh = qkv[:, D + h * dh:D + (h + 1) * dh].astype(cd)
            vh = qkv[:, 2 * D + h * dh:2 * D + (h + 1) * dh].astype(cd)
            s = lax.dot_general(qh, kh, (((1,), (1,)), ((), ())),
                                preferred_element_type=jnp.float32)    # (S, S)
            s = s - jnp.max(s, axis=-1, keepdims=True)
            p = jnp.exp(s)
            p = p * pl.reciprocal(jnp.sum(p, axis=-1, keepdims=True),
                                  approx=approx_softmax)    # EUP slot when approx
            head_outs.append(
                jnp.dot(p.astype(cd), vh, preferred_element_type=jnp.float32))
        ctx = jnp.concatenate(head_outs, axis=-1)           # (S, D)
        # ONE output projection over the concatenated heads.
        proj = jnp.dot(ctx.astype(cd), w_o, preferred_element_type=jnp.float32) + b_o
        acc_ref[pl.ds(r0, S), :] = xb + proj                # residual 1 (f32, dropout=id)

    _loop(bb, attn_one_item)

    # --------------------- MLP branch: x <- x + MLP(LN2(x)) ---------------------
    # Row-tiled so the (rows, M) hidden activation stays a few MB at any size.
    n_chunks = N // row_tile

    def mlp_one_chunk(c):
        r0 = _row_offset(c, row_tile)
        xb = acc_ref[pl.ds(r0, row_tile), :]                # (rt, D) f32
        yn = _layernorm(xb, ln2_g, ln2_b)
        h1 = jnp.dot(yn.astype(cd), w1, preferred_element_type=jnp.float32) + b1
        h1 = _gelu_exact(h1)
        h2 = jnp.dot(h1.astype(cd), w2, preferred_element_type=jnp.float32) + b2
        acc_ref[pl.ds(r0, row_tile), :] = xb + h2           # residual 2 (f32)

    _loop(n_chunks, mlp_one_chunk)

    # ---- last layer step: final LayerNorm, single store of the whole block ----
    @pl.when(l == num_layers - 1)
    def _finalize():
        lnf_g = lnfg_ref[...]
        lnf_b = lnfb_ref[...]
        def final_one_item(b):
            r0 = _row_offset(b, S)
            y = _layernorm(acc_ref[pl.ds(r0, S), :], lnf_g, lnf_b)
            o_ref[b] = y.astype(o_ref.dtype)
        _loop(bb, final_one_item)


# ------------------------------- wrapper -------------------------------------

_STACK_KEYS = ("ln1_g", "ln1_b", "w_qkv", "b_qkv", "w_o", "b_o",
               "ln2_g", "ln2_b", "w1", "b1", "w2", "b2")
_MATMUL_KEYS = frozenset({"w_qkv", "w_o", "w1", "w2"})


def _vmem_capacity_bytes():
    """Physical VMEM per TensorCore (128 MiB v5e/v6e, 64 MiB v7x)."""
    try:
        cap = int(pltpu.get_tpu_info().vmem_capacity_bytes)
        if cap > 0:
            return cap
    except Exception:
        pass
    return 64 * 1024 * 1024     # conservative (v7x-sized) fallback


def _pick_row_tile(n_rows):
    # Largest MXU-friendly row tile dividing the flattened row count; >=256 rows
    # fully feed the systolic array, <=512 bounds the (rows, M) temporary.
    for t in (512, 384, 256, 128, 64, 32, 16, 8):
        if n_rows % t == 0:
            return t
    return n_rows


def _footprint_bytes(bb, S, D, M, H, x_itemsize, w_itemsize):
    """Rough per-TensorCore VMEM footprint estimate for a batch block of size bb."""
    f32 = 4
    N = bb * S
    rt = _pick_row_tile(N)
    acc = N * D * f32                                        # resident residual stream
    io = 2 * bb * S * D * x_itemsize + S * D * x_itemsize    # x block, out block, pos
    per_layer_w = (3 * D * D + D * D + D * M + M * D) * w_itemsize \
                  + (3 * D + D + M + D + 6 * D) * f32        # biases + LN params (f32)
    weights = 2 * per_layer_w                                # double-buffered layer pipe
    attn_tmp = (S * 3 * D + H * S * S + 4 * S * D) * f32     # per-item qkv/scores/ctx
    mlp_tmp = rt * (2 * M + 2 * D) * f32                     # per-row-tile hidden act
    return acc + io + weights + attn_tmp + mlp_tmp


def _layer_block_spec(stacked):
    rest = stacked.shape[1:]
    zeros = (0,) * len(rest)
    return pl.BlockSpec((1, *rest), lambda nb, l, _z=zeros: (l, *_z))


def _invariant_spec(block_shape, index_map, single_buffer):
    # These operands' block index never advances along the inner (sequential)
    # layer axis; a 1-deep buffer avoids a useless second VMEM copy.
    if single_buffer:
        return pl.BlockSpec(block_shape, index_map, pipeline_mode=pl.Buffered(1))
    return pl.BlockSpec(block_shape, index_map)


def _encoder_pallas(x, params, num_heads, *, num_batch_blocks, compute_dtype,
                    approx_softmax, single_buffer_invariants):
    B, S, D = x.shape
    L = len(params["layers"])
    M = params["layers"][0]["w1"].shape[-1]
    H = num_heads
    assert D % H == 0

    w_itemsize = jnp.dtype(compute_dtype).itemsize
    x_itemsize = jnp.dtype(x.dtype).itemsize
    vmem_cap = _vmem_capacity_bytes()
    # ~85% of physical: ~108 MiB on v5e/v6e (128 MiB), ~54 MiB on v7x (64 MiB/TC).
    vmem_limit = int(vmem_cap * 0.85)

    if num_batch_blocks is None:
        # Generation-aware batch-block choice:
        #  * v5e/v6e (one TensorCore): smallest nb whose footprint fits VMEM
        #    (usually 1) -> weights streamed once, tallest MXU M dimension.
        #  * v7x (two TensorCores, 64 MiB each): keep nb >= 2 so the "parallel"
        #    axis shards batch blocks across both cores, still VMEM-sized.
        budget = int(vmem_cap * 0.6)
        two_core = vmem_cap <= 80 * 1024 * 1024
        nb_blocks = None
        for d in range(1, B + 1):
            if B % d:
                continue
            if two_core and d == 1 and B % 2 == 0 and B >= 2:
                continue
            if _footprint_bytes(B // d, S, D, M, H, x_itemsize, w_itemsize) <= budget:
                nb_blocks = d
                break
        if nb_blocks is None:
            nb_blocks = B
    else:
        nb_blocks = min(num_batch_blocks, B)
    assert B % nb_blocks == 0
    bb = B // nb_blocks
    row_tile = _pick_row_tile(bb * S)

    # Stack per-layer weights on a leading layer axis -> streamed through the
    # BlockSpec pipeline along the layer grid axis (DMA overlapped with compute).
    # Matmul weights are cast to compute_dtype (bf16 in production): halves weight
    # HBM traffic and the double-buffered weight VMEM, ~2x MXU rate.
    stacked = []
    for name in _STACK_KEYS:
        arr = jnp.stack([lp[name] for lp in params["layers"]], axis=0)
        if name in _MATMUL_KEYS:
            arr = arr.astype(compute_dtype)
        stacked.append(arr)

    sb = single_buffer_invariants
    in_specs = [
        _invariant_spec((bb, S, D), lambda nb, l: (nb, 0, 0), sb),   # x
        _invariant_spec((1, S, D), lambda nb, l: (0, 0, 0), sb),     # pos_embedding
    ]
    in_specs += [_layer_block_spec(w) for w in stacked]              # per-layer weights
    in_specs += [
        _invariant_spec((1, D), lambda nb, l: (0, 0), sb),           # final LN gamma
        _invariant_spec((1, D), lambda nb, l: (0, 0), sb),           # final LN beta
    ]
    out_spec = _invariant_spec((bb, S, D), lambda nb, l: (nb, 0, 0), sb)

    kernel = functools.partial(
        encoder_fused_kernel,
        num_heads=H, seq_len=S, row_tile=row_tile,
        compute_dtype=compute_dtype, approx_softmax=approx_softmax)

    # INVARIANT: layer axis is the innermost, sequentially iterated ("arbitrary")
    # grid axis; the f32 acc scratch carries the residual stream across it.  The
    # scratch is kept (rather than carrying in o_ref) so the residual stays f32
    # even if the output dtype is bf16.
    return pl.pallas_call(
        kernel,
        out_shape=jax.ShapeDtypeStruct((B, S, D), x.dtype),
        grid=(nb_blocks, L),
        in_specs=in_specs,
        out_specs=out_spec,
        scratch_shapes=[pltpu.VMEM((bb * S, D), jnp.float32)],
        compiler_params=pltpu.CompilerParams(
            dimension_semantics=("parallel", "arbitrary"),
            vmem_limit_bytes=vmem_limit),
    )(x, params["pos"], *stacked, params["ln_g"], params["ln_b"])


def encoder_forward(x, params, num_heads, *, num_batch_blocks=None,
                    compute_dtype=jnp.bfloat16, approx_softmax=True):
    """Fused Encoder forward: pos-add + all layers + final LN in one pallas_call."""
    try:
        return _encoder_pallas(x, params, num_heads,
                               num_batch_blocks=num_batch_blocks,
                               compute_dtype=compute_dtype,
                               approx_softmax=approx_softmax,
                               single_buffer_invariants=True)
    except Exception:
        # pl.Buffered(1) on layer-invariant operands is a pure VMEM optimization;
        # fall back to default double buffering if this jax build rejects it.
        return _encoder_pallas(x, params, num_heads,
                               num_batch_blocks=num_batch_blocks,
                               compute_dtype=compute_dtype,
                               approx_softmax=approx_softmax,
                               single_buffer_invariants=False)


# --------------------------- parameter init ---------------------------------

def init_params(key, num_layers, S, D, M):
    def xavier(k, fan_in, fan_out, shape):
        lim = (6.0 / (fan_in + fan_out)) ** 0.5
        return jax.random.uniform(k, shape, jnp.float32, -lim, lim)

    keys = jax.random.split(key, 1 + num_layers)
    params = {
        "pos": 0.02 * jax.random.normal(keys[0], (1, S, D), jnp.float32),
        "ln_g": jnp.ones((1, D), jnp.float32),
        "ln_b": jnp.zeros((1, D), jnp.float32),
        "layers": [],
    }
    for i in range(num_layers):
        lk = jax.random.split(keys[1 + i], 6)
        params["layers"].append({
            "ln1_g": jnp.ones((1, D), jnp.float32),
            "ln1_b": jnp.zeros((1, D), jnp.float32),
            # MHA in_proj weight (3D, D) xavier-uniform, stored transposed (D, 3D)
            "w_qkv": xavier(lk[0], D, 3 * D, (D, 3 * D)),
            "b_qkv": jnp.zeros((1, 3 * D), jnp.float32),
            "w_o": xavier(lk[1], D, D, (D, D)),
            "b_o": jnp.zeros((1, D), jnp.float32),
            "ln2_g": jnp.ones((1, D), jnp.float32),
            "ln2_b": jnp.zeros((1, D), jnp.float32),
            "w1": xavier(lk[2], D, M, (D, M)),
            "b1": 1e-6 * jax.random.normal(lk[3], (1, M), jnp.float32),
            "w2": xavier(lk[4], M, D, (M, D)),
            "b2": 1e-6 * jax.random.normal(lk[5], (1, D), jnp.float32),
        })
    return params


# --------------------------- pure-JAX reference ------------------------------

def ref_forward(x, params, num_heads):
    def ln(t, g, b):
        m = t.mean(-1, keepdims=True)
        v = ((t - m) ** 2).mean(-1, keepdims=True)
        return (t - m) / jnp.sqrt(v + EPS) * g + b

    B, S, D = x.shape
    dh = D // num_heads
    x = x + params["pos"]
    for p in params["layers"]:
        xn = ln(x, p["ln1_g"], p["ln1_b"])
        qkv = xn @ p["w_qkv"] + p["b_qkv"]
        q, k, v = qkv[..., :D], qkv[..., D:2 * D], qkv[..., 2 * D:]
        split = lambda t: t.reshape(B, S, num_heads, dh).transpose(0, 2, 1, 3)
        qh, kh, vh = split(q), split(k), split(v)
        s = jnp.einsum("bhsd,bhtd->bhst", qh, kh) / (dh ** 0.5)
        a = jax.nn.softmax(s, axis=-1)
        o = jnp.einsum("bhst,bhtd->bhsd", a, vh).transpose(0, 2, 1, 3).reshape(B, S, D)
        x = x + (o @ p["w_o"] + p["b_o"])
        yn = ln(x, p["ln2_g"], p["ln2_b"])
        h = jax.nn.gelu(yn @ p["w1"] + p["b1"], approximate=False)
        x = x + (h @ p["w2"] + p["b2"])
    return ln(x, params["ln_g"], params["ln_b"])


# ---------------------------------- main -------------------------------------

if __name__ == "__main__":
    # Small config consistent with the module: seq_length=8, num_layers=2,
    # num_heads=4, hidden_dim=32, mlp_dim=64, dropout=0, attention_dropout=0, batch=2.
    B, S, D, H, M, L = 2, 8, 32, 4, 64, 2

    key = jax.random.PRNGKey(0)
    k_x, k_p = jax.random.split(key)
    x = jax.random.normal(k_x, (B, S, D), jnp.float32)
    params = init_params(k_p, L, S, D, M)

    ref = jax.block_until_ready(ref_forward(x, params, H))

    # Strict correctness check: f32 matmuls, exact softmax reciprocal.
    out_f32 = jax.block_until_ready(
        encoder_forward(x, params, H, compute_dtype=jnp.float32, approx_softmax=False))
    assert out_f32.shape == (B, S, D)
    assert bool(jnp.allclose(out_f32, ref, atol=1e-4, rtol=1e-4)), "f32 mismatch vs reference"

    # Production configuration: bf16 matmul weights/activations with f32 accumulation
    # and approx (EUP) softmax reciprocal — validated at a bf16-appropriate tolerance.
    out_bf16 = jax.block_until_ready(
        encoder_forward(x, params, H, compute_dtype=jnp.bfloat16, approx_softmax=True))
    assert out_bf16.shape == (B, S, D)
    assert bool(jnp.allclose(out_bf16, ref, atol=5e-2, rtol=5e-2)), "bf16 mismatch vs reference"

    print("KERNEL_OK")
</pallas_src>

<mosaic_0001>
module attributes {stable_mosaic.version = 11 : i64} {
  func.func @encoder_fused_kernel(%arg0: i32, %arg1: i32, %arg2: memref<1x8x32xf32, #tpu.memory_space<vmem>>, %arg3: memref<1x8x32xf32, #tpu.memory_space<vmem>>, %arg4: memref<1x1x32xf32, #tpu.memory_space<vmem>>, %arg5: memref<1x1x32xf32, #tpu.memory_space<vmem>>, %arg6: memref<1x32x96xf32, #tpu.memory_space<vmem>>, %arg7: memref<1x1x96xf32, #tpu.memory_space<vmem>>, %arg8: memref<1x32x32xf32, #tpu.memory_space<vmem>>, %arg9: memref<1x1x32xf32, #tpu.memory_space<vmem>>, %arg10: memref<1x1x32xf32, #tpu.memory_space<vmem>>, %arg11: memref<1x1x32xf32, #tpu.memory_space<vmem>>, %arg12: memref<1x32x64xf32, #tpu.memory_space<vmem>>, %arg13: memref<1x1x64xf32, #tpu.memory_space<vmem>>, %arg14: memref<1x64x32xf32, #tpu.memory_space<vmem>>, %arg15: memref<1x1x32xf32, #tpu.memory_space<vmem>>, %arg16: memref<1x32xf32, #tpu.memory_space<vmem>>, %arg17: memref<1x32xf32, #tpu.memory_space<vmem>>, %arg18: memref<1x8x32xf32, #tpu.memory_space<vmem>>, %arg19: memref<8x32xf32, #tpu.memory_space<vmem>>) attributes {dimension_semantics = [#tpu.dimension_semantics<parallel>, #tpu.dimension_semantics<arbitrary>], iteration_bounds = array<i64: 2, 2>, scalar_prefetch = 0 : i64, scratch_operands = 1 : i64, tpu.core_type = #tpu.core_type<tc>, window_params = [{pipeline_mode = #tpu.pipeline_mode<synchronous>, transform_indices = @transform_0, window_bounds = array<i64: 1, 8, 32>}, {pipeline_mode = #tpu.pipeline_mode<synchronous>, transform_indices = @transform_1, window_bounds = array<i64: 1, 8, 32>}, {transform_indices = @transform_2, window_bounds = array<i64: 1, 1, 32>}, {transform_indices = @transform_3, window_bounds = array<i64: 1, 1, 32>}, {transform_indices = @transform_4, window_bounds = array<i64: 1, 32, 96>}, {transform_indices = @transform_5, window_bounds = array<i64: 1, 1, 96>}, {transform_indices = @transform_6, window_bounds = array<i64: 1, 32, 32>}, {transform_indices = @transform_7, window_bounds = array<i64: 1, 1, 32>}, {transform_indices = @transform_8, window_bounds = array<i64: 1, 1, 32>}, {transform_indices = @transform_9, window_bounds = array<i64: 1, 1, 32>}, {transform_indices = @transform_10, window_bounds = array<i64: 1, 32, 64>}, {transform_indices = @transform_11, window_bounds = array<i64: 1, 1, 64>}, {transform_indices = @transform_12, window_bounds = array<i64: 1, 64, 32>}, {transform_indices = @transform_13, window_bounds = array<i64: 1, 1, 32>}, {pipeline_mode = #tpu.pipeline_mode<synchronous>, transform_indices = @transform_14, window_bounds = array<i64: 1, 32>}, {pipeline_mode = #tpu.pipeline_mode<synchronous>, transform_indices = @transform_15, window_bounds = array<i64: 1, 32>}, {pipeline_mode = #tpu.pipeline_mode<synchronous>, transform_indices = @transform_16, window_bounds = array<i64: 1, 8, 32>}]} {
    %c0_i32 = arith.constant 0 : i32
    %0 = arith.cmpi eq, %arg1, %c0_i32 : i32
    %1 = arith.extui %0 : i1 to i32
    %c0_i32_0 = arith.constant 0 : i32
    %2 = arith.cmpi ne, %1, %c0_i32_0 : i32
    scf.if %2 {
      %c0_81 = arith.constant 0 : index
      %c0_82 = arith.constant 0 : index
      %c0_83 = arith.constant 0 : index
      %169 = vector.load %arg3[%c0_81, %c0_82, %c0_83] : memref<1x8x32xf32, #tpu.memory_space<vmem>>, vector<1x8x32xf32>
      %170 = vector.shape_cast %169 : vector<1x8x32xf32> to vector<8x32xf32>
      %c0_84 = arith.constant 0 : index
      %c0_85 = arith.constant 0 : index
      %c0_86 = arith.constant 0 : index
      %171 = vector.load %arg2[%c0_84, %c0_85, %c0_86] : memref<1x8x32xf32, #tpu.memory_space<vmem>>, vector<1x8x32xf32>
      %172 = vector.shape_cast %171 : vector<1x8x32xf32> to vector<8x32xf32>
      %173 = arith.addf %172, %170 : vector<8x32xf32>
      %c0_87 = arith.constant 0 : index
      %c0_88 = arith.constant 0 : index
      %174 = vector.load %arg19[%c0_87, %c0_88] : memref<8x32xf32, #tpu.memory_space<vmem>>, vector<8x32xf32>
      tpu.vector_store %arg19[%c0_87, %c0_88], %173 {strides = array<i32>} : memref<8x32xf32, #tpu.memory_space<vmem>>, vector<8x32xf32>,
    } else {
    }
    %c0 = arith.constant 0 : index
    %c0_1 = arith.constant 0 : index
    %c0_2 = arith.constant 0 : index
    %3 = vector.load %arg4[%c0, %c0_1, %c0_2] : memref<1x1x32xf32, #tpu.memory_space<vmem>>, vector<1x1x32xf32>
    %4 = vector.shape_cast %3 : vector<1x1x32xf32> to vector<1x32xf32>
    %c0_3 = arith.constant 0 : index
    %c0_4 = arith.constant 0 : index
    %c0_5 = arith.constant 0 : index
    %5 = vector.load %arg5[%c0_3, %c0_4, %c0_5] : memref<1x1x32xf32, #tpu.memory_space<vmem>>, vector<1x1x32xf32>
    %6 = vector.shape_cast %5 : vector<1x1x32xf32> to vector<1x32xf32>
    %c0_6 = arith.constant 0 : index
    %c0_7 = arith.constant 0 : index
    %c0_8 = arith.constant 0 : index
    %7 = vector.load %arg6[%c0_6, %c0_7, %c0_8] : memref<1x32x96xf32, #tpu.memory_space<vmem>>, vector<1x32x96xf32>
    %8 = vector.shape_cast %7 : vector<1x32x96xf32> to vector<32x96xf32>
    %c0_9 = arith.constant 0 : index
    %c0_10 = arith.constant 0 : index
    %c0_11 = arith.constant 0 : index
    %9 = vector.load %arg7[%c0_9, %c0_10, %c0_11] : memref<1x1x96xf32, #tpu.memory_space<vmem>>, vector<1x1x96xf32>
    %10 = vector.shape_cast %9 : vector<1x1x96xf32> to vector<1x96xf32>
    %c0_12 = arith.constant 0 : index
    %c0_13 = arith.constant 0 : index
    %c0_14 = arith.constant 0 : index
    %11 = vector.load %arg8[%c0_12, %c0_13, %c0_14] : memref<1x32x32xf32, #tpu.memory_space<vmem>>, vector<1x32x32xf32>
    %12 = vector.shape_cast %11 : vector<1x32x32xf32> to vector<32x32xf32>
    %c0_15 = arith.constant 0 : index
    %c0_16 = arith.constant 0 : index
    %c0_17 = arith.constant 0 : index
    %13 = vector.load %arg9[%c0_15, %c0_16, %c0_17] : memref<1x1x32xf32, #tpu.memory_space<vmem>>, vector<1x1x32xf32>
    %14 = vector.shape_cast %13 : vector<1x1x32xf32> to vector<1x32xf32>
    %c0_18 = arith.constant 0 : index
    %c0_19 = arith.constant 0 : index
    %c0_20 = arith.constant 0 : index
    %15 = vector.load %arg10[%c0_18, %c0_19, %c0_20] : memref<1x1x32xf32, #tpu.memory_space<vmem>>, vector<1x1x32xf32>
    %16 = vector.shape_cast %15 : vector<1x1x32xf32> to vector<1x32xf32>
    %c0_21 = arith.constant 0 : index
    %c0_22 = arith.constant 0 : index
    %c0_23 = arith.constant 0 : index
    %17 = vector.load %arg11[%c0_21, %c0_22, %c0_23] : memref<1x1x32xf32, #tpu.memory_space<vmem>>, vector<1x1x32xf32>
    %18 = vector.shape_cast %17 : vector<1x1x32xf32> to vector<1x32xf32>
    %c0_24 = arith.constant 0 : index
    %c0_25 = arith.constant 0 : index
    %c0_26 = arith.constant 0 : index
    %19 = vector.load %arg12[%c0_24, %c0_25, %c0_26] : memref<1x32x64xf32, #tpu.memory_space<vmem>>, vector<1x32x64xf32>
    %20 = vector.shape_cast %19 : vector<1x32x64xf32> to vector<32x64xf32>
    %c0_27 = arith.constant 0 : index
    %c0_28 = arith.constant 0 : index
    %c0_29 = arith.constant 0 : index
    %21 = vector.load %arg13[%c0_27, %c0_28, %c0_29] : memref<1x1x64xf32, #tpu.memory_space<vmem>>, vector<1x1x64xf32>
    %22 = vector.shape_cast %21 : vector<1x1x64xf32> to vector<1x64xf32>
    %c0_30 = arith.constant 0 : index
    %c0_31 = arith.constant 0 : index
    %c0_32 = arith.constant 0 : index
    %23 = vector.load %arg14[%c0_30, %c0_31, %c0_32] : memref<1x64x32xf32, #tpu.memory_space<vmem>>, vector<1x64x32xf32>
    %24 = vector.shape_cast %23 : vector<1x64x32xf32> to vector<64x32xf32>
    %c0_33 = arith.constant 0 : index
    %c0_34 = arith.constant 0 : index
    %c0_35 = arith.constant 0 : index
    %25 = vector.load %arg15[%c0_33, %c0_34, %c0_35] : memref<1x1x32xf32, #tpu.memory_space<vmem>>, vector<1x1x32xf32>
    %26 = vector.shape_cast %25 : vector<1x1x32xf32> to vector<1x32xf32>
    %c0_36 = arith.constant 0 : index
    %c0_37 = arith.constant 0 : index
    %27 = vector.load %arg19[%c0_36, %c0_37] : memref<8x32xf32, #tpu.memory_space<vmem>>, vector<8x32xf32>
    %cst = arith.constant dense<0.000000e+00> : vector<8xf32>
    %28 = vector.multi_reduction <add>, %27, %cst [1] : vector<8x32xf32> to vector<8xf32>
    %29 = vector.shape_cast %28 : vector<8xf32> to vector<8x1xf32>
    %cst_38 = arith.constant 3.200000e+01 : f32
    %30 = vector.broadcast %cst_38 : f32 to vector<8x1xf32>
    %31 = arith.divf %29, %30 : vector<8x1xf32>
    %32 = vector.broadcast %31 : vector<8x1xf32> to vector<8x32xf32>
    %33 = arith.subf %27, %32 : vector<8x32xf32>
    %34 = arith.mulf %33, %33 : vector<8x32xf32>
    %cst_39 = arith.constant dense<0.000000e+00> : vector<8xf32>
    %35 = vector.multi_reduction <add>, %34, %cst_39 [1] : vector<8x32xf32> to vector<8xf32>
    %36 = vector.shape_cast %35 : vector<8xf32> to vector<8x1xf32>
    %cst_40 = arith.constant 3.200000e+01 : f32
    %37 = vector.broadcast %cst_40 : f32 to vector<8x1xf32>
    %38 = arith.divf %36, %37 : vector<8x1xf32>
    %39 = vector.broadcast %31 : vector<8x1xf32> to vector<8x32xf32>
    %40 = arith.subf %27, %39 : vector<8x32xf32>
    %cst_41 = arith.constant 9.99999997E-7 : f32
    %41 = vector.broadcast %cst_41 : f32 to vector<8x1xf32>
    %42 = arith.addf %38, %41 : vector<8x1xf32>
    %43 = math.rsqrt %42 : vector<8x1xf32>
    %44 = vector.broadcast %43 : vector<8x1xf32> to vector<8x32xf32>
    %45 = arith.mulf %40, %44 : vector<8x32xf32>
    %46 = vector.broadcast %4 : vector<1x32xf32> to vector<8x32xf32>
    %47 = arith.mulf %45, %46 : vector<8x32xf32>
    %48 = vector.broadcast %6 : vector<1x32xf32> to vector<8x32xf32>
    %49 = arith.addf %47, %48 : vector<8x32xf32>
    %cst_42 = arith.constant dense<0.000000e+00> : vector<8x96xf32>
    %50 = tpu.matmul %49, %8, %cst_42 {dimension_numbers = #tpu.dot_dimension_numbers<[1], [0], [0], [1], [0, 0, 1, 1], [], []>} : vector<8x32xf32>, vector<32x96xf32>, vector<8x96xf32> -> vector<8x96xf32>
    %51 = vector.broadcast %10 : vector<1x96xf32> to vector<8x96xf32>
    %52 = arith.addf %50, %51 : vector<8x96xf32>
    %53 = vector.extract_strided_slice %52 {offsets = [0, 0], sizes = [8, 8], strides = [1, 1]} : vector<8x96xf32> to vector<8x8xf32>
    %cst_43 = arith.constant 0.353553385 : f32
    %54 = vector.broadcast %cst_43 : f32 to vector<8x8xf32>
    %55 = arith.mulf %53, %54 : vector<8x8xf32>
    %56 = vector.extract_strided_slice %52 {offsets = [0, 32], sizes = [8, 8], strides = [1, 1]} : vector<8x96xf32> to vector<8x8xf32>
    %57 = vector.extract_strided_slice %52 {offsets = [0, 64], sizes = [8, 8], strides = [1, 1]} : vector<8x96xf32> to vector<8x8xf32>
    %cst_44 = arith.constant dense<0.000000e+00> : vector<8x8xf32>
    %58 = tpu.matmul %55, %56, %cst_44 {dimension_numbers = #tpu.dot_dimension_numbers<[1], [1], [0], [0], [0, 0, 1, 0], [], []>} : vector<8x8xf32>, vector<8x8xf32>, vector<8x8xf32> -> vector<8x8xf32>
    %cst_45 = arith.constant dense<0xFF800000> : vector<8xf32>
    %59 = vector.multi_reduction <maximumf>, %58, %cst_45 [1] : vector<8x8xf32> to vector<8xf32>
    %60 = vector.shape_cast %59 : vector<8xf32> to vector<8x1xf32>
    %61 = vector.broadcast %60 : vector<8x1xf32> to vector<8x8xf32>
    %62 = arith.subf %58, %61 : vector<8x8xf32>
    %63 = math.exp %62 : vector<8x8xf32>
    %cst_46 = arith.constant dense<0.000000e+00> : vector<8xf32>
    %64 = vector.multi_reduction <add>, %63, %cst_46 [1] : vector<8x8xf32> to vector<8xf32>
    %65 = vector.shape_cast %64 : vector<8xf32> to vector<8x1xf32>
    %66 = tpu.reciprocal %65 : vector<8x1xf32> -> vector<8x1xf32>
    %67 = vector.broadcast %66 : vector<8x1xf32> to vector<8x8xf32>
    %68 = arith.mulf %63, %67 : vector<8x8xf32>
    %cst_47 = arith.constant dense<0.000000e+00> : vector<8x8xf32>
    %69 = tpu.matmul %68, %57, %cst_47 {dimension_numbers = #tpu.dot_dimension_numbers<[1], [0], [0], [1], [0, 0, 1, 1], [], []>} : vector<8x8xf32>, vector<8x8xf32>, vector<8x8xf32> -> vector<8x8xf32>
    %70 = vector.extract_strided_slice %52 {offsets = [0, 8], sizes = [8, 8], strides = [1, 1]} : vector<8x96xf32> to vector<8x8xf32>
    %cst_48 = arith.constant 0.353553385 : f32
    %71 = vector.broadcast %cst_48 : f32 to vector<8x8xf32>
    %72 = arith.mulf %70, %71 : vector<8x8xf32>
    %73 = vector.extract_strided_slice %52 {offsets = [0, 40], sizes = [8, 8], strides = [1, 1]} : vector<8x96xf32> to vector<8x8xf32>
    %74 = vector.extract_strided_slice %52 {offsets = [0, 72], sizes = [8, 8], strides = [1, 1]} : vector<8x96xf32> to vector<8x8xf32>
    %cst_49 = arith.constant dense<0.000000e+00> : vector<8x8xf32>
    %75 = tpu.matmul %72, %73, %cst_49 {dimension_numbers = #tpu.dot_dimension_numbers<[1], [1], [0], [0], [0, 0, 1, 0], [], []>} : vector<8x8xf32>, vector<8x8xf32>, vector<8x8xf32> -> vector<8x8xf32>
    %cst_50 = arith.constant dense<0xFF800000> : vector<8xf32>
    %76 = vector.multi_reduction <maximumf>, %75, %cst_50 [1] : vector<8x8xf32> to vector<8xf32>
    %77 = vector.shape_cast %76 : vector<8xf32> to vector<8x1xf32>
    %78 = vector.broadcast %77 : vector<8x1xf32> to vector<8x8xf32>
    %79 = arith.subf %75, %78 : vector<8x8xf32>
    %80 = math.exp %79 : vector<8x8xf32>
    %cst_51 = arith.constant dense<0.000000e+00> : vector<8xf32>
    %81 = vector.multi_reduction <add>, %80, %cst_51 [1] : vector<8x8xf32> to vector<8xf32>
    %82 = vector.shape_cast %81 : vector<8xf32> to vector<8x1xf32>
    %83 = tpu.reciprocal %82 : vector<8x1xf32> -> vector<8x1xf32>
    %84 = vector.broadcast %83 : vector<8x1xf32> to vector<8x8xf32>
    %85 = arith.mulf %80, %84 : vector<8x8xf32>
    %cst_52 = arith.constant dense<0.000000e+00> : vector<8x8xf32>
    %86 = tpu.matmul %85, %74, %cst_52 {dimension_numbers = #tpu.dot_dimension_numbers<[1], [0], [0], [1], [0, 0, 1, 1], [], []>} : vector<8x8xf32>, vector<8x8xf32>, vector<8x8xf32> -> vector<8x8xf32>
    %87 = vector.extract_strided_slice %52 {offsets = [0, 16], sizes = [8, 8], strides = [1, 1]} : vector<8x96xf32> to vector<8x8xf32>
    %cst_53 = arith.constant 0.353553385 : f32
    %88 = vector.broadcast %cst_53 : f32 to vector<8x8xf32>
    %89 = arith.mulf %87, %88 : vector<8x8xf32>
    %90 = vector.extract_strided_slice %52 {offsets = [0, 48], sizes = [8, 8], strides = [1, 1]} : vector<8x96xf32> to vector<8x8xf32>
    %91 = vector.extract_strided_slice %52 {offsets = [0, 80], sizes = [8, 8], strides = [1, 1]} : vector<8x96xf32> to vector<8x8xf32>
    %cst_54 = arith.constant dense<0.000000e+00> : vector<8x8xf32>
    %92 = tpu.matmul %89, %90, %cst_54 {dimension_numbers = #tpu.dot_dimension_numbers<[1], [1], [0], [0], [0, 0, 1, 0], [], []>} : vector<8x8xf32>, vector<8x8xf32>, vector<8x8xf32> -> vector<8x8xf32>
    %cst_55 = arith.constant dense<0xFF800000> : vector<8xf32>
    %93 = vector.multi_reduction <maximumf>, %92, %cst_55 [1] : vector<8x8xf32> to vector<8xf32>
    %94 = vector.shape_cast %93 : vector<8xf32> to vector<8x1xf32>
    %95 = vector.broadcast %94 : vector<8x1xf32> to vector<8x8xf32>
    %96 = arith.subf %92, %95 : vector<8x8xf32>
    %97 = math.exp %96 : vector<8x8xf32>
    %cst_56 = arith.constant dense<0.000000e+00> : vector<8xf32>
    %98 = vector.multi_reduction <add>, %97, %cst_56 [1] : vector<8x8xf32> to vector<8xf32>
    %99 = vector.shape_cast %98 : vector<8xf32> to vector<8x1xf32>
    %100 = tpu.reciprocal %99 : vector<8x1xf32> -> vector<8x1xf32>
    %101 = vector.broadcast %100 : vector<8x1xf32> to vector<8x8xf32>
    %102 = arith.mulf %97, %101 : vector<8x8xf32>
    %cst_57 = arith.constant dense<0.000000e+00> : vector<8x8xf32>
    %103 = tpu.matmul %102, %91, %cst_57 {dimension_numbers = #tpu.dot_dimension_numbers<[1], [0], [0], [1], [0, 0, 1, 1], [], []>} : vector<8x8xf32>, vector<8x8xf32>, vector<8x8xf32> -> vector<8x8xf32>
    %104 = vector.extract_strided_slice %52 {offsets = [0, 24], sizes = [8, 8], strides = [1, 1]} : vector<8x96xf32> to vector<8x8xf32>
    %cst_58 = arith.constant 0.353553385 : f32
    %105 = vector.broadcast %cst_58 : f32 to vector<8x8xf32>
    %106 = arith.mulf %104, %105 : vector<8x8xf32>
    %107 = vector.extract_strided_slice %52 {offsets = [0, 56], sizes = [8, 8], strides = [1, 1]} : vector<8x96xf32> to vector<8x8xf32>
    %108 = vector.extract_strided_slice %52 {offsets = [0, 88], sizes = [8, 8], strides = [1, 1]} : vector<8x96xf32> to vector<8x8xf32>
    %cst_59 = arith.constant dense<0.000000e+00> : vector<8x8xf32>
    %109 = tpu.matmul %106, %107, %cst_59 {dimension_numbers = #tpu.dot_dimension_numbers<[1], [1], [0], [0], [0, 0, 1, 0], [], []>} : vector<8x8xf32>, vector<8x8xf32>, vector<8x8xf32> -> vector<8x8xf32>
    %cst_60 = arith.constant dense<0xFF800000> : vector<8xf32>
    %110 = vector.multi_reduction <maximumf>, %109, %cst_60 [1] : vector<8x8xf32> to vector<8xf32>
    %111 = vector.shape_cast %110 : vector<8xf32> to vector<8x1xf32>
    %112 = vector.broadcast %111 : vector<8x1xf32> to vector<8x8xf32>
    %113 = arith.subf %109, %112 : vector<8x8xf32>
    %114 = math.exp %113 : vector<8x8xf32>
    %cst_61 = arith.constant dense<0.000000e+00> : vector<8xf32>
    %115 = vector.multi_reduction <add>, %114, %cst_61 [1] : vector<8x8xf32> to vector<8xf32>
    %116 = vector.shape_cast %115 : vector<8xf32> to vector<8x1xf32>
    %117 = tpu.reciprocal %116 : vector<8x1xf32> -> vector<8x1xf32>
    %118 = vector.broadcast %117 : vector<8x1xf32> to vector<8x8xf32>
    %119 = arith.mulf %114, %118 : vector<8x8xf32>
    %cst_62 = arith.constant dense<0.000000e+00> : vector<8x8xf32>
    %120 = tpu.matmul %119, %108, %cst_62 {dimension_numbers = #tpu.dot_dimension_numbers<[1], [0], [0], [1], [0, 0, 1, 1], [], []>} : vector<8x8xf32>, vector<8x8xf32>, vector<8x8xf32> -> vector<8x8xf32>
    %121 = tpu.concatenate %69, %86, %103, %120 in 1 : vector<8x8xf32>, vector<8x8xf32>, vector<8x8xf32>, vector<8x8xf32> -> vector<8x32xf32>
    %cst_63 = arith.constant dense<0.000000e+00> : vector<8x32xf32>
    %122 = tpu.matmul %121, %12, %cst_63 {dimension_numbers = #tpu.dot_dimension_numbers<[1], [0], [0], [1], [0, 0, 1, 1], [], []>} : vector<8x32xf32>, vector<32x32xf32>, vector<8x32xf32> -> vector<8x32xf32>
    %123 = vector.broadcast %14 : vector<1x32xf32> to vector<8x32xf32>
    %124 = arith.addf %122, %123 : vector<8x32xf32>
    %125 = arith.addf %27, %124 : vector<8x32xf32>
    %c0_64 = arith.constant 0 : index
    %c0_65 = arith.constant 0 : index
    %126 = vector.load %arg19[%c0_64, %c0_65] : memref<8x32xf32, #tpu.memory_space<vmem>>, vector<8x32xf32>
    tpu.vector_store %arg19[%c0_64, %c0_65], %125 {strides = array<i32>} : memref<8x32xf32, #tpu.memory_space<vmem>>, vector<8x32xf32>,
    %c0_66 = arith.constant 0 : index
    %c0_67 = arith.constant 0 : index
    %127 = vector.load %arg19[%c0_66, %c0_67] : memref<8x32xf32, #tpu.memory_space<vmem>>, vector<8x32xf32>
    %cst_68 = arith.constant dense<0.000000e+00> : vector<8xf32>
    %128 = vector.multi_reduction <add>, %127, %cst_68 [1] : vector<8x32xf32> to vector<8xf32>
    %129 = vector.shape_cast %128 : vector<8xf32> to vector<8x1xf32>
    %cst_69 = arith.constant 3.200000e+01 : f32
    %130 = vector.broadcast %cst_69 : f32 to vector<8x1xf32>
    %131 = arith.divf %129, %130 : vector<8x1xf32>
    %132 = vector.broadcast %131 : vector<8x1xf32> to vector<8x32xf32>
    %133 = arith.subf %127, %132 : vector<8x32xf32>
    %134 = arith.mulf %133, %133 : vector<8x32xf32>
    %cst_70 = arith.constant dense<0.000000e+00> : vector<8xf32>
    %135 = vector.multi_reduction <add>, %134, %cst_70 [1] : vector<8x32xf32> to vector<8xf32>
    %136 = vector.shape_cast %135 : vector<8xf32> to vector<8x1xf32>
    %cst_71 = arith.constant 3.200000e+01 : f32
    %137 = vector.broadcast %cst_71 : f32 to vector<8x1xf32>
    %138 = arith.divf %136, %137 : vector<8x1xf32>
    %139 = vector.broadcast %131 : vector<8x1xf32> to vector<8x32xf32>
    %140 = arith.subf %127, %139 : vector<8x32xf32>
    %cst_72 = arith.constant 9.99999997E-7 : f32
    %141 = vector.broadcast %cst_72 : f32 to vector<8x1xf32>
    %142 = arith.addf %138, %141 : vector<8x1xf32>
    %143 = math.rsqrt %142 : vector<8x1xf32>
    %144 = vector.broadcast %143 : vector<8x1xf32> to vector<8x32xf32>
    %145 = arith.mulf %140, %144 : vector<8x32xf32>
    %146 = vector.broadcast %16 : vector<1x32xf32> to vector<8x32xf32>
    %147 = arith.mulf %145, %146 : vector<8x32xf32>
    %148 = vector.broadcast %18 : vector<1x32xf32> to vector<8x32xf32>
    %149 = arith.addf %147, %148 : vector<8x32xf32>
    %cst_73 = arith.constant dense<0.000000e+00> : vector<8x64xf32>
    %150 = tpu.matmul %149, %20, %cst_73 {dimension_numbers = #tpu.dot_dimension_numbers<[1], [0], [0], [1], [0, 0, 1, 1], [], []>} : vector<8x32xf32>, vector<32x64xf32>, vector<8x64xf32> -> vector<8x64xf32>
    %151 = vector.broadcast %22 : vector<1x64xf32> to vector<8x64xf32>
    %152 = arith.addf %150, %151 : vector<8x64xf32>
    %cst_74 = arith.constant 5.000000e-01 : f32
    %153 = vector.broadcast %cst_74 : f32 to vector<8x64xf32>
    %154 = arith.mulf %153, %152 : vector<8x64xf32>
    %cst_75 = arith.constant 0.707106769 : f32
    %155 = vector.broadcast %cst_75 : f32 to vector<8x64xf32>
    %156 = arith.mulf %152, %155 : vector<8x64xf32>
    %157 = math.erf %156 : vector<8x64xf32>
    %cst_76 = arith.constant 1.000000e+00 : f32
    %158 = vector.broadcast %cst_76 : f32 to vector<8x64xf32>
    %159 = arith.addf %158, %157 : vector<8x64xf32>
    %160 = arith.mulf %154, %159 : vector<8x64xf32>
    %cst_77 = arith.constant dense<0.000000e+00> : vector<8x32xf32>
    %161 = tpu.matmul %160, %24, %cst_77 {dimension_numbers = #tpu.dot_dimension_numbers<[1], [0], [0], [1], [0, 0, 1, 1], [], []>} : vector<8x64xf32>, vector<64x32xf32>, vector<8x32xf32> -> vector<8x32xf32>
    %162 = vector.broadcast %26 : vector<1x32xf32> to vector<8x32xf32>
    %163 = arith.addf %161, %162 : vector<8x32xf32>
    %164 = arith.addf %127, %163 : vector<8x32xf32>
    %c0_78 = arith.constant 0 : index
    %c0_79 = arith.constant 0 : index
    %165 = vector.load %arg19[%c0_78, %c0_79] : memref<8x32xf32, #tpu.memory_space<vmem>>, vector<8x32xf32>
    tpu.vector_store %arg19[%c0_78, %c0_79], %164 {strides = array<i32>} : memref<8x32xf32, #tpu.memory_space<vmem>>, vector<8x32xf32>,
    %c1_i32 = arith.constant 1 : i32
    %166 = arith.cmpi eq, %arg1, %c1_i32 : i32
    %167 = arith.extui %166 : i1 to i32
    %c0_i32_80 = arith.constant 0 : i32
    %168 = arith.cmpi ne, %167, %c0_i32_80 : i32
    scf.if %168 {
      %c0_81 = arith.constant 0 : index
      %c0_82 = arith.constant 0 : index
      %169 = vector.load %arg16[%c0_81, %c0_82] : memref<1x32xf32, #tpu.memory_space<vmem>>, vector<1x32xf32>
      %c0_83 = arith.constant 0 : index
      %c0_84 = arith.constant 0 : index
      %170 = vector.load %arg17[%c0_83, %c0_84] : memref<1x32xf32, #tpu.memory_space<vmem>>, vector<1x32xf32>
      %c0_85 = arith.constant 0 : index
      %c0_86 = arith.constant 0 : index
      %171 = vector.load %arg19[%c0_85, %c0_86] : memref<8x32xf32, #tpu.memory_space<vmem>>, vector<8x32xf32>
      %cst_87 = arith.constant dense<0.000000e+00> : vector<8xf32>
      %172 = vector.multi_reduction <add>, %171, %cst_87 [1] : vector<8x32xf32> to vector<8xf32>
      %173 = vector.shape_cast %172 : vector<8xf32> to vector<8x1xf32>
      %cst_88 = arith.constant 3.200000e+01 : f32
      %174 = vector.broadcast %cst_88 : f32 to vector<8x1xf32>
      %175 = arith.divf %173, %174 : vector<8x1xf32>
      %176 = vector.broadcast %175 : vector<8x1xf32> to vector<8x32xf32>
      %177 = arith.subf %171, %176 : vector<8x32xf32>
      %178 = arith.mulf %177, %177 : vector<8x32xf32>
      %cst_89 = arith.constant dense<0.000000e+00> : vector<8xf32>
      %179 = vector.multi_reduction <add>, %178, %cst_89 [1] : vector<8x32xf32> to vector<8xf32>
      %180 = vector.shape_cast %179 : vector<8xf32> to vector<8x1xf32>
      %cst_90 = arith.constant 3.200000e+01 : f32
      %181 = vector.broadcast %cst_90 : f32 to vector<8x1xf32>
      %182 = arith.divf %180, %181 : vector<8x1xf32>
      %183 = vector.broadcast %175 : vector<8x1xf32> to vector<8x32xf32>
      %184 = arith.subf %171, %183 : vector<8x32xf32>
      %cst_91 = arith.constant 9.99999997E-7 : f32
      %185 = vector.broadcast %cst_91 : f32 to vector<8x1xf32>
      %186 = arith.addf %182, %185 : vector<8x1xf32>
      %187 = math.rsqrt %186 : vector<8x1xf32>
      %188 = vector.broadcast %187 : vector<8x1xf32> to vector<8x32xf32>
      %189 = arith.mulf %184, %188 : vector<8x32xf32>
      %190 = vector.broadcast %169 : vector<1x32xf32> to vector<8x32xf32>
      %191 = arith.mulf %189, %190 : vector<8x32xf32>
      %192 = vector.broadcast %170 : vector<1x32xf32> to vector<8x32xf32>
      %193 = arith.addf %191, %192 : vector<8x32xf32>
      %c0_92 = arith.constant 0 : index
      %c0_93 = arith.constant 0 : index
      %c0_94 = arith.constant 0 : index
      %194 = vector.load %arg18[%c0_92, %c0_93, %c0_94] : memref<1x8x32xf32, #tpu.memory_space<vmem>>, vector<1x8x32xf32>
      %195 = vector.shape_cast %194 : vector<1x8x32xf32> to vector<8x32xf32>
      %196 = vector.shape_cast %193 : vector<8x32xf32> to vector<1x8x32xf32>
      tpu.vector_store %arg18[%c0_92, %c0_93, %c0_94], %196 {strides = array<i32>} : memref<1x8x32xf32, #tpu.memory_space<vmem>>, vector<1x8x32xf32>,
    } else {
    }
    return
  }
  func.func @transform_0(%arg0: i32, %arg1: i32) -> (i32, i32, i32) {
    %c0_i32 = arith.constant 0 : i32
    %c0_i32_0 = arith.constant 0 : i32
    %c0_i32_1 = arith.constant 0 : i32
    return %arg0, %c0_i32, %c0_i32_0 : i32, i32, i32
  }
  func.func @transform_1(%arg0: i32, %arg1: i32) -> (i32, i32, i32) {
    %c0_i32 = arith.constant 0 : i32
    %c0_i32_0 = arith.constant 0 : i32
    %c0_i32_1 = arith.constant 0 : i32
    %c0_i32_2 = arith.constant 0 : i32
    return %c0_i32, %c0_i32_0, %c0_i32_1 : i32, i32, i32
  }
  func.func @transform_2(%arg0: i32, %arg1: i32) -> (i32, i32, i32) {
    %c0_i32 = arith.constant 0 : i32
    %c0_i32_0 = arith.constant 0 : i32
    %c0_i32_1 = arith.constant 0 : i32
    return %arg1, %c0_i32, %c0_i32_0 : i32, i32, i32
  }
  func.func @transform_3(%arg0: i32, %arg1: i32) -> (i32, i32, i32) {
    %c0_i32 = arith.constant 0 : i32
    %c0_i32_0 = arith.constant 0 : i32
    %c0_i32_1 = arith.constant 0 : i32
    return %arg1, %c0_i32, %c0_i32_0 : i32, i32, i32
  }
  func.func @transform_4(%arg0: i32, %arg1: i32) -> (i32, i32, i32) {
    %c0_i32 = arith.constant 0 : i32
    %c0_i32_0 = arith.constant 0 : i32
    %c0_i32_1 = arith.constant 0 : i32
    return %arg1, %c0_i32, %c0_i32_0 : i32, i32, i32
  }
  func.func @transform_5(%arg0: i32, %arg1: i32) -> (i32, i32, i32) {
    %c0_i32 = arith.constant 0 : i32
    %c0_i32_0 = arith.constant 0 : i32
    %c0_i32_1 = arith.constant 0 : i32
    return %arg1, %c0_i32, %c0_i32_0 : i32, i32, i32
  }
  func.func @transform_6(%arg0: i32, %arg1: i32) -> (i32, i32, i32) {
    %c0_i32 = arith.constant 0 : i32
    %c0_i32_0 = arith.constant 0 : i32
    %c0_i32_1 = arith.constant 0 : i32
    return %arg1, %c0_i32, %c0_i32_0 : i32, i32, i32
  }
  func.func @transform_7(%arg0: i32, %arg1: i32) -> (i32, i32, i32) {
    %c0_i32 = arith.constant 0 : i32
    %c0_i32_0 = arith.constant 0 : i32
    %c0_i32_1 = arith.constant 0 : i32
    return %arg1, %c0_i32, %c0_i32_0 : i32, i32, i32
  }
  func.func @transform_8(%arg0: i32, %arg1: i32) -> (i32, i32, i32) {
    %c0_i32 = arith.constant 0 : i32
    %c0_i32_0 = arith.constant 0 : i32
    %c0_i32_1 = arith.constant 0 : i32
    return %arg1, %c0_i32, %c0_i32_0 : i32, i32, i32
  }
  func.func @transform_9(%arg0: i32, %arg1: i32) -> (i32, i32, i32) {
    %c0_i32 = arith.constant 0 : i32
    %c0_i32_0 = arith.constant 0 : i32
    %c0_i32_1 = arith.constant 0 : i32
    return %arg1, %c0_i32, %c0_i32_0 : i32, i32, i32
  }
  func.func @transform_10(%arg0: i32, %arg1: i32) -> (i32, i32, i32) {
    %c0_i32 = arith.constant 0 : i32
    %c0_i32_0 = arith.constant 0 : i32
    %c0_i32_1 = arith.constant 0 : i32
    return %arg1, %c0_i32, %c0_i32_0 : i32, i32, i32
  }
  func.func @transform_11(%arg0: i32, %arg1: i32) -> (i32, i32, i32) {
    %c0_i32 = arith.constant 0 : i32
    %c0_i32_0 = arith.constant 0 : i32
    %c0_i32_1 = arith.constant 0 : i32
    return %arg1, %c0_i32, %c0_i32_0 : i32, i32, i32
  }
  func.func @transform_12(%arg0: i32, %arg1: i32) -> (i32, i32, i32) {
    %c0_i32 = arith.constant 0 : i32
    %c0_i32_0 = arith.constant 0 : i32
    %c0_i32_1 = arith.constant 0 : i32
    return %arg1, %c0_i32, %c0_i32_0 : i32, i32, i32
  }
  func.func @transform_13(%arg0: i32, %arg1: i32) -> (i32, i32, i32) {
    %c0_i32 = arith.constant 0 : i32
    %c0_i32_0 = arith.constant 0 : i32
    %c0_i32_1 = arith.constant 0 : i32
    return %arg1, %c0_i32, %c0_i32_0 : i32, i32, i32
  }
  func.func @transform_14(%arg0: i32, %arg1: i32) -> (i32, i32) {
    %c0_i32 = arith.constant 0 : i32
    %c0_i32_0 = arith.constant 0 : i32
    %c0_i32_1 = arith.constant 0 : i32
    return %c0_i32, %c0_i32_0 : i32, i32
  }
  func.func @transform_15(%arg0: i32, %arg1: i32) -> (i32, i32) {
    %c0_i32 = arith.constant 0 : i32
    %c0_i32_0 = arith.constant 0 : i32
    %c0_i32_1 = arith.constant 0 : i32
    return %c0_i32, %c0_i32_0 : i32, i32
  }
  func.func @transform_16(%arg0: i32, %arg1: i32) -> (i32, i32, i32) {
    %c0_i32 = arith.constant 0 : i32
    %c0_i32_0 = arith.constant 0 : i32
    %c0_i32_1 = arith.constant 0 : i32
    return %arg0, %c0_i32, %c0_i32_0 : i32, i32, i32
  }
}

module attributes {stable_mosaic.version = 11 : i64} {
  func.func @encoder_fused_kernel(%arg0: i32, %arg1: i32, %arg2: memref<1x8x32xf32, #tpu.memory_space<vmem>>, %arg3: memref<1x8x32xf32, #tpu.memory_space<vmem>>, %arg4: memref<1x1x32xf32, #tpu.memory_space<vmem>>, %arg5: memref<1x1x32xf32, #tpu.memory_space<vmem>>, %arg6: memref<1x32x96xf32, #tpu.memory_space<vmem>>, %arg7: memref<1x1x96xf32, #tpu.memory_space<vmem>>, %arg8: memref<1x32x32xf32, #tpu.memory_space<vmem>>, %arg9: memref<1x1x32xf32, #tpu.memory_space<vmem>>, %arg10: memref<1x1x32xf32, #tpu.memory_space<vmem>>, %arg11: memref<1x1x32xf32, #tpu.memory_space<vmem>>, %arg12: memref<1x32x64xf32, #tpu.memory_space<vmem>>, %arg13: memref<1x1x64xf32, #tpu.memory_space<vmem>>, %arg14: memref<1x64x32xf32, #tpu.memory_space<vmem>>, %arg15: memref<1x1x32xf32, #tpu.memory_space<vmem>>, %arg16: memref<1x32xf32, #tpu.memory_space<vmem>>, %arg17: memref<1x32xf32, #tpu.memory_space<vmem>>, %arg18: memref<1x8x32xf32, #tpu.memory_space<vmem>>, %arg19: memref<8x32xf32, #tpu.memory_space<vmem>>) attributes {dimension_semantics = [#tpu.dimension_semantics<parallel>, #tpu.dimension_semantics<arbitrary>], iteration_bounds = array<i64: 2, 2>, scalar_prefetch = 0 : i64, scratch_operands = 1 : i64, tpu.core_type = #tpu.core_type<tc>, window_params = [{transform_indices = @transform_0, window_bounds = array<i64: 1, 8, 32>}, {pipeline_mode = #tpu.pipeline_mode<synchronous>, transform_indices = @transform_1, window_bounds = array<i64: 1, 8, 32>}, {transform_indices = @transform_2, window_bounds = array<i64: 1, 1, 32>}, {transform_indices = @transform_3, window_bounds = array<i64: 1, 1, 32>}, {transform_indices = @transform_4, window_bounds = array<i64: 1, 32, 96>}, {transform_indices = @transform_5, window_bounds = array<i64: 1, 1, 96>}, {transform_indices = @transform_6, window_bounds = array<i64: 1, 32, 32>}, {transform_indices = @transform_7, window_bounds = array<i64: 1, 1, 32>}, {transform_indices = @transform_8, window_bounds = array<i64: 1, 1, 32>}, {transform_indices = @transform_9, window_bounds = array<i64: 1, 1, 32>}, {transform_indices = @transform_10, window_bounds = array<i64: 1, 32, 64>}, {transform_indices = @transform_11, window_bounds = array<i64: 1, 1, 64>}, {transform_indices = @transform_12, window_bounds = array<i64: 1, 64, 32>}, {transform_indices = @transform_13, window_bounds = array<i64: 1, 1, 32>}, {pipeline_mode = #tpu.pipeline_mode<synchronous>, transform_indices = @transform_14, window_bounds = array<i64: 1, 32>}, {pipeline_mode = #tpu.pipeline_mode<synchronous>, transform_indices = @transform_15, window_bounds = array<i64: 1, 32>}, {transform_indices = @transform_16, window_bounds = array<i64: 1, 8, 32>}]} {
    %c0_i32 = arith.constant 0 : i32
    %0 = arith.cmpi eq, %arg1, %c0_i32 : i32
    %1 = arith.extui %0 : i1 to i32
    %c0_i32_0 = arith.constant 0 : i32
    %2 = arith.cmpi ne, %1, %c0_i32_0 : i32
    scf.if %2 {
      %c0_81 = arith.constant 0 : index
      %c0_82 = arith.constant 0 : index
      %c0_83 = arith.constant 0 : index
      %169 = vector.load %arg3[%c0_81, %c0_82, %c0_83] : memref<1x8x32xf32, #tpu.memory_space<vmem>>, vector<1x8x32xf32>
      %170 = vector.shape_cast %169 : vector<1x8x32xf32> to vector<8x32xf32>
      %c0_84 = arith.constant 0 : index
      %c0_85 = arith.constant 0 : index
      %c0_86 = arith.constant 0 : index
      %171 = vector.load %arg2[%c0_84, %c0_85, %c0_86] : memref<1x8x32xf32, #tpu.memory_space<vmem>>, vector<1x8x32xf32>
      %172 = vector.shape_cast %171 : vector<1x8x32xf32> to vector<8x32xf32>
      %173 = arith.addf %172, %170 : vector<8x32xf32>
      %c0_87 = arith.constant 0 : index
      %c0_88 = arith.constant 0 : index
      %174 = vector.load %arg19[%c0_87, %c0_88] : memref<8x32xf32, #tpu.memory_space<vmem>>, vector<8x32xf32>
      tpu.vector_store %arg19[%c0_87, %c0_88], %173 {strides = array<i32>} : memref<8x32xf32, #tpu.memory_space<vmem>>, vector<8x32xf32>,
    } else {
    }
    %c0 = arith.constant 0 : index
    %c0_1 = arith.constant 0 : index
    %c0_2 = arith.constant 0 : index
    %3 = vector.load %arg4[%c0, %c0_1, %c0_2] : memref<1x1x32xf32, #tpu.memory_space<vmem>>, vector<1x1x32xf32>
    %4 = vector.shape_cast %3 : vector<1x1x32xf32> to vector<1x32xf32>
    %c0_3 = arith.constant 0 : index
    %c0_4 = arith.constant 0 : index
    %c0_5 = arith.constant 0 : index
    %5 = vector.load %arg5[%c0_3, %c0_4, %c0_5] : memref<1x1x32xf32, #tpu.memory_space<vmem>>, vector<1x1x32xf32>
    %6 = vector.shape_cast %5 : vector<1x1x32xf32> to vector<1x32xf32>
    %c0_6 = arith.constant 0 : index
    %c0_7 = arith.constant 0 : index
    %c0_8 = arith.constant 0 : index
    %7 = vector.load %arg6[%c0_6, %c0_7, %c0_8] : memref<1x32x96xf32, #tpu.memory_space<vmem>>, vector<1x32x96xf32>
    %8 = vector.shape_cast %7 : vector<1x32x96xf32> to vector<32x96xf32>
    %c0_9 = arith.constant 0 : index
    %c0_10 = arith.constant 0 : index
    %c0_11 = arith.constant 0 : index
    %9 = vector.load %arg7[%c0_9, %c0_10, %c0_11] : memref<1x1x96xf32, #tpu.memory_space<vmem>>, vector<1x1x96xf32>
    %10 = vector.shape_cast %9 : vector<1x1x96xf32> to vector<1x96xf32>
    %c0_12 = arith.constant 0 : index
    %c0_13 = arith.constant 0 : index
    %c0_14 = arith.constant 0 : index
    %11 = vector.load %arg8[%c0_12, %c0_13, %c0_14] : memref<1x32x32xf32, #tpu.memory_space<vmem>>, vector<1x32x32xf32>
    %12 = vector.shape_cast %11 : vector<1x32x32xf32> to vector<32x32xf32>
    %c0_15 = arith.constant 0 : index
    %c0_16 = arith.constant 0 : index
    %c0_17 = arith.constant 0 : index
    %13 = vector.load %arg9[%c0_15, %c0_16, %c0_17] : memref<1x1x32xf32, #tpu.memory_space<vmem>>, vector<1x1x32xf32>
    %14 = vector.shape_cast %13 : vector<1x1x32xf32> to vector<1x32xf32>
    %c0_18 = arith.constant 0 : index
    %c0_19 = arith.constant 0 : index
    %c0_20 = arith.constant 0 : index
    %15 = vector.load %arg10[%c0_18, %c0_19, %c0_20] : memref<1x1x32xf32, #tpu.memory_space<vmem>>, vector<1x1x32xf32>
    %16 = vector.shape_cast %15 : vector<1x1x32xf32> to vector<1x32xf32>
    %c0_21 = arith.constant 0 : index
    %c0_22 = arith.constant 0 : index
    %c0_23 = arith.constant 0 : index
    %17 = vector.load %arg11[%c0_21, %c0_22, %c0_23] : memref<1x1x32xf32, #tpu.memory_space<vmem>>, vector<1x1x32xf32>
    %18 = vector.shape_cast %17 : vector<1x1x32xf32> to vector<1x32xf32>
    %c0_24 = arith.constant 0 : index
    %c0_25 = arith.constant 0 : index
    %c0_26 = arith.constant 0 : index
    %19 = vector.load %arg12[%c0_24, %c0_25, %c0_26] : memref<1x32x64xf32, #tpu.memory_space<vmem>>, vector<1x32x64xf32>
    %20 = vector.shape_cast %19 : vector<1x32x64xf32> to vector<32x64xf32>
    %c0_27 = arith.constant 0 : index
    %c0_28 = arith.constant 0 : index
    %c0_29 = arith.constant 0 : index
    %21 = vector.load %arg13[%c0_27, %c0_28, %c0_29] : memref<1x1x64xf32, #tpu.memory_space<vmem>>, vector<1x1x64xf32>
    %22 = vector.shape_cast %21 : vector<1x1x64xf32> to vector<1x64xf32>
    %c0_30 = arith.constant 0 : index
    %c0_31 = arith.constant 0 : index
    %c0_32 = arith.constant 0 : index
    %23 = vector.load %arg14[%c0_30, %c0_31, %c0_32] : memref<1x64x32xf32, #tpu.memory_space<vmem>>, vector<1x64x32xf32>
    %24 = vector.shape_cast %23 : vector<1x64x32xf32> to vector<64x32xf32>
    %c0_33 = arith.constant 0 : index
    %c0_34 = arith.constant 0 : index
    %c0_35 = arith.constant 0 : index
    %25 = vector.load %arg15[%c0_33, %c0_34, %c0_35] : memref<1x1x32xf32, #tpu.memory_space<vmem>>, vector<1x1x32xf32>
    %26 = vector.shape_cast %25 : vector<1x1x32xf32> to vector<1x32xf32>
    %c0_36 = arith.constant 0 : index
    %c0_37 = arith.constant 0 : index
    %27 = vector.load %arg19[%c0_36, %c0_37] : memref<8x32xf32, #tpu.memory_space<vmem>>, vector<8x32xf32>
    %cst = arith.constant dense<0.000000e+00> : vector<8xf32>
    %28 = vector.multi_reduction <add>, %27, %cst [1] : vector<8x32xf32> to vector<8xf32>
    %29 = vector.shape_cast %28 : vector<8xf32> to vector<8x1xf32>
    %cst_38 = arith.constant 3.200000e+01 : f32
    %30 = vector.broadcast %cst_38 : f32 to vector<8x1xf32>
    %31 = arith.divf %29, %30 : vector<8x1xf32>
    %32 = vector.broadcast %31 : vector<8x1xf32> to vector<8x32xf32>
    %33 = arith.subf %27, %32 : vector<8x32xf32>
    %34 = arith.mulf %33, %33 : vector<8x32xf32>
    %cst_39 = arith.constant dense<0.000000e+00> : vector<8xf32>
    %35 = vector.multi_reduction <add>, %34, %cst_39 [1] : vector<8x32xf32> to vector<8xf32>
    %36 = vector.shape_cast %35 : vector<8xf32> to vector<8x1xf32>
    %cst_40 = arith.constant 3.200000e+01 : f32
    %37 = vector.broadcast %cst_40 : f32 to vector<8x1xf32>
    %38 = arith.divf %36, %37 : vector<8x1xf32>
    %39 = vector.broadcast %31 : vector<8x1xf32> to vector<8x32xf32>
    %40 = arith.subf %27, %39 : vector<8x32xf32>
    %cst_41 = arith.constant 9.99999997E-7 : f32
    %41 = vector.broadcast %cst_41 : f32 to vector<8x1xf32>
    %42 = arith.addf %38, %41 : vector<8x1xf32>
    %43 = math.rsqrt %42 : vector<8x1xf32>
    %44 = vector.broadcast %43 : vector<8x1xf32> to vector<8x32xf32>
    %45 = arith.mulf %40, %44 : vector<8x32xf32>
    %46 = vector.broadcast %4 : vector<1x32xf32> to vector<8x32xf32>
    %47 = arith.mulf %45, %46 : vector<8x32xf32>
    %48 = vector.broadcast %6 : vector<1x32xf32> to vector<8x32xf32>
    %49 = arith.addf %47, %48 : vector<8x32xf32>
    %cst_42 = arith.constant dense<0.000000e+00> : vector<8x96xf32>
    %50 = tpu.matmul %49, %8, %cst_42 {dimension_numbers = #tpu.dot_dimension_numbers<[1], [0], [0], [1], [0, 0, 1, 1], [], []>} : vector<8x32xf32>, vector<32x96xf32>, vector<8x96xf32> -> vector<8x96xf32>
    %51 = vector.broadcast %10 : vector<1x96xf32> to vector<8x96xf32>
    %52 = arith.addf %50, %51 : vector<8x96xf32>
    %53 = vector.extract_strided_slice %52 {offsets = [0, 0], sizes = [8, 8], strides = [1, 1]} : vector<8x96xf32> to vector<8x8xf32>
    %cst_43 = arith.constant 0.353553385 : f32
    %54 = vector.broadcast %cst_43 : f32 to vector<8x8xf32>
    %55 = arith.mulf %53, %54 : vector<8x8xf32>
    %56 = vector.extract_strided_slice %52 {offsets = [0, 32], sizes = [8, 8], strides = [1, 1]} : vector<8x96xf32> to vector<8x8xf32>
    %57 = vector.extract_strided_slice %52 {offsets = [0, 64], sizes = [8, 8], strides = [1, 1]} : vector<8x96xf32> to vector<8x8xf32>
    %cst_44 = arith.constant dense<0.000000e+00> : vector<8x8xf32>
    %58 = tpu.matmul %55, %56, %cst_44 {dimension_numbers = #tpu.dot_dimension_numbers<[1], [1], [0], [0], [0, 0, 1, 0], [], []>} : vector<8x8xf32>, vector<8x8xf32>, vector<8x8xf32> -> vector<8x8xf32>
    %cst_45 = arith.constant dense<0xFF800000> : vector<8xf32>
    %59 = vector.multi_reduction <maximumf>, %58, %cst_45 [1] : vector<8x8xf32> to vector<8xf32>
    %60 = vector.shape_cast %59 : vector<8xf32> to vector<8x1xf32>
    %61 = vector.broadcast %60 : vector<8x1xf32> to vector<8x8xf32>
    %62 = arith.subf %58, %61 : vector<8x8xf32>
    %63 = math.exp %62 : vector<8x8xf32>
    %cst_46 = arith.constant dense<0.000000e+00> : vector<8xf32>
    %64 = vector.multi_reduction <add>, %63, %cst_46 [1] : vector<8x8xf32> to vector<8xf32>
    %65 = vector.shape_cast %64 : vector<8xf32> to vector<8x1xf32>
    %66 = tpu.reciprocal %65 : vector<8x1xf32> -> vector<8x1xf32>
    %67 = vector.broadcast %66 : vector<8x1xf32> to vector<8x8xf32>
    %68 = arith.mulf %63, %67 : vector<8x8xf32>
    %cst_47 = arith.constant dense<0.000000e+00> : vector<8x8xf32>
    %69 = tpu.matmul %68, %57, %cst_47 {dimension_numbers = #tpu.dot_dimension_numbers<[1], [0], [0], [1], [0, 0, 1, 1], [], []>} : vector<8x8xf32>, vector<8x8xf32>, vector<8x8xf32> -> vector<8x8xf32>
    %70 = vector.extract_strided_slice %52 {offsets = [0, 8], sizes = [8, 8], strides = [1, 1]} : vector<8x96xf32> to vector<8x8xf32>
    %cst_48 = arith.constant 0.353553385 : f32
    %71 = vector.broadcast %cst_48 : f32 to vector<8x8xf32>
    %72 = arith.mulf %70, %71 : vector<8x8xf32>
    %73 = vector.extract_strided_slice %52 {offsets = [0, 40], sizes = [8, 8], strides = [1, 1]} : vector<8x96xf32> to vector<8x8xf32>
    %74 = vector.extract_strided_slice %52 {offsets = [0, 72], sizes = [8, 8], strides = [1, 1]} : vector<8x96xf32> to vector<8x8xf32>
    %cst_49 = arith.constant dense<0.000000e+00> : vector<8x8xf32>
    %75 = tpu.matmul %72, %73, %cst_49 {dimension_numbers = #tpu.dot_dimension_numbers<[1], [1], [0], [0], [0, 0, 1, 0], [], []>} : vector<8x8xf32>, vector<8x8xf32>, vector<8x8xf32> -> vector<8x8xf32>
    %cst_50 = arith.constant dense<0xFF800000> : vector<8xf32>
    %76 = vector.multi_reduction <maximumf>, %75, %cst_50 [1] : vector<8x8xf32> to vector<8xf32>
    %77 = vector.shape_cast %76 : vector<8xf32> to vector<8x1xf32>
    %78 = vector.broadcast %77 : vector<8x1xf32> to vector<8x8xf32>
    %79 = arith.subf %75, %78 : vector<8x8xf32>
    %80 = math.exp %79 : vector<8x8xf32>
    %cst_51 = arith.constant dense<0.000000e+00> : vector<8xf32>
    %81 = vector.multi_reduction <add>, %80, %cst_51 [1] : vector<8x8xf32> to vector<8xf32>
    %82 = vector.shape_cast %81 : vector<8xf32> to vector<8x1xf32>
    %83 = tpu.reciprocal %82 : vector<8x1xf32> -> vector<8x1xf32>
    %84 = vector.broadcast %83 : vector<8x1xf32> to vector<8x8xf32>
    %85 = arith.mulf %80, %84 : vector<8x8xf32>
    %cst_52 = arith.constant dense<0.000000e+00> : vector<8x8xf32>
    %86 = tpu.matmul %85, %74, %cst_52 {dimension_numbers = #tpu.dot_dimension_numbers<[1], [0], [0], [1], [0, 0, 1, 1], [], []>} : vector<8x8xf32>, vector<8x8xf32>, vector<8x8xf32> -> vector<8x8xf32>
    %87 = vector.extract_strided_slice %52 {offsets = [0, 16], sizes = [8, 8], strides = [1, 1]} : vector<8x96xf32> to vector<8x8xf32>
    %cst_53 = arith.constant 0.353553385 : f32
    %88 = vector.broadcast %cst_53 : f32 to vector<8x8xf32>
    %89 = arith.mulf %87, %88 : vector<8x8xf32>
    %90 = vector.extract_strided_slice %52 {offsets = [0, 48], sizes = [8, 8], strides = [1, 1]} : vector<8x96xf32> to vector<8x8xf32>
    %91 = vector.extract_strided_slice %52 {offsets = [0, 80], sizes = [8, 8], strides = [1, 1]} : vector<8x96xf32> to vector<8x8xf32>
    %cst_54 = arith.constant dense<0.000000e+00> : vector<8x8xf32>
    %92 = tpu.matmul %89, %90, %cst_54 {dimension_numbers = #tpu.dot_dimension_numbers<[1], [1], [0], [0], [0, 0, 1, 0], [], []>} : vector<8x8xf32>, vector<8x8xf32>, vector<8x8xf32> -> vector<8x8xf32>
    %cst_55 = arith.constant dense<0xFF800000> : vector<8xf32>
    %93 = vector.multi_reduction <maximumf>, %92, %cst_55 [1] : vector<8x8xf32> to vector<8xf32>
    %94 = vector.shape_cast %93 : vector<8xf32> to vector<8x1xf32>
    %95 = vector.broadcast %94 : vector<8x1xf32> to vector<8x8xf32>
    %96 = arith.subf %92, %95 : vector<8x8xf32>
    %97 = math.exp %96 : vector<8x8xf32>
    %cst_56 = arith.constant dense<0.000000e+00> : vector<8xf32>
    %98 = vector.multi_reduction <add>, %97, %cst_56 [1] : vector<8x8xf32> to vector<8xf32>
    %99 = vector.shape_cast %98 : vector<8xf32> to vector<8x1xf32>
    %100 = tpu.reciprocal %99 : vector<8x1xf32> -> vector<8x1xf32>
    %101 = vector.broadcast %100 : vector<8x1xf32> to vector<8x8xf32>
    %102 = arith.mulf %97, %101 : vector<8x8xf32>
    %cst_57 = arith.constant dense<0.000000e+00> : vector<8x8xf32>
    %103 = tpu.matmul %102, %91, %cst_57 {dimension_numbers = #tpu.dot_dimension_numbers<[1], [0], [0], [1], [0, 0, 1, 1], [], []>} : vector<8x8xf32>, vector<8x8xf32>, vector<8x8xf32> -> vector<8x8xf32>
    %104 = vector.extract_strided_slice %52 {offsets = [0, 24], sizes = [8, 8], strides = [1, 1]} : vector<8x96xf32> to vector<8x8xf32>
    %cst_58 = arith.constant 0.353553385 : f32
    %105 = vector.broadcast %cst_58 : f32 to vector<8x8xf32>
    %106 = arith.mulf %104, %105 : vector<8x8xf32>
    %107 = vector.extract_strided_slice %52 {offsets = [0, 56], sizes = [8, 8], strides = [1, 1]} : vector<8x96xf32> to vector<8x8xf32>
    %108 = vector.extract_strided_slice %52 {offsets = [0, 88], sizes = [8, 8], strides = [1, 1]} : vector<8x96xf32> to vector<8x8xf32>
    %cst_59 = arith.constant dense<0.000000e+00> : vector<8x8xf32>
    %109 = tpu.matmul %106, %107, %cst_59 {dimension_numbers = #tpu.dot_dimension_numbers<[1], [1], [0], [0], [0, 0, 1, 0], [], []>} : vector<8x8xf32>, vector<8x8xf32>, vector<8x8xf32> -> vector<8x8xf32>
    %cst_60 = arith.constant dense<0xFF800000> : vector<8xf32>
    %110 = vector.multi_reduction <maximumf>, %109, %cst_60 [1] : vector<8x8xf32> to vector<8xf32>
    %111 = vector.shape_cast %110 : vector<8xf32> to vector<8x1xf32>
    %112 = vector.broadcast %111 : vector<8x1xf32> to vector<8x8xf32>
    %113 = arith.subf %109, %112 : vector<8x8xf32>
    %114 = math.exp %113 : vector<8x8xf32>
    %cst_61 = arith.constant dense<0.000000e+00> : vector<8xf32>
    %115 = vector.multi_reduction <add>, %114, %cst_61 [1] : vector<8x8xf32> to vector<8xf32>
    %116 = vector.shape_cast %115 : vector<8xf32> to vector<8x1xf32>
    %117 = tpu.reciprocal %116 : vector<8x1xf32> -> vector<8x1xf32>
    %118 = vector.broadcast %117 : vector<8x1xf32> to vector<8x8xf32>
    %119 = arith.mulf %114, %118 : vector<8x8xf32>
    %cst_62 = arith.constant dense<0.000000e+00> : vector<8x8xf32>
    %120 = tpu.matmul %119, %108, %cst_62 {dimension_numbers = #tpu.dot_dimension_numbers<[1], [0], [0], [1], [0, 0, 1, 1], [], []>} : vector<8x8xf32>, vector<8x8xf32>, vector<8x8xf32> -> vector<8x8xf32>
    %121 = tpu.concatenate %69, %86, %103, %120 in 1 : vector<8x8xf32>, vector<8x8xf32>, vector<8x8xf32>, vector<8x8xf32> -> vector<8x32xf32>
    %cst_63 = arith.constant dense<0.000000e+00> : vector<8x32xf32>
    %122 = tpu.matmul %121, %12, %cst_63 {dimension_numbers = #tpu.dot_dimension_numbers<[1], [0], [0], [1], [0, 0, 1, 1], [], []>} : vector<8x32xf32>, vector<32x32xf32>, vector<8x32xf32> -> vector<8x32xf32>
    %123 = vector.broadcast %14 : vector<1x32xf32> to vector<8x32xf32>
    %124 = arith.addf %122, %123 : vector<8x32xf32>
    %125 = arith.addf %27, %124 : vector<8x32xf32>
    %c0_64 = arith.constant 0 : index
    %c0_65 = arith.constant 0 : index
    %126 = vector.load %arg19[%c0_64, %c0_65] : memref<8x32xf32, #tpu.memory_space<vmem>>, vector<8x32xf32>
    tpu.vector_store %arg19[%c0_64, %c0_65], %125 {strides = array<i32>} : memref<8x32xf32, #tpu.memory_space<vmem>>, vector<8x32xf32>,
    %c0_66 = arith.constant 0 : index
    %c0_67 = arith.constant 0 : index
    %127 = vector.load %arg19[%c0_66, %c0_67] : memref<8x32xf32, #tpu.memory_space<vmem>>, vector<8x32xf32>
    %cst_68 = arith.constant dense<0.000000e+00> : vector<8xf32>
    %128 = vector.multi_reduction <add>, %127, %cst_68 [1] : vector<8x32xf32> to vector<8xf32>
    %129 = vector.shape_cast %128 : vector<8xf32> to vector<8x1xf32>
    %cst_69 = arith.constant 3.200000e+01 : f32
    %130 = vector.broadcast %cst_69 : f32 to vector<8x1xf32>
    %131 = arith.divf %129, %130 : vector<8x1xf32>
    %132 = vector.broadcast %131 : vector<8x1xf32> to vector<8x32xf32>
    %133 = arith.subf %127, %132 : vector<8x32xf32>
    %134 = arith.mulf %133, %133 : vector<8x32xf32>
    %cst_70 = arith.constant dense<0.000000e+00> : vector<8xf32>
    %135 = vector.multi_reduction <add>, %134, %cst_70 [1] : vector<8x32xf32> to vector<8xf32>
    %136 = vector.shape_cast %135 : vector<8xf32> to vector<8x1xf32>
    %cst_71 = arith.constant 3.200000e+01 : f32
    %137 = vector.broadcast %cst_71 : f32 to vector<8x1xf32>
    %138 = arith.divf %136, %137 : vector<8x1xf32>
    %139 = vector.broadcast %131 : vector<8x1xf32> to vector<8x32xf32>
    %140 = arith.subf %127, %139 : vector<8x32xf32>
    %cst_72 = arith.constant 9.99999997E-7 : f32
    %141 = vector.broadcast %cst_72 : f32 to vector<8x1xf32>
    %142 = arith.addf %138, %141 : vector<8x1xf32>
    %143 = math.rsqrt %142 : vector<8x1xf32>
    %144 = vector.broadcast %143 : vector<8x1xf32> to vector<8x32xf32>
    %145 = arith.mulf %140, %144 : vector<8x32xf32>
    %146 = vector.broadcast %16 : vector<1x32xf32> to vector<8x32xf32>
    %147 = arith.mulf %145, %146 : vector<8x32xf32>
    %148 = vector.broadcast %18 : vector<1x32xf32> to vector<8x32xf32>
    %149 = arith.addf %147, %148 : vector<8x32xf32>
    %cst_73 = arith.constant dense<0.000000e+00> : vector<8x64xf32>
    %150 = tpu.matmul %149, %20, %cst_73 {dimension_numbers = #tpu.dot_dimension_numbers<[1], [0], [0], [1], [0, 0, 1, 1], [], []>} : vector<8x32xf32>, vector<32x64xf32>, vector<8x64xf32> -> vector<8x64xf32>
    %151 = vector.broadcast %22 : vector<1x64xf32> to vector<8x64xf32>
    %152 = arith.addf %150, %151 : vector<8x64xf32>
    %cst_74 = arith.constant 5.000000e-01 : f32
    %153 = vector.broadcast %cst_74 : f32 to vector<8x64xf32>
    %154 = arith.mulf %153, %152 : vector<8x64xf32>
    %cst_75 = arith.constant 0.707106769 : f32
    %155 = vector.broadcast %cst_75 : f32 to vector<8x64xf32>
    %156 = arith.mulf %152, %155 : vector<8x64xf32>
    %157 = math.erf %156 : vector<8x64xf32>
    %cst_76 = arith.constant 1.000000e+00 : f32
    %158 = vector.broadcast %cst_76 : f32 to vector<8x64xf32>
    %159 = arith.addf %158, %157 : vector<8x64xf32>
    %160 = arith.mulf %154, %159 : vector<8x64xf32>
    %cst_77 = arith.constant dense<0.000000e+00> : vector<8x32xf32>
    %161 = tpu.matmul %160, %24, %cst_77 {dimension_numbers = #tpu.dot_dimension_numbers<[1], [0], [0], [1], [0, 0, 1, 1], [], []>} : vector<8x64xf32>, vector<64x32xf32>, vector<8x32xf32> -> vector<8x32xf32>
    %162 = vector.broadcast %26 : vector<1x32xf32> to vector<8x32xf32>
    %163 = arith.addf %161, %162 : vector<8x32xf32>
    %164 = arith.addf %127, %163 : vector<8x32xf32>
    %c0_78 = arith.constant 0 : index
    %c0_79 = arith.constant 0 : index
    %165 = vector.load %arg19[%c0_78, %c0_79] : memref<8x32xf32, #tpu.memory_space<vmem>>, vector<8x32xf32>
    tpu.vector_store %arg19[%c0_78, %c0_79], %164 {strides = array<i32>} : memref<8x32xf32, #tpu.memory_space<vmem>>, vector<8x32xf32>,
    %c1_i32 = arith.constant 1 : i32
    %166 = arith.cmpi eq, %arg1, %c1_i32 : i32
    %167 = arith.extui %166 : i1 to i32
    %c0_i32_80 = arith.constant 0 : i32
    %168 = arith.cmpi ne, %167, %c0_i32_80 : i32
    scf.if %168 {
      %c0_81 = arith.constant 0 : index
      %c0_82 = arith.constant 0 : index
      %169 = vector.load %arg16[%c0_81, %c0_82] : memref<1x32xf32, #tpu.memory_space<vmem>>, vector<1x32xf32>
      %c0_83 = arith.constant 0 : index
      %c0_84 = arith.constant 0 : index
      %170 = vector.load %arg17[%c0_83, %c0_84] : memref<1x32xf32, #tpu.memory_space<vmem>>, vector<1x32xf32>
      %c0_85 = arith.constant 0 : index
      %c0_86 = arith.constant 0 : index
      %171 = vector.load %arg19[%c0_85, %c0_86] : memref<8x32xf32, #tpu.memory_space<vmem>>, vector<8x32xf32>
      %cst_87 = arith.constant dense<0.000000e+00> : vector<8xf32>
      %172 = vector.multi_reduction <add>, %171, %cst_87 [1] : vector<8x32xf32> to vector<8xf32>
      %173 = vector.shape_cast %172 : vector<8xf32> to vector<8x1xf32>
      %cst_88 = arith.constant 3.200000e+01 : f32
      %174 = vector.broadcast %cst_88 : f32 to vector<8x1xf32>
      %175 = arith.divf %173, %174 : vector<8x1xf32>
      %176 = vector.broadcast %175 : vector<8x1xf32> to vector<8x32xf32>
      %177 = arith.subf %171, %176 : vector<8x32xf32>
      %178 = arith.mulf %177, %177 : vector<8x32xf32>
      %cst_89 = arith.constant dense<0.000000e+00> : vector<8xf32>
      %179 = vector.multi_reduction <add>, %178, %cst_89 [1] : vector<8x32xf32> to vector<8xf32>
      %180 = vector.shape_cast %179 : vector<8xf32> to vector<8x1xf32>
      %cst_90 = arith.constant 3.200000e+01 : f32
      %181 = vector.broadcast %cst_90 : f32 to vector<8x1xf32>
      %182 = arith.divf %180, %181 : vector<8x1xf32>
      %183 = vector.broadcast %175 : vector<8x1xf32> to vector<8x32xf32>
      %184 = arith.subf %171, %183 : vector<8x32xf32>
      %cst_91 = arith.constant 9.99999997E-7 : f32
      %185 = vector.broadcast %cst_91 : f32 to vector<8x1xf32>
      %186 = arith.addf %182, %185 : vector<8x1xf32>
      %187 = math.rsqrt %186 : vector<8x1xf32>
      %188 = vector.broadcast %187 : vector<8x1xf32> to vector<8x32xf32>
      %189 = arith.mulf %184, %188 : vector<8x32xf32>
      %190 = vector.broadcast %169 : vector<1x32xf32> to vector<8x32xf32>
      %191 = arith.mulf %189, %190 : vector<8x32xf32>
      %192 = vector.broadcast %170 : vector<1x32xf32> to vector<8x32xf32>
      %193 = arith.addf %191, %192 : vector<8x32xf32>
      %c0_92 = arith.constant 0 : index
      %c0_93 = arith.constant 0 : index
      %c0_94 = arith.constant 0 : index
      %194 = vector.load %arg18[%c0_92, %c0_93, %c0_94] : memref<1x8x32xf32, #tpu.memory_space<vmem>>, vector<1x8x32xf32>
      %195 = vector.shape_cast %194 : vector<1x8x32xf32> to vector<8x32xf32>
      %196 = vector.shape_cast %193 : vector<8x32xf32> to vector<1x8x32xf32>
      tpu.vector_store %arg18[%c0_92, %c0_93, %c0_94], %196 {strides = array<i32>} : memref<1x8x32xf32, #tpu.memory_space<vmem>>, vector<1x8x32xf32>,
    } else {
    }
    return
  }
  func.func @transform_0(%arg0: i32, %arg1: i32) -> (i32, i32, i32) {
    %c0_i32 = arith.constant 0 : i32
    %c0_i32_0 = arith.constant 0 : i32
    %c0_i32_1 = arith.constant 0 : i32
    return %arg0, %c0_i32, %c0_i32_0 : i32, i32, i32
  }
  func.func @transform_1(%arg0: i32, %arg1: i32) -> (i32, i32, i32) {
    %c0_i32 = arith.constant 0 : i32
    %c0_i32_0 = arith.constant 0 : i32
    %c0_i32_1 = arith.constant 0 : i32
    %c0_i32_2 = arith.constant 0 : i32
    return %c0_i32, %c0_i32_0, %c0_i32_1 : i32, i32, i32
  }
  func.func @transform_2(%arg0: i32, %arg1: i32) -> (i32, i32, i32) {
    %c0_i32 = arith.constant 0 : i32
    %c0_i32_0 = arith.constant 0 : i32
    %c0_i32_1 = arith.constant 0 : i32
    return %arg1, %c0_i32, %c0_i32_0 : i32, i32, i32
  }
  func.func @transform_3(%arg0: i32, %arg1: i32) -> (i32, i32, i32) {
    %c0_i32 = arith.constant 0 : i32
    %c0_i32_0 = arith.constant 0 : i32
    %c0_i32_1 = arith.constant 0 : i32
    return %arg1, %c0_i32, %c0_i32_0 : i32, i32, i32
  }
  func.func @transform_4(%arg0: i32, %arg1: i32) -> (i32, i32, i32) {
    %c0_i32 = arith.constant 0 : i32
    %c0_i32_0 = arith.constant 0 : i32
    %c0_i32_1 = arith.constant 0 : i32
    return %arg1, %c0_i32, %c0_i32_0 : i32, i32, i32
  }
  func.func @transform_5(%arg0: i32, %arg1: i32) -> (i32, i32, i32) {
    %c0_i32 = arith.constant 0 : i32
    %c0_i32_0 = arith.constant 0 : i32
    %c0_i32_1 = arith.constant 0 : i32
    return %arg1, %c0_i32, %c0_i32_0 : i32, i32, i32
  }
  func.func @transform_6(%arg0: i32, %arg1: i32) -> (i32, i32, i32) {
    %c0_i32 = arith.constant 0 : i32
    %c0_i32_0 = arith.constant 0 : i32
    %c0_i32_1 = arith.constant 0 : i32
    return %arg1, %c0_i32, %c0_i32_0 : i32, i32, i32
  }
  func.func @transform_7(%arg0: i32, %arg1: i32) -> (i32, i32, i32) {
    %c0_i32 = arith.constant 0 : i32
    %c0_i32_0 = arith.constant 0 : i32
    %c0_i32_1 = arith.constant 0 : i32
    return %arg1, %c0_i32, %c0_i32_0 : i32, i32, i32
  }
  func.func @transform_8(%arg0: i32, %arg1: i32) -> (i32, i32, i32) {
    %c0_i32 = arith.constant 0 : i32
    %c0_i32_0 = arith.constant 0 : i32
    %c0_i32_1 = arith.constant 0 : i32
    return %arg1, %c0_i32, %c0_i32_0 : i32, i32, i32
  }
  func.func @transform_9(%arg0: i32, %arg1: i32) -> (i32, i32, i32) {
    %c0_i32 = arith.constant 0 : i32
    %c0_i32_0 = arith.constant 0 : i32
    %c0_i32_1 = arith.constant 0 : i32
    return %arg1, %c0_i32, %c0_i32_0 : i32, i32, i32
  }
  func.func @transform_10(%arg0: i32, %arg1: i32) -> (i32, i32, i32) {
    %c0_i32 = arith.constant 0 : i32
    %c0_i32_0 = arith.constant 0 : i32
    %c0_i32_1 = arith.constant 0 : i32
    return %arg1, %c0_i32, %c0_i32_0 : i32, i32, i32
  }
  func.func @transform_11(%arg0: i32, %arg1: i32) -> (i32, i32, i32) {
    %c0_i32 = arith.constant 0 : i32
    %c0_i32_0 = arith.constant 0 : i32
    %c0_i32_1 = arith.constant 0 : i32
    return %arg1, %c0_i32, %c0_i32_0 : i32, i32, i32
  }
  func.func @transform_12(%arg0: i32, %arg1: i32) -> (i32, i32, i32) {
    %c0_i32 = arith.constant 0 : i32
    %c0_i32_0 = arith.constant 0 : i32
    %c0_i32_1 = arith.constant 0 : i32
    return %arg1, %c0_i32, %c0_i32_0 : i32, i32, i32
  }
  func.func @transform_13(%arg0: i32, %arg1: i32) -> (i32, i32, i32) {
    %c0_i32 = arith.constant 0 : i32
    %c0_i32_0 = arith.constant 0 : i32
    %c0_i32_1 = arith.constant 0 : i32
    return %arg1, %c0_i32, %c0_i32_0 : i32, i32, i32
  }
  func.func @transform_14(%arg0: i32, %arg1: i32) -> (i32, i32) {
    %c0_i32 = arith.constant 0 : i32
    %c0_i32_0 = arith.constant 0 : i32
    %c0_i32_1 = arith.constant 0 : i32
    return %c0_i32, %c0_i32_0 : i32, i32
  }
  func.func @transform_15(%arg0: i32, %arg1: i32) -> (i32, i32) {
    %c0_i32 = arith.constant 0 : i32
    %c0_i32_0 = arith.constant 0 : i32
    %c0_i32_1 = arith.constant 0 : i32
    return %c0_i32, %c0_i32_0 : i32, i32
  }
  func.func @transform_16(%arg0: i32, %arg1: i32) -> (i32, i32, i32) {
    %c0_i32 = arith.constant 0 : i32
    %c0_i32_0 = arith.constant 0 : i32
    %c0_i32_1 = arith.constant 0 : i32
    return %arg0, %c0_i32, %c0_i32_0 : i32, i32, i32
  }
}

</mosaic_0001>

<bundles_post_ra>
// kernel: tpu_custom_call.1
= control target key start
LH: loop header
LB: loop body
LE: loop exit
PB: predicated region body
PF: predicated region fallthrough
CT: control target
= control target key end

     0   :  { %s2653_s0 = inlined_call_operand.hbm [shape: f32[2,8,32], index: 0, kind: input, shape index: {}]   ;;  %s2654_s1 = inlined_call_operand.hbm [shape: f32[1,8,32], index: 1, kind: input, shape index: {}]   ;;  %s2655_s2 = inlined_call_operand.hbm [shape: f32[2,1,32], index: 2, kind: input, shape index: {}]   ;;  %s2656_s3 = inlined_call_operand.vmem [shape: f32[2,1,32], index: 3, kind: input, shape index: {}]   ;;  %s2657_s4 = inlined_call_operand.vmem [shape: f32[2,32,96], index: 4, kind: input, shape index: {}]   ;;  %s2658_s5 = inlined_call_operand.hbm [shape: f32[2,1,96], index: 5, kind: input, shape index: {}]   ;;  %s2659_s6 = inlined_call_operand.vmem [shape: f32[2,32,32], index: 6, kind: input, shape index: {}]   ;;  %s2660_s7 = inlined_call_operand.vmem [shape: f32[2,1,32], index: 7, kind: input, shape index: {}]   ;;  %s2661_s8 = inlined_call_operand.hbm [shape: f32[2,1,32], index: 8, kind: input, shape index: {}]   ;;  %s2662_s9 = inlined_call_operand.vmem [shape: f32[2,1,32], index: 9, kind: input, shape index: {}]   ;;  %s2663_s10 = inlined_call_operand.vmem [shape: f32[2,32,64], index: 10, kind: input, shape index: {}]   ;;  %s2664_s11 = inlined_call_operand.vmem [shape: f32[2,1,64], index: 11, kind: input, shape index: {}]   ;;  %s2665_s12 = inlined_call_operand.vmem [shape: f32[2,64,32], index: 12, kind: input, shape index: {}]   ;;  %s2666_s13 = inlined_call_operand.vmem [shape: f32[2,1,32], index: 13, kind: input, shape index: {}]   ;;  %s2667_s14 = inlined_call_operand.vmem [shape: f32[1,32], index: 14, kind: input, shape index: {}]   ;;  %s2668_s15 = inlined_call_operand.vmem [shape: f32[1,32], index: 15, kind: input, shape index: {}]   ;;  %s2669_s16 = inlined_call_operand.hbm [shape: f32[2,8,32], index: 16, kind: output, shape index: {}]  }
   0x1   :  { %2684 = sst [smem:[#allocation26_spill]] %s2653_s0 }
   0x2   :  { %2685 = sst [smem:[#allocation27_spill]] %s2654_s1 }
   0x3   :  { %2686 = sst [smem:[#allocation28_spill]] %s2655_s2 }
   0x4   :  { %2687 = sst [smem:[#allocation29_spill]] %s2657_s4 }
   0x5   :  { %2688 = sst [smem:[#allocation30_spill]] %s2658_s5 }
   0x6   :  { %2689 = sst [smem:[#allocation31_spill]] %s2659_s6 }
   0x7   :  { %2690 = sst [smem:[#allocation32_spill]] %s2660_s7 }
   0x8   :  { %2691 = sst [smem:[#allocation33_spill]] %s2661_s8 }
   0x9   :  { %2692 = sst [smem:[#allocation34_spill]] %s2662_s9 }
   0xa   :  { %2693 = sst [smem:[#allocation35_spill]] %s2663_s10 }
   0xb   :  { %2694 = sst [smem:[#allocation36_spill]] %s2664_s11 }
   0xc   :  { %2695 = sst [smem:[#allocation37_spill]] %s2665_s12 }
   0xd   :  { %2696 = sst [smem:[#allocation38_spill]] %s2666_s13 }
   0xe   :  { %2697 = sst [smem:[#allocation39_spill]] %s2667_s14 }
   0xf   :  { %2698 = sst [smem:[#allocation40_spill]] %s2668_s15 }
  0x10   :  { %2699 = sst [smem:[#allocation41_spill]] %s2669_s16 }
  0x11   :  { %21 = vsyncpa [#allocation4], 0 }
  0x12   :  { %22 = vsyncpa [#allocation7], 0 }
  0x13   :  { %23 = vsyncpa [#allocation5], 0  ;;  %s2236_s21 = smov 0   ;;  %s2238_s22 = smov 0  }
  0x14   :  { %s2240_s23 = smov 0   ;;  %s2242_s24 = smov 0  }
  0x15   :  { %s2244_s25 = smov 0   ;;  %s2246_s26 = smov 0  }
  0x16   :  { %s2248_s27 = smov 0   ;;  %s2250_s28 = smov 0  }
  0x17   :  { %s2252_s29 = smov 0   ;;  %s2254_s30 = smov 0  }
  0x18   :  { %s2256_s0 = smov 0  }
  0x19 LB: > { %2700 = sst [smem:[#allocation16_spill]] %s2107_s25  ;;  %s2288_s17 = sadd.s32 4294967295, %s2131_s0   ;;  %s2131_s0 = sphi %s2256_s0, %s29_s0   ;;  %s2127_s30 = sphi %s2254_s30, %s2752_s30   ;;  %s2123_s29 = sphi %s2252_s29, %s2751_s29   ;;  %s2119_s28 = sphi %s2250_s28, %s2750_s28   ;;  %s2115_s27 = sphi %s2248_s27, %s2749_s27   ;;  %s2111_s26 = sphi %s2246_s26, %s2748_s26   ;;  %s2107_s25 = sphi %s2244_s25, %s2747_s25   ;;  %s2103_s24 = sphi %s2242_s24, %s2746_s24   ;;  %s2099_s23 = sphi %s2240_s23, %s2755_s23   ;;  %s2095_s22 = sphi %s2238_s22, %s2754_s22   ;;  %s2091_s21 = sphi %s2236_s21, %s2753_s21  }
  0x1a   : > { %2701 = sst [smem:[#allocation17_spill]] %s2111_s26  ;;  %p61_p0 = scmp.ne.s32.totalorder %s2107_s25, %s2103_s24 }
  0x1b   : > { %2702 = sst [smem:[#allocation18_spill]] %s2119_s28  ;;  %p62_p1 = scmp.eq.s32.totalorder %s2288_s17, 0 }
  0x1c   : > { %2703 = sst [smem:[#allocation19_spill]] %s2123_s29  ;;  %p108_p2 = scmp.ne.s32.totalorder %s2095_s22, %s2091_s21 }
  0x1d   : > { %2704 = sst [smem:[#allocation20_spill]] %s2127_s30  ;;  %p459_p3 = scmp.ne.s32.totalorder %s2111_s26, %s2107_s25 }
  0x1e   : > { %p2298_p4 = por %p62_p1, %p61_p0  ;;  %p460_p5 = scmp.eq.s32.totalorder %s2288_s17, 3 }
  0x1f   : > { %p2305_p6 = por %p108_p2, %p62_p1  ;;  %p1635_p7 = scmp.ge.s32.totalorder %s2131_s0, 1 }
  0x20   : > { %p2310_p8 = por %p460_p5, %p459_p3  ;;  %p473_p9 = scmp.lt.s32.totalorder %s2131_s0, 5 }
  0x21   : > { %s2676_s21 = sshll.u32 %s2119_s28, 3  ;;  %s2710_s15 = sld [smem:[#allocation26_spill]] }
  0x22   : > { %s2707_s16 = scalar_select %p2310_p8, 1, 0 }
  0x23   : > { %p2316_p10 = pnand %p1635_p7, %p473_p9  ;;  %s2133_s13 = smov [#allocation3]  }
  0x24   : > { %2708 = sst [smem:[#allocation21_spill]] %s2707_s16  ;;  %s489_s11 = sshll.u32 %s2133_s13, 4  ;;  %s490_s11 = int_to_ptr.vmem [resolvable:$true] %s489_s11 }
  0x25   : > { %p2677_p11 = pneg %p2316_p10 }
  0x27   : > { %s485_s14 = scalar_lea.hbm %s2710_s15, %s2676_s21  ;;  %p2332_p12 = pnand %p2677_p11, %p2298_p4 }
  0x28   : > { %s487_s12 = sshll.u32 %s485_s14, 4  ;;  %s1858_s18 = scalar_lea.hbm %s2710_s15, 16  ;;  %s488_s12 = int_to_ptr.hbm [resolvable:$true] %s487_s12 }
  0x29   : > { %s1851_s28 = sshra.s32 %s488_s12, 4  ;;  %p1855_p0 = pneg %p2332_p12  ;;  %s1852_s28 = int_to_ptr.hbm [resolvable:$true] %s1851_s28 }
  0x2a   : > { %s1853_s25 = scalar_lea.hbm %s1852_s28, 8  ;;  %p1859_p5 = scmp.lt.s32.totalorder %s1852_s28, %s2710_s15 }
  0x2b   : > { %p1854_p13 = scmp.ne.s32.totalorder %s1852_s28, %s1853_s25  ;;  %p1860_p7 = scmp.lt.s32.totalorder %s1858_s18, %s1853_s25 }
  0x2d   : > { %p1856_p2 = pnand %p1855_p0, %p1854_p13  ;;  %p1861_p9 = por %p1860_p7, %p1859_p5 }
  0x2f   : > { %p1857_p3 = pneg %p1856_p2 }
  0x31   : > { %p1862_p11 = pnand %p1861_p9, %p1857_p3 }
  0x33   : > { %1865 = shalt.err (!%p1862_p11)
}
  0x34   : > { %1692 = dma.hbm_to_vmem [thread:$0]  (!%p2332_p12), %s488_s12, 128, %s490_s11, [#allocation4]  }
  0x35   : > { %s38_s10 = sadd.s32 1, %s2123_s29  ;;  %s41_s28 = sadd.s32 1, %s2127_s30 }
  0x36   : > { %p39_p13 = scmp.ge.s32.totalorder %s38_s10, 2  ;;  %s95_s21 = sadd.s32 1, %s2099_s23 }
  0x37   : > { %p102_p11 = scmp.ne.s32.totalorder %s2099_s23, %s2095_s22  ;;  %p103_p0 = scmp.eq.s32.totalorder %s2131_s0, 0 }
  0x38   : > { %s2757_s10 = smov (%p39_p13, %s38_s10), 0  ;;  %s2759_s28 = smov (!%p39_p13, %s41_s28), %s2127_s30 }
  0x39   : > { %2712 = sst [smem:[#allocation22_spill]] %s2757_s10  ;;  %s92_s16 = ssub.s32 %s2123_s29, %s2757_s10 }
  0x3a   : > { %p43_p2 = scmp.ge.s32.totalorder %s2759_s28, 2  ;;  %p93_p3 = scmp.eq.s32.totalorder %s92_s16, 0 }
  0x3b   : > { %p2357_p12 = por %p103_p0, %p102_p11  ;;  %p1707_p5 = scmp.lt.s32.totalorder %s2131_s0, 4 }
  0x3c   : > { %s2761_s28 = smov (%p43_p2, %s2759_s28), 0  ;;  %s518_s13 = sand.u32 1, %s2131_s0  }
  0x3d   : > { %2714 = sst [smem:[#allocation23_spill]] %s2761_s28  ;;  %s45_s25 = ssub.s32 %s2127_s30, %s2761_s28 }
  0x3e   : > { %s2365_s12 = scalar_select %p93_p3, %s2099_s23, %s95_s21  }
  0x3f   : > { %p46_p7 = scmp.eq.s32.totalorder %s45_s25, 0  ;;  %s520_s14 = sand.u32 1, %s2099_s23  }
  0x40   : > { %2715 = sst [smem:[#allocation24_spill]] %s2365_s12  ;;  %s2717_s10 = sadd.s32 1, %s2111_s26 }
  0x41   : > { %s2716_s2 = sld [smem:[#allocation28_spill]]  ;;  %s521_s6 = scalar_lea.vmem [#allocation8], %s520_s14 }
  0x42   : > { %s2378_s9 = scalar_select %p46_p7, %s2111_s26, %s2717_s10  }
  0x43   : > { %s528_s4 = sshll.u32 %s521_s6, 4  ;;  %p2384_p9 = pnand %p1707_p5, %p2357_p12  ;;  %s529_s4 = int_to_ptr.vmem [resolvable:$true] %s528_s4 }
  0x44   : > { %2718 = sst [smem:[#allocation25_spill]] %s2378_s9  ;;  %s519_s18 = scalar_lea.sflag [#allocation4], %s518_s13 }
  0x45   : > { %s2720_s5 = sld [smem:[#allocation30_spill]]  ;;  %s552_s6 = scalar_lea.vmem [#allocation9], %s520_s14 }
  0x46   : > { %s2721_s1 = sld [smem:[#allocation27_spill]]  ;;  %s2134_s28 = smov [#allocation6]  }
  0x47   : > { %s524_s16 = scalar_lea.hbm %s2716_s2, %s2123_s29  ;;  %s501_s25 = sshll.u32 %s2134_s28, 4  ;;  %s502_s25 = int_to_ptr.vmem [resolvable:$true] %s501_s25 }
  0x48   : > { %s526_s7 = sshll.u32 %s524_s16, 4  ;;  %s559_s16 = sshll.u32 %s552_s6, 4  ;;  %s527_s7 = int_to_ptr.hbm [resolvable:$true] %s526_s7  ;;  %s560_s16 = int_to_ptr.vmem [resolvable:$true] %s559_s16 }
  0x49   : > { %1699 = dma.hbm_to_vmem [thread:$0]  (!%p2384_p9), %s527_s7, 16, %s529_s4, %s519_s18  }
  0x4a   : > { %p2722_p13 = pneg %p2316_p10  ;;  %s2723_s8 = sld [smem:[#allocation33_spill]] }
  0x4b   : > { %s555_s15 = scalar_lea.hbm %s2720_s5, %s2123_s29  ;;  %s583_s6 = scalar_lea.vmem [#allocation10], %s520_s14 }
  0x4c   : > { %s557_s10 = sshll.u32 %s555_s15, 4  ;;  %s499_s30 = sshll.u32 %s2721_s1, 4  ;;  %s558_s10 = int_to_ptr.hbm [resolvable:$true] %s557_s10  ;;  %s500_s30 = int_to_ptr.hbm [resolvable:$true] %s499_s30 }
  0x4d   : > { %1702 = dma.hbm_to_vmem [thread:$0]  (!%p2384_p9), %s558_s10, 16, %s560_s16, %s519_s18  }
  0x4e   : > { %p1693_p11 = pnand %p2722_p13, %p62_p1  ;;  %s590_s5 = sshll.u32 %s583_s6, 4  ;;  %s591_s5 = int_to_ptr.vmem [resolvable:$true] %s590_s5 }
  0x4f   : > { %633 = sbr.rel (%p2316_p10) target bundleno = 2707 (0xa93), region = 84 }
  0x50   : > { %s586_s13 = scalar_lea.hbm %s2723_s8, %s2123_s29 }
  0x51   : > { %1695 = dma.hbm_to_vmem [thread:$0]  (!%p1693_p11), %s500_s30, 128, %s502_s25, [#allocation7]  }
  0x52   : > { %s588_s15 = sshll.u32 %s586_s13, 4  ;;  %s589_s15 = int_to_ptr.hbm [resolvable:$true] %s588_s15 }
  0x53   : > { %1705 = dma.hbm_to_vmem [thread:$0]  (!%p2384_p9), %s589_s15, 16, %s591_s5, %s519_s18  }
  0x54   : > { %2074 = dma.done.wait (%p2298_p4), [#allocation4], 128  }
  0x55   : > { %2076 = vsyncadd (%p2298_p4), [#allocation4], 4294967168 }
  0x56   : > { %2078 = dma.done.wait (%p62_p1), [#allocation7], 128  }
  0x57   : > { %2080 = vsyncadd (%p62_p1), [#allocation7], 4294967168  ;;  %s645_s2 = sand.u32 1, %s2288_s17   ;;  %s2422_s5 = sand.u32 1, %s2095_s22  }
  0x58   : > { %s646_s30 = scalar_lea.sflag [#allocation4], %s645_s2 }
  0x59   : > { %2082 = dma.done.wait (%p2305_p6), %s646_s30, 48  }
  0x5a   : > { %2084 = vsyncadd (%p2305_p6), %s646_s30, 4294967248  ;;  %p753_p4 = scmp.lt.s32.totalorder %s2115_s27, 1  ;;  %s2724_s16 = sld [smem:[#allocation29_spill]] }
  0x5b   : > { %s2725_s4 = sld [smem:[#allocation31_spill]]  ;;  %s657_s30 = scalar_lea.vmem [#allocation9], %s2422_s5 }
  0x5c   : > { %s2431_s19 = scalar_select %p753_p4, %s2115_s27, 1 }
  0x5d   : > { %s2727_s17 = sld [smem:[#allocation34_spill]]  ;;  %s666_s14 = scalar_lea.vmem [#allocation10], %s2422_s5 }
  0x5e   : > { %s1671_s20 = sshll.u32 %s2431_s19, 5  ;;  %s2728_s8 = sld [smem:[#allocation35_spill]] }
  0x5f   : > { %s1674_s28 = sshll.u32 %s2431_s19, 6  ;;  %s2730_s26 = sld [smem:[#allocation38_spill]] }
  0x60   : > { %s2441_s11 = scalar_lea.vmem %s2724_s16, %s1671_s20  ;;  %s2729_s16 = sld [smem:[#allocation36_spill]] }
  0x61   : > { %s2446_s7 = scalar_lea.vmem %s2725_s4, %s1671_s20  ;;  %s2731_s6 = sld [smem:[#allocation37_spill]] }
  0x62   : > { %p1649_p1 = scmp.ne.s32.totalorder %s2115_s27, 0 }
  0x63   : > { %s771_s24 = scalar_lea.vmem %s2727_s17, %s2431_s19 }
  0x64   : > { %s2459_s29 = scalar_lea.vmem %s2728_s8, %s1671_s20  ;;  %791 = sbr.rel (%p1649_p1) target bundleno = 109 (0x6d), region = 108 }
  0x65   : > { %s787_s12 = scalar_lea.vmem %s2730_s26, %s2431_s19 }
  0x66   : > { %s779_s9 = scalar_lea.vmem %s2729_s16, %s2431_s19 }
  0x67   : > { %s2473_s2 = scalar_lea.vmem %s2731_s6, %s1674_s28 }
  0x69   : > { %v792_v0 = vld [vmem:[#allocation6] sm:$0xff]  ;;  %v793_v1 = vld [vmem:[#allocation3] sm:$0xff]  ;;  %vm795_vm0 = vcmask 261120  }
  0x6a   : > { %v794_v2 = vadd.f32 %v793_v1, %v792_v0 }
  0x6c   : > { %796 = vst.msk [vmem:[#allocation2] sm:$0xff] %vm795_vm0, %v794_v2 }
  0x6d PF: > { %vm826_vm1 = vcmask 261120   ;;  %v2135_v5 = vmov 32.0   ;;  %v802_v17 = vld [vmem:[%s2441_s11 + $0x18] sm:$0xff]  ;;  %v801_v18 = vld [vmem:[%s2441_s11 + $0x10] sm:$0xff]  ;;  %v800_v19 = vld [vmem:[%s2441_s11 + $0x8] sm:$0xff]  ;;  %s2732_s1 = scalar_lea.vmem [#allocation8], %s2422_s5  ;;  %s2733_s21 = scalar_lea.vmem %s2656_s3, %s2431_s19 }
  0x6e   : > { %1823 = vrcp.f32 %v2135_v5  ;;  %882 = vmatpush.msra.mxu0 %v802_v17  ;;  %v799_v20 = vld [vmem:[%s2441_s11] sm:$0xff]  ;;  %s2136_s20 = smov 64   ;;  %s2137_s11 = smov 96   ;;  %vm894_vm6 = vcmask 64512  }
  0x6f   : > { %v1815_v30 = vld [vmem:[%s2732_s1] ss:$0 sm:$0xff]  ;;  %s2138_s17 = smov 120   ;;  %s2139_s10 = smov 72  }
  0x70   : > { %883 = vmatpush.msra.mxu0 %v801_v18  ;;  %v1816_v33 = vld [vmem:[%s2733_s21] ss:$0 sm:$0xff]  ;;  %s2140_s18 = smov 88   ;;  %s2141_s16 = smov 56  }
  0x71   : > { %v1817_v36 = vld [vmem:[%s657_s30] ss:$0 sm:$0xff]  ;;  %s2142_s28 = smov 80   ;;  %s2143_s25 = smov 104  }
  0x72   : > { %884 = vmatpush.msra.mxu0 %v800_v19  ;;  %s2144_s4 = smov 112   ;;  %s2145_s13 = smov 48  }
  0x73   : > { %v2478_v3 = vld [vmem:[#allocation2] sm:$0xff]  ;;  %s2146_s15 = smov 8   ;;  %s2147_s6 = smov 40  }
  0x74   : > { %v827_v4 = vsel %vm826_vm1, %v2478_v3, 0.0  ;;  %v1824_v6 = vpop.eup %1823  ;;  %885 = vmatpush.msra.mxu0 %v799_v20  ;;  %s2148_s30 = smov 16   ;;  %s2149_s1 = smov 24  }
  0x75   : > { %828 = vadd.xlane.f32.xlu0 %v827_v4  ;;  %v831_v7 = vmul.f32 32.0, %v1824_v6  ;;  %vm835_vm2 = vweird.f32 %v1824_v6  ;;  %s2734_s21 = sld [smem:[#allocation32_spill]]  ;;  %p1667_p6 = scmp.ne.s32.totalorder %s2115_s27, 1 }
  0x77   : > { %v832_v8 = vsub.f32 1.0, %v831_v7 }
  0x79   : > { %v833_v9 = vmul.f32 %v1824_v6, %v832_v8 }
  0x7b   : > { %v834_v10 = vadd.f32 %v1824_v6, %v833_v9 }
  0x7d   : > { %v2482_v11 = vsel %vm835_vm2, %v1824_v6, %v834_v10 }
  0xe8   : > { %v829_v12 = vpop.xlane.xlu0 %828 }
  0xe9   : > { %v837_v13 = vmul.f32 %v2482_v11, %v829_v12 }
  0xeb   : > { %v838_v14 = vsub.f32 %v2478_v3, %v837_v13 }
  0xed   : > { %v839_v15 = vmul.f32 %v838_v14, %v838_v14 }
  0xef   : > { %v840_v16 = vsel %vm826_vm1, %v839_v15, 0.0 }
  0xf0   : > { %841 = vadd.xlane.f32.xlu0 %v840_v16 }
 0x163   : > { %v842_v21 = vpop.xlane.xlu0 %841 }
 0x164   : > { %v843_v22 = vmul.f32 %v842_v21, %v2482_v11 }
 0x166   : > { %v844_v23 = vadd.f32 1e-06, %v843_v22 }
 0x168   : > { %1825 = vrsqrt.f32 %v844_v23  ;;  %vm851_vm4 = vweird.f32 %v844_v23 }
 0x16e   : > { %v1826_v24 = vpop.eup %1825 }
 0x16f   : > { %v846_v25 = vmul.f32 %v1826_v24, %v844_v23  ;;  %vm852_vm3 = vweird.f32 %v1826_v24 }
 0x170   : > { %vm853_vm5 = vmor %vm851_vm4, %vm852_vm3 }
 0x171   : > { %v847_v26 = vmul.f32 %v1826_v24, %v846_v25 }
 0x173   : > { %v848_v27 = vmul.f32 0.5, %v847_v26 }
 0x175   : > { %v849_v28 = vsub.f32 1.5, %v848_v27 }
 0x177   : > { %v850_v29 = vmul.f32 %v1826_v24, %v849_v28 }
 0x179   : > { %v854_v31 = vsel %vm853_vm5, %v1826_v24, %v850_v29 }
 0x17a   : > { %v855_v32 = vmul.f32 %v854_v31, %v838_v14 }
 0x17c   : > { %v859_v34 = vmul.f32 %v1815_v30, %v855_v32 }
 0x17e   : > { %v863_v35 = vadd.f32 %v1816_v33, %v859_v34 }
 0x180   : > { %1650 = vmatmul.msk.f32.vlgmr.msra.gmra.mxu0 %vm826_vm1, %v863_v35 }
 0x1fd   : > { %v887_v37 = vpop.f32.mrf.mxu0 }
 0x1fe   : > { %v2502_v38 = vadd.f32 %v1817_v36, %v887_v37 }
 0x200   : > { %944 = vrot.lane.b32.xlu0 %v2502_v38, %s2136_s20  ;;  %892 = vrot.lane.b32.xlu1 %v2502_v38, %s2137_s11  ;;  %v890_v39 = vmul.f32 0.35355338, %v2502_v38  ;;  %s2735_s20 = scalar_lea.vmem %s2734_s21, %s2431_s19  ;;  %s2739_s19 = sld [smem:[#allocation39_spill]] (!%p1667_p6) }
 0x202   : > { %970 = vrot.lane.b32.xlu2 %v890_v39, %s2138_s17 }
 0x208   : > { %1128 = vrot.lane.b32.xlu0 %v2502_v38, %s2139_s10  ;;  %972 = vrot.lane.b32.xlu1 %v2502_v38, %s2140_s18 }
 0x25c   : > { %v971_v43 = vpop.permute.xlu2 %970 }
 0x272   : > { %v945_v40 = vpop.permute.xlu0 %944  ;;  %v893_v41 = vpop.permute.xlu1 %892 }
 0x273   : > { %1651 = vmatpush.xpose.msk.msra.mxu1 %vm894_vm6, %v893_v41  ;;  %965 = vmatpush.msra.mxu2 %v945_v40 }
 0x276   : > { %1652 = vmatmul.msk.f32.vlgmr.msra.gmra.mxu1 %vm894_vm6, %v890_v39 }
 0x27a   : > { %v973_v42 = vpop.permute.xlu1 %972  ;;  %v1129_v51 = vpop.permute.xlu0 %1128 }
 0x27b   : > { %1654 = vmatpush.xpose.msk.msra.mxu3 %vm894_vm6, %v973_v42 }
 0x27e   : > { %1655 = vmatmul.msk.f32.vlgmr.msra.gmra.mxu3 %vm894_vm6, %v971_v43 }
 0x2f3   : > { %v917_v44 = vpop.f32.mrf.mxu1 }
 0x2f4   : > { %v920_v45 = vsel %vm894_vm6, %v917_v44, -inf }
 0x2f5   : > { %921 = vmax.xlane.f32.xlu2 %v920_v45 }
 0x301   : > { %v995_v46 = vpop.f32.mrf.mxu3 }
 0x302   : > { %v998_v47 = vsel %vm894_vm6, %v995_v46, -inf }
 0x303   : > { %999 = vmax.xlane.f32.xlu0 %v998_v47 }
 0x30d   : > { %1022 = vrot.lane.b32.xlu2 %v2502_v38, %s2141_s16  ;;  %s2740_s16 = sld [smem:[#allocation40_spill]] (!%p1667_p6) }
 0x317   : > { %1050 = vrot.lane.b32.xlu0 %v2502_v38, %s2142_s28 }
 0x368   : > { %v922_v48 = vpop.xlane.xlu2 %921 }
 0x369   : > { %v923_v49 = vsub.f32 %v917_v44, %v922_v48 }
 0x36b   : > { %v924_v50 = vmul.f32 1.442695, %v923_v49 }
 0x36d   : > { %1827 = vpow2.f32 %v924_v50 }
 0x370   : > { %v1023_v52 = vpop.permute.xlu2 %1022 }
 0x371   : > { %1043 = vmatpush.msrb.mxu2 %v1023_v52 }
 0x373   : > { %v1828_v53 = vpop.eup %1827 }
 0x374   : > { %v926_v54 = vsel %vm894_vm6, %v1828_v53, 0.0 }
 0x375   : > { %927 = vadd.xlane.f32.xlu1 %v926_v54 }
 0x376   : > { %v1000_v55 = vpop.xlane.xlu0 %999 }
 0x377   : > { %v1001_v56 = vsub.f32 %v995_v46, %v1000_v55 }
 0x379   : > { %v1002_v57 = vmul.f32 1.442695, %v1001_v56 }
 0x37b   : > { %1829 = vpow2.f32 %v1002_v57 }
 0x381   : > { %v1830_v58 = vpop.eup %1829 }
 0x382   : > { %v1004_v59 = vsel %vm894_vm6, %v1830_v58, 0.0 }
 0x383   : > { %1005 = vadd.xlane.f32.xlu0 %v1004_v59 }
 0x389   : > { %v1051_v60 = vpop.permute.xlu0 %1050 }
 0x38a   : > { %1657 = vmatpush.xpose.msk.msrb.mxu1 %vm894_vm6, %v1051_v60 }
 0x38e   : > { %1126 = vrot.lane.b32.xlu1 %v890_v39, %s2143_s25 }
 0x397   : > { %1048 = vrot.lane.b32.xlu0 %v890_v39, %s2144_s4 }
 0x3e8   : > { %v928_v61 = vpop.xlane.xlu1 %927 }
 0x3e9   : > { %1831 = vrcp.f32 %v928_v61  ;;  %v940_v1 = vand.u32 2147483648, %v928_v61  ;;  %v938_v4 = vand.u32 2147483647, %v928_v61  ;;  %vm934_vm8 = vweird.f32 %v928_v61 }
 0x3eb   : > { %v941_v7 = vor.u32 1.1754944e-38, %v940_v1  ;;  %vm939_vm10 = vcmp.eq.f32.partialorder %v938_v4, 8.507059e+37 }
 0x3ef   : > { %v1832_v62 = vpop.eup %1831 }
 0x3f0   : > { %v930_v63 = vmul.f32 %v1832_v62, %v928_v61  ;;  %vm935_vm7 = vweird.f32 %v1832_v62 }
 0x3f1   : > { %vm936_vm9 = vmor %vm934_vm8, %vm935_vm7 }
 0x3f2   : > { %v931_v0 = vsub.f32 1.0, %v930_v63 }
 0x3f4   : > { %v932_v2 = vmul.f32 %v1832_v62, %v931_v0 }
 0x3f6   : > { %v1006_v5 = vpop.xlane.xlu0 %1005  ;;  %v933_v6 = vadd.f32 %v1832_v62, %v932_v2 }
 0x3f7   : > { %1833 = vrcp.f32 %v1006_v5  ;;  %v1018_v15 = vand.u32 2147483648, %v1006_v5  ;;  %v1016_v17 = vand.u32 2147483647, %v1006_v5  ;;  %vm1012_vm12 = vweird.f32 %v1006_v5 }
 0x3f8   : > { %v937_v8 = vsel %vm936_vm9, %v1832_v62, %v933_v6  ;;  %v807_v6 = vld [vmem:[%s2446_s7 + $0x18] sm:$0xff]  ;;  %vm1217_vm9 = vcmask 130048  }
 0x3f9   : > { %v942_v9 = vsel %vm939_vm10, %v941_v7, %v937_v8  ;;  %v1019_v19 = vor.u32 1.1754944e-38, %v1018_v15  ;;  %vm1017_vm14 = vcmp.eq.f32.partialorder %v1016_v17, 8.507059e+37  ;;  %v806_v7 = vld [vmem:[%s2446_s7 + $0x10] sm:$0xff]  ;;  %1239 = vmatpush.msra.mxu1 %v807_v6  ;;  %v805_v8 = vld [vmem:[%s2446_s7 + $0x8] sm:$0xff]  ;;  %vm1219_vm10 = vcmask 195584  }
 0x3fa   : > { %v943_v10 = vmul.f32 %v1828_v53, %v942_v9  ;;  %v804_v9 = vld [vmem:[%s2446_s7] sm:$0xff] }
 0x3fb   : > { %1240 = vmatpush.msra.mxu1 %v806_v7  ;;  %v1818_v17 = vld [vmem:[%s2735_s20] ss:$0 sm:$0xff] }
 0x3fc   : > { %1653 = vmatmul.msk.f32.vlgmr.msra.gmra.mxu2 %vm894_vm6, %v943_v10  ;;  %v816_v7 = vld [vmem:[%s2473_s2] sm:$0xff] }
 0x3fd   : > { %v1834_v12 = vpop.eup %1833  ;;  %1660 = vmatpush.xpose.msk.msra.mxu2 %vm894_vm6, %v1129_v51  ;;  %1241 = vmatpush.msra.mxu1 %v805_v8 }
 0x3fe   : > { %v1008_v13 = vmul.f32 %v1834_v12, %v1006_v5  ;;  %vm1013_vm11 = vweird.f32 %v1834_v12 }
 0x3ff   : > { %vm1014_vm13 = vmor %vm1012_vm12, %vm1013_vm11  ;;  %1242 = vmatpush.msra.mxu1 %v804_v9 }
 0x400   : > { %v1009_v14 = vsub.f32 1.0, %v1008_v13  ;;  %v1127_v24 = vpop.permute.xlu1 %1126 }
 0x402   : > { %v1010_v16 = vmul.f32 %v1834_v12, %v1009_v14 }
 0x404   : > { %v1011_v18 = vadd.f32 %v1834_v12, %v1010_v16 }
 0x406   : > { %v1015_v20 = vsel %vm1014_vm13, %v1834_v12, %v1011_v18 }
 0x407   : > { %v1020_v21 = vsel %vm1017_vm14, %v1019_v19, %v1015_v20 }
 0x408   : > { %v1021_v22 = vmul.f32 %v1830_v58, %v1020_v21 }
 0x409   : > { %v1049_v23 = vpop.permute.xlu0 %1048 }
 0x40a   : > { %1656 = vmatmul.msk.f32.vlgmr.msrb.gmra.mxu2 %vm894_vm6, %v1021_v22  ;;  %1658 = vmatmul.msk.f32.vlgmr.msrb.gmra.mxu1 %vm894_vm6, %v1049_v23 }
 0x412   : > { %1661 = vmatmul.msk.f32.vlgmr.msra.gmra.mxu2 %vm894_vm6, %v1127_v24 }
 0x47f   : > { %v2525_v25 = vpop.f32.mrf.mxu2 }
 0x487   : > { %v1073_v26 = vpop.f32.mrf.mxu1 }
 0x488   : > { %v1076_v27 = vsel %vm894_vm6, %v1073_v26, -inf }
 0x489   : > { %1077 = vmax.xlane.f32.xlu2 %v1076_v27 }
 0x48d   : > { %v1045_v28 = vpop.f32.mrf.mxu2 }
 0x495   : > { %v1151_v29 = vpop.f32.mrf.mxu2 }
 0x496   : > { %v1154_v30 = vsel %vm894_vm6, %v1151_v29, -inf }
 0x497   : > { %1155 = vmax.xlane.f32.xlu0 %v1154_v30  ;;  %v811_v30 = vld [vmem:[%s2459_s29] sm:$0xff] }
 0x4ab   : > { %1100 = vrot.lane.b32.xlu0 %v2502_v38, %s2145_s13 }
 0x4fc   : > { %v1078_v31 = vpop.xlane.xlu2 %1077 }
 0x4fd   : > { %v1079_v32 = vsub.f32 %v1073_v26, %v1078_v31 }
 0x4ff   : > { %v1080_v33 = vmul.f32 1.442695, %v1079_v32 }
 0x501   : > { %1835 = vpow2.f32 %v1080_v33 }
 0x507   : > { %v1836_v34 = vpop.eup %1835 }
 0x508   : > { %v1082_v35 = vsel %vm894_vm6, %v1836_v34, 0.0 }
 0x509   : > { %1083 = vadd.xlane.f32.xlu1 %v1082_v35 }
 0x50a   : > { %v1156_v36 = vpop.xlane.xlu0 %1155 }
 0x50b   : > { %v1157_v37 = vsub.f32 %v1151_v29, %v1156_v36  ;;  %v812_v29 = vld [vmem:[%s2459_s29 + $0x8] sm:$0xff] }
 0x50d   : > { %v1158_v39 = vmul.f32 1.442695, %v1157_v37 }
 0x50f   : > { %1837 = vpow2.f32 %v1158_v39 }
 0x515   : > { %v1838_v40 = vpop.eup %1837 }
 0x516   : > { %v1160_v41 = vsel %vm894_vm6, %v1838_v40, 0.0 }
 0x517   : > { %1161 = vadd.xlane.f32.xlu2 %v1160_v41  ;;  %v1819_v41 = vld [vmem:[%s666_s14] ss:$0 sm:$0xff] }
 0x51d   : > { %v1101_v42 = vpop.permute.xlu0 %1100 }
 0x51e   : > { %1121 = vmatpush.msrb.mxu3 %v1101_v42 }
 0x522   : > { %1205 = vrot.lane.b32.xlu1 %v1045_v28, %s2146_s15  ;;  %v814_v28 = vld [vmem:[%s2459_s29 + $0x18] sm:$0xff] }
 0x523   : > { %1298 = vmatpush.msra.mxu3 %v814_v28 }
 0x52f   : > { %1178 = vrot.lane.b32.xlu2 %v2502_v38, %s2147_s6 }
 0x57c   : > { %v1084_v43 = vpop.xlane.xlu1 %1083 }
 0x57d   : > { %1839 = vrcp.f32 %v1084_v43  ;;  %v1096_v47 = vand.u32 2147483648, %v1084_v43  ;;  %v1094_v49 = vand.u32 2147483647, %v1084_v43  ;;  %vm1090_vm0 = vweird.f32 %v1084_v43 }
 0x57f   : > { %v1097_v52 = vor.u32 1.1754944e-38, %v1096_v47  ;;  %vm1095_vm3 = vcmp.eq.f32.partialorder %v1094_v49, 8.507059e+37  ;;  %v1821_v47 = vld [vmem:[%s779_s9] ss:$0 sm:$0xff] }
 0x583   : > { %v1840_v44 = vpop.eup %1839 }
 0x584   : > { %v1086_v45 = vmul.f32 %v1840_v44, %v1084_v43  ;;  %vm1091_vm15 = vweird.f32 %v1840_v44 }
 0x585   : > { %vm1092_vm2 = vmor %vm1090_vm0, %vm1091_vm15 }
 0x586   : > { %v1087_v46 = vsub.f32 1.0, %v1086_v45 }
 0x588   : > { %v1088_v48 = vmul.f32 %v1840_v44, %v1087_v46 }
 0x58a   : > { %v1089_v50 = vadd.f32 %v1840_v44, %v1088_v48  ;;  %v1162_v51 = vpop.xlane.xlu2 %1161 }
 0x58b   : > { %1841 = vrcp.f32 %v1162_v51  ;;  %v1174_v59 = vand.u32 2147483648, %v1162_v51  ;;  %v1172_v61 = vand.u32 2147483647, %v1162_v51  ;;  %vm1168_vm5 = vweird.f32 %v1162_v51 }
 0x58c   : > { %v1093_v53 = vsel %vm1092_vm2, %v1840_v44, %v1089_v50  ;;  %v1820_v44 = vld [vmem:[%s771_s24] ss:$0 sm:$0xff]  ;;  %vm1353_vm2 = vcmask 523264  }
 0x58d   : > { %v1098_v54 = vsel %vm1095_vm3, %v1097_v52, %v1093_v53  ;;  %v1175_v63 = vor.u32 1.1754944e-38, %v1174_v59  ;;  %vm1173_vm8 = vcmp.eq.f32.partialorder %v1172_v61, 8.507059e+37  ;;  %v823_v53 = vld [vmem:[%s2473_s2 + $0x38] sm:$0xff]  ;;  %v820_v61 = vld [vmem:[%s2473_s2 + $0x20] sm:$0xff] }
 0x58e   : > { %v1099_v55 = vmul.f32 %v1836_v34, %v1098_v54  ;;  %1365 = vmatpush.msrb.mxu0 %v823_v53 }
 0x590   : > { %1659 = vmatmul.msk.f32.vlgmr.msrb.gmra.mxu3 %vm894_vm6, %v1099_v55 }
 0x591   : > { %v1842_v38 = vpop.eup %1841 }
 0x592   : > { %v1164_v56 = vmul.f32 %v1842_v38, %v1162_v51  ;;  %v1179_v57 = vpop.permute.xlu2 %1178  ;;  %vm1169_vm4 = vweird.f32 %v1842_v38 }
 0x593   : > { %1199 = vmatpush.msrb.mxu2 %v1179_v57  ;;  %vm1170_vm7 = vmor %vm1168_vm5, %vm1169_vm4 }
 0x594   : > { %v1165_v58 = vsub.f32 1.0, %v1164_v56  ;;  %v1206_v12 = vpop.permute.xlu1 %1205 }
 0x595   : > { %v1216_v13 = vsel %vm894_vm6, %v2525_v25, %v1206_v12 }
 0x596   : > { %v1166_v60 = vmul.f32 %v1842_v38, %v1165_v58  ;;  %v821_v58 = vld [vmem:[%s2473_s2 + $0x28] sm:$0xff] }
 0x598   : > { %v1167_v62 = vadd.f32 %v1842_v38, %v1166_v60 }
 0x59a   : > { %v1171_v0 = vsel %vm1170_vm7, %v1842_v38, %v1167_v62  ;;  %v822_v38 = vld [vmem:[%s2473_s2 + $0x30] sm:$0xff] }
 0x59b   : > { %v1176_v1 = vsel %vm1173_vm8, %v1175_v63, %v1171_v0  ;;  %1366 = vmatpush.msrb.mxu0 %v822_v38  ;;  %v819_v63 = vld [vmem:[%s2473_s2 + $0x18] sm:$0xff] }
 0x59c   : > { %v1177_v2 = vmul.f32 %v1838_v40, %v1176_v1 }
 0x59d   : > { %1367 = vmatpush.msrb.mxu0 %v821_v58 }
 0x59e   : > { %1662 = vmatmul.msk.f32.vlgmr.msrb.gmra.mxu2 %vm894_vm6, %v1177_v2  ;;  %v818_v2 = vld [vmem:[%s2473_s2 + $0x10] sm:$0xff] }
 0x59f   : > { %1368 = vmatpush.msrb.mxu0 %v820_v61 }
 0x5a1   : > { %1369 = vmatpush.msrb.mxu0 %v819_v63 }
 0x5a3   : > { %1370 = vmatpush.msrb.mxu0 %v818_v2 }
 0x613   : > { %v1123_v4 = vpop.f32.mrf.mxu3 }
 0x614   : > { %1209 = vrot.lane.b32.xlu0 %v1123_v4, %s2148_s30 }
 0x621   : > { %v1201_v5 = vpop.f32.mrf.mxu2 }
 0x622   : > { %1213 = vrot.lane.b32.xlu0 %v1201_v5, %s2149_s1  ;;  %v817_v5 = vld [vmem:[%s2473_s2 + $0x8] sm:$0xff] }
 0x623   : > { %1371 = vmatpush.msrb.mxu0 %v817_v5 }
 0x625   : > { %1372 = vmatpush.msrb.mxu0 %v816_v7 }
 0x686   : > { %v1210_v10 = vpop.permute.xlu0 %1209 }
 0x687   : > { %v1218_v14 = vsel %vm1217_vm9, %v1216_v13, %v1210_v10 }
 0x694   : > { %v1214_v15 = vpop.permute.xlu0 %1213 }
 0x695   : > { %v1220_v16 = vsel %vm1219_vm10, %v1218_v14, %v1214_v15 }
 0x696   : > { %1663 = vmatmul.msk.f32.vlgmr.msra.gmra.mxu1 %vm826_vm1, %v1220_v16 }
 0x713   : > { %v1244_v18 = vpop.f32.mrf.mxu1 }
 0x714   : > { %v1245_v19 = vadd.f32 %v1818_v17, %v1244_v18 }
 0x716   : > { %v1247_v20 = vadd.f32 %v1245_v19, %v2478_v3  ;;  %v813_v3 = vld [vmem:[%s2459_s29 + $0x10] sm:$0xff] }
 0x717   : > { %1299 = vmatpush.msra.mxu3 %v813_v3 }
 0x718   : > { %1248 = vst.msk [vmem:[#allocation2] sm:$0xff] %vm826_vm1, %v1247_v20 }
 0x719   : > { %1300 = vmatpush.msra.mxu3 %v812_v29 }
 0x71b   : > { %1301 = vmatpush.msra.mxu3 %v811_v30 }
 0x71f   : > { %v2549_v21 = vld [vmem:[#allocation2] sm:$0xff] }
 0x720   : > { %v1250_v22 = vsel %vm826_vm1, %v2549_v21, 0.0 }
 0x721   : > { %1251 = vadd.xlane.f32.xlu2 %v1250_v22 }
 0x794   : > { %v1252_v23 = vpop.xlane.xlu2 %1251 }
 0x795   : > { %v1253_v24 = vmul.f32 %v1252_v23, %v2482_v11 }
 0x797   : > { %v1254_v25 = vsub.f32 %v2549_v21, %v1253_v24 }
 0x799   : > { %v1255_v26 = vmul.f32 %v1254_v25, %v1254_v25 }
 0x79b   : > { %v1256_v27 = vsel %vm826_vm1, %v1255_v26, 0.0 }
 0x79c   : > { %1257 = vadd.xlane.f32.xlu1 %v1256_v27 }
 0x80f   : > { %v1258_v31 = vpop.xlane.xlu1 %1257 }
 0x810   : > { %v1259_v32 = vmul.f32 %v1258_v31, %v2482_v11 }
 0x812   : > { %v1260_v33 = vadd.f32 1e-06, %v1259_v32 }
 0x814   : > { %1843 = vrsqrt.f32 %v1260_v33  ;;  %vm1267_vm11 = vweird.f32 %v1260_v33 }
 0x81a   : > { %v1844_v34 = vpop.eup %1843 }
 0x81b   : > { %v1262_v35 = vmul.f32 %v1844_v34, %v1260_v33  ;;  %vm1268_vm6 = vweird.f32 %v1844_v34 }
 0x81c   : > { %vm1269_vm12 = vmor %vm1267_vm11, %vm1268_vm6 }
 0x81d   : > { %v1263_v36 = vmul.f32 %v1844_v34, %v1262_v35 }
 0x81f   : > { %v1264_v37 = vmul.f32 0.5, %v1263_v36 }
 0x821   : > { %v1265_v39 = vsub.f32 1.5, %v1264_v37 }
 0x823   : > { %v1266_v40 = vmul.f32 %v1844_v34, %v1265_v39 }
 0x825   : > { %v1270_v42 = vsel %vm1269_vm12, %v1844_v34, %v1266_v40  ;;  %v1822_v34 = vld [vmem:[%s787_s12] ss:$0 sm:$0xff] }
 0x826   : > { %v1271_v43 = vmul.f32 %v1270_v42, %v1254_v25 }
 0x828   : > { %v1275_v45 = vmul.f32 %v1819_v41, %v1271_v43 }
 0x82a   : > { %v1279_v46 = vadd.f32 %v1820_v44, %v1275_v45 }
 0x82c   : > { %1664 = vmatmul.msk.f32.vlgmr.msra.gmra.mxu3 %vm826_vm1, %v1279_v46 }
 0x8af   : > { %v1303_v48 = vpop.f32.mrf.mxu3 }
 0x8b0   : > { %v1304_v49 = vadd.f32 %v1821_v47, %v1303_v48 }
 0x8b2   : > { %v1307_v50 = vmul.f32 0.70710677, %v1304_v49  ;;  %v1306_v31 = vmul.f32 0.5, %v1304_v49 }
 0x8b4   : > { %v1308_v51 = vmul.f32 %v1307_v50, %v1307_v50 }
 0x8b6   : > { %v1309_v52 = vmin.f32 %v1308_v51, 16.0 }
 0x8b8   : > { %v1310_v54 = vmul.f32 2.1237322e-06, %v1309_v52  ;;  %v1321_v55 = vmul.f32 3.8918573e-05, %v1309_v52 }
 0x8ba   : > { %v1311_v56 = vadd.f32 0.00028619796, %v1310_v54  ;;  %v1322_v57 = vadd.f32 0.001143296, %v1321_v55 }
 0x8bc   : > { %v1312_v59 = vmul.f32 %v1311_v56, %v1309_v52  ;;  %v1323_v60 = vmul.f32 %v1322_v57, %v1309_v52 }
 0x8be   : > { %v1324_v62 = vadd.f32 0.014752088, %v1323_v60  ;;  %v1313_v0 = vadd.f32 0.0036580483, %v1312_v59 }
 0x8c0   : > { %v1325_v1 = vmul.f32 %v1324_v62, %v1309_v52  ;;  %v1314_v6 = vmul.f32 %v1313_v0, %v1309_v52 }
 0x8c2   : > { %v1326_v4 = vadd.f32 0.112945676, %v1325_v1  ;;  %v1315_v10 = vadd.f32 0.05243302, %v1314_v6 }
 0x8c4   : > { %v1327_v8 = vmul.f32 %v1326_v4, %v1309_v52  ;;  %v1316_v14 = vmul.f32 %v1315_v10, %v1309_v52 }
 0x8c6   : > { %v1328_v9 = vadd.f32 0.4994258, %v1327_v8  ;;  %v1317_v15 = vadd.f32 0.18741608, %v1316_v14 }
 0x8c8   : > { %v1329_v12 = vmul.f32 %v1328_v9, %v1309_v52  ;;  %v1318_v17 = vmul.f32 %v1317_v15, %v1309_v52 }
 0x8ca   : > { %v1330_v13 = vadd.f32 1.0, %v1329_v12  ;;  %v1319_v22 = vadd.f32 1.1283791, %v1318_v17 }
 0x8cc   : > { %1845 = vrcp.f32 %v1330_v13  ;;  %v1342_v20 = vand.u32 2147483648, %v1330_v13  ;;  %v1340_v24 = vand.u32 2147483647, %v1330_v13  ;;  %vm1336_vm14 = vweird.f32 %v1330_v13 }
 0x8cd   : > { %v1320_v27 = vmul.f32 %v1319_v22, %v1307_v50 }
 0x8ce   : > { %v1343_v26 = vor.u32 1.1754944e-38, %v1342_v20  ;;  %vm1341_vm0 = vcmp.eq.f32.partialorder %v1340_v24, 8.507059e+37 }
 0x8d2   : > { %v1846_v16 = vpop.eup %1845 }
 0x8d3   : > { %v1332_v18 = vmul.f32 %v1846_v16, %v1330_v13  ;;  %vm1337_vm13 = vweird.f32 %v1846_v16 }
 0x8d4   : > { %vm1338_vm15 = vmor %vm1336_vm14, %vm1337_vm13 }
 0x8d5   : > { %v1333_v19 = vsub.f32 1.0, %v1332_v18 }
 0x8d7   : > { %v1334_v23 = vmul.f32 %v1846_v16, %v1333_v19 }
 0x8d9   : > { %v1335_v25 = vadd.f32 %v1846_v16, %v1334_v23 }
 0x8db   : > { %v1339_v28 = vsel %vm1338_vm15, %v1846_v16, %v1335_v25 }
 0x8dc   : > { %v1344_v3 = vsel %vm1341_vm0, %v1343_v26, %v1339_v28 }
 0x8dd   : > { %v1345_v29 = vmul.f32 %v1344_v3, %v1320_v27 }
 0x8df   : > { %v1665_v30 = vclamps-f32 %v1345_v29, 1.0 }
 0x8e1   : > { %v1348_v32 = vadd.f32 1.0, %v1665_v30 }
 0x8e3   : > { %v1349_v33 = vmul.f32 %v1348_v32, %v1306_v31 }
 0x8e5   : > { %1666 = vmatmul.msk.f32.vlgmr.msrb.gmra.mxu0 %vm1353_vm2, %v1349_v33 }
 0x962   : > { %v1374_v35 = vpop.f32.mrf.mxu0 }
 0x963   : > { %v1375_v36 = vadd.f32 %v1822_v34, %v1374_v35  ;;  %1382 = sbr.rel (%p1667_p6) target bundleno = 2684 (0xa7c), region = 112 }
 0x965   : > { %v1377_v37 = vadd.f32 %v1375_v36, %v2549_v21 }
 0x967   : > { %1378 = vst.msk [vmem:[#allocation2] sm:$0xff] %vm826_vm1, %v1377_v37 }
 0x968   : > { %v1847_v54 = vld [vmem:[%s2739_s19] ss:$0 sm:$0xff] }
 0x96e   : > { %v1385_v39 = vld [vmem:[#allocation2] sm:$0xff] }
 0x96f   : > { %v1386_v40 = vsel %vm826_vm1, %v1385_v39, 0.0 }
 0x970   : > { %1387 = vadd.xlane.f32.xlu0 %v1386_v40 }
 0x9e3   : > { %v1388_v41 = vpop.xlane.xlu0 %1387 }
 0x9e4   : > { %v1389_v42 = vmul.f32 %v1388_v41, %v2482_v11 }
 0x9e6   : > { %v1390_v43 = vsub.f32 %v1385_v39, %v1389_v42 }
 0x9e8   : > { %v1391_v44 = vmul.f32 %v1390_v43, %v1390_v43 }
 0x9ea   : > { %v1392_v45 = vsel %vm826_vm1, %v1391_v44, 0.0 }
 0x9eb   : > { %1393 = vadd.xlane.f32.xlu0 %v1392_v45 }
 0xa5e   : > { %v1394_v46 = vpop.xlane.xlu0 %1393 }
 0xa5f   : > { %v1395_v21 = vmul.f32 %v1394_v46, %v2482_v11  ;;  %v1848_v11 = vld [vmem:[%s2740_s16] ss:$0 sm:$0xff] }
 0xa61   : > { %v1396_v47 = vadd.f32 1e-06, %v1395_v21 }
 0xa63   : > { %1849 = vrsqrt.f32 %v1396_v47  ;;  %vm1403_vm4 = vweird.f32 %v1396_v47 }
 0xa69   : > { %v1850_v48 = vpop.eup %1849 }
 0xa6a   : > { %v1398_v49 = vmul.f32 %v1850_v48, %v1396_v47  ;;  %vm1404_vm3 = vweird.f32 %v1850_v48 }
 0xa6b   : > { %vm1405_vm5 = vmor %vm1403_vm4, %vm1404_vm3 }
 0xa6c   : > { %v1399_v50 = vmul.f32 %v1850_v48, %v1398_v49 }
 0xa6e   : > { %v1400_v51 = vmul.f32 0.5, %v1399_v50 }
 0xa70   : > { %v1401_v52 = vsub.f32 1.5, %v1400_v51 }
 0xa72   : > { %v1402_v53 = vmul.f32 %v1850_v48, %v1401_v52 }
 0xa74   : > { %v1406_v55 = vsel %vm1405_vm5, %v1850_v48, %v1402_v53 }
 0xa75   : > { %v1407_v38 = vmul.f32 %v1406_v55, %v1390_v43 }
 0xa77   : > { %v1411_v56 = vmul.f32 %v1847_v54, %v1407_v38 }
 0xa79   : > { %v1415_v57 = vadd.f32 %v1848_v11, %v1411_v56 }
 0xa7b   : > { %1416 = vst.msk [vmem:[#allocation11] sm:$0xff] %vm826_vm1, %v1415_v57 }
 0xa7c PF: > { %s2741_s28 = sld [smem:[#allocation18_spill]]  ;;  %s2150_s1 = smov [#allocation11]  }
 0xa7d   : > { %s2743_s15 = sld [smem:[#allocation41_spill]]  ;;  %s1425_s8 = sshll.u32 %s2150_s1, 4  ;;  %s1426_s8 = int_to_ptr.vmem [resolvable:$true] %s1425_s8 }
 0xa82   : > { %s2742_s25 = sshll.u32 %s2741_s28, 3 }
 0xa83   : > { %s1423_s30 = scalar_lea.hbm %s2743_s15, %s2742_s25  ;;  %s2021_s11 = scalar_lea.hbm %s2743_s15, 16 }
 0xa84   : > { %s1427_s26 = sshll.u32 %s1423_s30, 4  ;;  %s1428_s26 = int_to_ptr.hbm [resolvable:$true] %s1427_s26 }
 0xa85   : > { %s2015_s21 = sshra.s32 %s1428_s26, 4  ;;  %s2016_s21 = int_to_ptr.hbm [resolvable:$true] %s2015_s21 }
 0xa86   : > { %s2017_s20 = scalar_lea.hbm %s2016_s21, 8  ;;  %p2022_p3 = scmp.lt.s32.totalorder %s2016_s21, %s2743_s15 }
 0xa87   : > { %p2018_p10 = scmp.ne.s32.totalorder %s2016_s21, %s2017_s20  ;;  %p2023_p12 = scmp.lt.s32.totalorder %s2021_s11, %s2017_s20 }
 0xa89   : > { %p2019_p0 = pnand %p2018_p10, %p2310_p8  ;;  %p2024_p5 = por %p2023_p12, %p2022_p3 }
 0xa8b   : > { %p2020_p2 = pneg %p2019_p0 }
 0xa8d   : > { %p2025_p7 = pnand %p2024_p5, %p2020_p2 }
 0xa8f   : > { %2028 = shalt.err (!%p2025_p7)
}
 0xa90   : > { %1687 = dma.vmem_to_hbm [thread:$0]  (%p2310_p8), %s1426_s8, 128, %s1428_s26, [#allocation5]  }
 0xa91   : > { %2086 = dma.done.wait (%p2310_p8), [#allocation5], 128  }
 0xa92   : > { %2088 = vsyncadd (%p2310_p8), [#allocation5], 4294967168 }
 0xa93 PF: > { %s29_s0 = sadd.s32 1, %s2131_s0   ;;  %s2745_s18 = sld [smem:[#allocation24_spill]] }
 0xa94   : > { %p26_p9 = scmp.ge.s32.totalorder %s29_s0, 6   ;;  %s2746_s24 = sld [smem:[#allocation16_spill]] }
 0xa95   : > { %s2747_s25 = sld [smem:[#allocation17_spill]]  ;;  %s2753_s21 = smov %s2095_s22 }
 0xa96   : > { %s2748_s26 = sld [smem:[#allocation25_spill]]  ;;  %s2754_s22 = smov %s2099_s23 }
 0xa97   : > { %s2749_s27 = sld [smem:[#allocation19_spill]]  ;;  %28 = sbr.rel (!%p26_p9) target bundleno = 25 (0x19), region = 187 }
 0xa98   : > { %s2750_s28 = sld [smem:[#allocation20_spill]] }
 0xa99   : > { %s2751_s29 = sld [smem:[#allocation22_spill]]  ;;  %s2755_s23 = smov %s2745_s18 }
 0xa9a   : > { %s2752_s30 = sld [smem:[#allocation23_spill]] }
 0xa9c   :  { %1441 = vsyncpa [#allocation4], 1 }
 0xa9d   :  { %1443 = vsyncpa [#allocation4 + $0x1], 1 }
 0xa9e   :  { %1444 = vsyncpa [#allocation7], 1 }
 0xa9f   :  { %1445 = vsyncpa [#allocation5], 1 }
 0xaa0   :  { %1447 = vsyncpa [#allocation5 + $0x1], 1 }

// kernel: tpu_custom_call.1
= control target key start
LH: loop header
LB: loop body
LE: loop exit
PB: predicated region body
PF: predicated region fallthrough
CT: control target
= control target key end

     0   :  { %s2739_s0 = inlined_call_operand.hbm [shape: f32[2,8,32], index: 0, kind: input, shape index: {}]   ;;  %s2740_s1 = inlined_call_operand.hbm [shape: f32[1,8,32], index: 1, kind: input, shape index: {}]   ;;  %s2741_s2 = inlined_call_operand.hbm [shape: f32[2,1,32], index: 2, kind: input, shape index: {}]   ;;  %s2742_s3 = inlined_call_operand.vmem [shape: f32[2,1,32], index: 3, kind: input, shape index: {}]   ;;  %s2743_s4 = inlined_call_operand.vmem [shape: f32[2,32,96], index: 4, kind: input, shape index: {}]   ;;  %s2744_s5 = inlined_call_operand.hbm [shape: f32[2,1,96], index: 5, kind: input, shape index: {}]   ;;  %s2745_s6 = inlined_call_operand.vmem [shape: f32[2,32,32], index: 6, kind: input, shape index: {}]   ;;  %s2746_s7 = inlined_call_operand.vmem [shape: f32[2,1,32], index: 7, kind: input, shape index: {}]   ;;  %s2747_s8 = inlined_call_operand.hbm [shape: f32[2,1,32], index: 8, kind: input, shape index: {}]   ;;  %s2748_s9 = inlined_call_operand.vmem [shape: f32[2,1,32], index: 9, kind: input, shape index: {}]   ;;  %s2749_s10 = inlined_call_operand.vmem [shape: f32[2,32,64], index: 10, kind: input, shape index: {}]   ;;  %s2750_s11 = inlined_call_operand.vmem [shape: f32[2,1,64], index: 11, kind: input, shape index: {}]   ;;  %s2751_s12 = inlined_call_operand.vmem [shape: f32[2,64,32], index: 12, kind: input, shape index: {}]   ;;  %s2752_s13 = inlined_call_operand.vmem [shape: f32[2,1,32], index: 13, kind: input, shape index: {}]   ;;  %s2753_s14 = inlined_call_operand.vmem [shape: f32[1,32], index: 14, kind: input, shape index: {}]   ;;  %s2754_s15 = inlined_call_operand.vmem [shape: f32[1,32], index: 15, kind: input, shape index: {}]   ;;  %s2755_s16 = inlined_call_operand.hbm [shape: f32[2,8,32], index: 16, kind: output, shape index: {}]  }
   0x1   :  { %2771 = sst [smem:[#allocation30_spill]] %s2739_s0 }
   0x2   :  { %2772 = sst [smem:[#allocation31_spill]] %s2740_s1 }
   0x3   :  { %2773 = sst [smem:[#allocation32_spill]] %s2741_s2 }
   0x4   :  { %2774 = sst [smem:[#allocation33_spill]] %s2743_s4 }
   0x5   :  { %2775 = sst [smem:[#allocation34_spill]] %s2744_s5 }
   0x6   :  { %2776 = sst [smem:[#allocation35_spill]] %s2745_s6 }
   0x7   :  { %2777 = sst [smem:[#allocation36_spill]] %s2746_s7 }
   0x8   :  { %2778 = sst [smem:[#allocation37_spill]] %s2747_s8 }
   0x9   :  { %2779 = sst [smem:[#allocation38_spill]] %s2748_s9 }
   0xa   :  { %2780 = sst [smem:[#allocation39_spill]] %s2749_s10 }
   0xb   :  { %2781 = sst [smem:[#allocation40_spill]] %s2750_s11 }
   0xc   :  { %2782 = sst [smem:[#allocation41_spill]] %s2751_s12 }
   0xd   :  { %2783 = sst [smem:[#allocation42_spill]] %s2752_s13 }
   0xe   :  { %2784 = sst [smem:[#allocation43_spill]] %s2753_s14 }
   0xf   :  { %2785 = sst [smem:[#allocation44_spill]] %s2754_s15 }
  0x10   :  { %2786 = sst [smem:[#allocation45_spill]] %s2755_s16 }
  0x11   :  { %21 = vsyncpa [#allocation4], 0 }
  0x12   :  { %23 = vsyncpa [#allocation4 + $0x1], 0 }
  0x13   :  { %24 = vsyncpa [#allocation7], 0 }
  0x14   :  { %25 = vsyncpa [#allocation5], 0 }
  0x15   :  { %27 = vsyncpa [#allocation5 + $0x1], 0  ;;  %s2297_s21 = smov 0   ;;  %s2299_s22 = smov 0  }
  0x16   :  { %s2301_s23 = smov 0   ;;  %s2303_s24 = smov 0  }
  0x17   :  { %s2305_s25 = smov 0   ;;  %s2307_s26 = smov 0  }
  0x18   :  { %s2309_s27 = smov 0   ;;  %s2311_s28 = smov 0  }
  0x19   :  { %s2313_s29 = smov 0   ;;  %s2315_s30 = smov 0  }
  0x1a   :  { %s2317_s0 = smov 0  }
  0x1b LB: > { %2787 = sst [smem:[#allocation16_spill]] %s2158_s22  ;;  %s1690_s17 = sadd.s32 4294967294, %s2194_s0   ;;  %s2194_s0 = sphi %s2317_s0, %s33_s0   ;;  %s2190_s30 = sphi %s2315_s30, %s2846_s30   ;;  %s2186_s29 = sphi %s2313_s29, %s2845_s29   ;;  %s2182_s28 = sphi %s2311_s28, %s2844_s28   ;;  %s2178_s27 = sphi %s2309_s27, %s2849_s27   ;;  %s2174_s26 = sphi %s2307_s26, %s2842_s26   ;;  %s2170_s25 = sphi %s2305_s25, %s2848_s25   ;;  %s2166_s24 = sphi %s2303_s24, %s2847_s24   ;;  %s2162_s23 = sphi %s2301_s23, %s2840_s23   ;;  %s2158_s22 = sphi %s2299_s22, %s2839_s22   ;;  %s2154_s21 = sphi %s2297_s21, %s2838_s21  }
  0x1c   : > { %2788 = sst [smem:[#allocation17_spill]] %s2162_s23  ;;  %s42_s18 = sadd.s32 1, %s2186_s29 }
  0x1d   : > { %2789 = sst [smem:[#allocation18_spill]] %s2166_s24  ;;  %p43_p0 = scmp.ge.s32.totalorder %s42_s18, 2 }
  0x1e   : > { %2790 = sst [smem:[#allocation19_spill]] %s2174_s26  ;;  %s45_s19 = sadd.s32 1, %s2190_s30 }
  0x1f   : > { %2791 = sst [smem:[#allocation20_spill]] %s2182_s28  ;;  %s52_s20 = sadd.s32 1, %s2174_s26 }
  0x20   : > { %2792 = sst [smem:[#allocation21_spill]] %s2186_s29  ;;  %p59_p1 = scmp.ne.s32.totalorder %s2174_s26, %s2170_s25 }
  0x21   : > { %2793 = sst [smem:[#allocation22_spill]] %s2190_s30  ;;  %s2851_s18 = smov (%p43_p0, %s42_s18), 0 }
  0x22   : > { %2794 = sst [smem:[#allocation23_spill]] %s2194_s0  ;;  %s2853_s19 = smov (!%p43_p0, %s45_s19), %s2190_s30 }
  0x23   : > { %2795 = sst [smem:[#allocation24_spill]] %s2851_s18  ;;  %p60_p2 = scmp.eq.s32.totalorder %s2194_s0, 0 }
  0x24   : > { %p65_p3 = scmp.ne.s32.totalorder %s2170_s25, %s2166_s24  ;;  %p47_p4 = scmp.ge.s32.totalorder %s2853_s19, 2 }
  0x25   : > { %s96_s16 = ssub.s32 %s2186_s29, %s2851_s18  ;;  %p2369_p5 = por %p60_p2, %p59_p1 }
  0x26   : > { %p97_p6 = scmp.eq.s32.totalorder %s96_s16, 0  ;;  %s2855_s19 = smov (%p47_p4, %s2853_s19), 0 }
  0x27   : > { %2797 = sst [smem:[#allocation25_spill]] %s2855_s19  ;;  %s99_s15 = sadd.s32 1, %s2162_s23 }
  0x28   : > { %p106_p7 = scmp.ne.s32.totalorder %s2162_s23, %s2158_s22  ;;  %s49_s14 = ssub.s32 %s2190_s30, %s2855_s19 }
  0x29   : > { %p470_p8 = scmp.eq.s32.totalorder %s1690_s17, 3  ;;  %p50_p9 = scmp.eq.s32.totalorder %s49_s14, 0 }
  0x2a   : > { %p2380_p10 = por %p106_p7, %p60_p2  ;;  %p1771_p12 = scmp.lt.s32.totalorder %s2194_s0, 4 }
  0x2b   : > { %s2385_s18 = scalar_select %p97_p6, %s2162_s23, %s99_s15  }
  0x2c   : > { %s2388_s13 = scalar_select %p50_p9, %s2174_s26, %s52_s20  }
  0x2d   : > { %2799 = sst [smem:[#allocation26_spill]] %s2385_s18  ;;  %p2393_p11 = por %p470_p8, %p65_p3 }
  0x2e   : > { %2800 = sst [smem:[#allocation27_spill]] %s2388_s13  ;;  %s508_s17 = sand.u32 1, %s2194_s0  }
  0x2f   : > { %s2801_s16 = scalar_select %p2393_p11, 1, 0 }
  0x30   : > { %s510_s14 = sand.u32 1, %s2174_s26   ;;  %s1695_s11 = sshll.u32 %s2190_s30, 3 }
  0x31   : > { %2802 = sst [smem:[#allocation28_spill]] %s2801_s16  ;;  %s1694_s19 = sshll.u32 %s510_s14, 3 }
  0x32   : > { %s2803_s7 = sld [smem:[#allocation30_spill]]  ;;  %s512_s18 = scalar_lea.vmem [#allocation3], %s1694_s19 }
  0x33   : > { %s520_s20 = sshll.u32 %s512_s18, 4  ;;  %p1754_p13 = pnand %p1771_p12, %p2369_p5  ;;  %s521_s20 = int_to_ptr.vmem [resolvable:$true] %s520_s20 }
  0x34   : > { %p2408_p0 = pnand %p1771_p12, %p2380_p10  ;;  %s2413_s14 = sand.u32 1, %s2162_s23  }
  0x35   : > { %s2805_s2 = sld [smem:[#allocation32_spill]]  ;;  %s530_s10 = scalar_lea.vmem [#allocation8], %s2413_s14 }
  0x36   : > { %s2806_s5 = sld [smem:[#allocation34_spill]]  ;;  %s561_s18 = scalar_lea.vmem [#allocation9], %s2413_s14 }
  0x37   : > { %s568_s19 = sshll.u32 %s561_s18, 4  ;;  %p112_p4 = scmp.ne.s32.totalorder %s2158_s22, %s2154_s21  ;;  %s569_s19 = int_to_ptr.vmem [resolvable:$true] %s568_s19 }
  0x38   : > { %s516_s6 = scalar_lea.hbm %s2803_s7, %s1695_s11  ;;  %s2419_s7 = scalar_lea.sflag [#allocation4], %s508_s17 }
  0x39   : > { %s518_s15 = sshll.u32 %s516_s6, 4  ;;  %s537_s11 = sshll.u32 %s530_s10, 4  ;;  %s519_s15 = int_to_ptr.hbm [resolvable:$true] %s518_s15  ;;  %s538_s11 = int_to_ptr.vmem [resolvable:$true] %s537_s11 }
  0x3a   : > { %1756 = dma.hbm_to_vmem [thread:$0]  (!%p1754_p13), %s519_s15, 128, %s521_s20, %s2419_s7  }
  0x3b   : > { %s533_s6 = scalar_lea.hbm %s2805_s2, %s2186_s29  ;;  %s2435_s17 = sadd.s32 4294967295, %s2194_s0  }
  0x3c   : > { %s535_s9 = sshll.u32 %s533_s6, 4  ;;  %s564_s30 = scalar_lea.hbm %s2806_s5, %s2186_s29  ;;  %s536_s9 = int_to_ptr.hbm [resolvable:$true] %s535_s9 }
  0x3d   : > { %1759 = dma.hbm_to_vmem [thread:$0]  (!%p2408_p0), %s536_s9, 16, %s538_s11, %s2419_s7  }
  0x3e   : > { %s566_s16 = sshll.u32 %s564_s30, 4  ;;  %p66_p2 = scmp.eq.s32.totalorder %s2435_s17, 0  ;;  %s567_s16 = int_to_ptr.hbm [resolvable:$true] %s566_s16 }
  0x3f   : > { %1762 = dma.hbm_to_vmem [thread:$0]  (!%p2408_p0), %s567_s16, 16, %s569_s19, %s2419_s7  }
  0x40   : > { %p464_p5 = scmp.eq.s32.totalorder %s2435_s17, 3  ;;  %p1691_p6 = scmp.ge.s32.totalorder %s2194_s0, 1 }
  0x41   : > { %p2447_p7 = por %p66_p2, %p65_p3  ;;  %p2453_p8 = por %p112_p4, %p66_p2 }
  0x42   : > { %p2460_p9 = por %p464_p5, %p59_p1  ;;  %p477_p10 = scmp.lt.s32.totalorder %s2194_s0, 5 }
  0x43   : > { %s2811_s1 = sld [smem:[#allocation31_spill]]  ;;  %s2196_s12 = smov [#allocation6]  }
  0x44   : > { %s2809_s6 = scalar_select %p2460_p9, 1, 0 }
  0x45   : > { %p2468_p3 = pnand %p1691_p6, %p477_p10  ;;  %s491_s28 = sshll.u32 %s2196_s12, 4  ;;  %s492_s28 = int_to_ptr.vmem [resolvable:$true] %s491_s28 }
  0x46   : > { %2810 = sst [smem:[#allocation29_spill]] %s2809_s6  ;;  %s592_s21 = scalar_lea.vmem [#allocation10], %s2413_s14 }
  0x47   : > { %p1749_p12 = pneg %p2468_p3  ;;  %s2813_s8 = sld [smem:[#allocation37_spill]] }
  0x48   : > { %s599_s9 = sshll.u32 %s592_s21, 4  ;;  %s644_s12 = sand.u32 (!%p2468_p3), 1, %s2435_s17   ;;  %s600_s9 = int_to_ptr.vmem [resolvable:$true] %s599_s9 }
  0x49   : > { %s489_s10 = sshll.u32 %s2811_s1, 4  ;;  %p1750_p1 = pnand %p1749_p12, %p66_p2  ;;  %s490_s10 = int_to_ptr.hbm [resolvable:$true] %s489_s10 }
  0x4a   : > { %s2761_s30 = sand.u32 (!%p2468_p3), 1, %s2170_s25  }
  0x4b   : > { %1752 = dma.hbm_to_vmem [thread:$0]  (!%p1750_p1), %s490_s10, 128, %s492_s28, [#allocation7]  }
  0x4c   : > { %642 = sbr.rel (%p2468_p3) target bundleno = 2701 (0xa8d), region = 84  ;;  %s2490_s18 = sshll.u32 (!%p2468_p3), %s2761_s30, 3 }
  0x4d   : > { %s595_s19 = scalar_lea.hbm %s2813_s8, %s2186_s29  ;;  %s648_s14 = scalar_lea.vmem (!%p2468_p3), [#allocation3], %s2490_s18 }
  0x4e   : > { %s597_s16 = sshll.u32 %s595_s19, 4  ;;  %s645_s19 = scalar_lea.sflag (!%p2468_p3), [#allocation4], %s644_s12  ;;  %s598_s16 = int_to_ptr.hbm [resolvable:$true] %s597_s16 }
  0x4f   : > { %1765 = dma.hbm_to_vmem [thread:$0]  (!%p2408_p0), %s598_s16, 16, %s600_s9, %s2419_s7  }
  0x51   : > { %2137 = dma.done.wait (%p2447_p7), %s645_s19, 128  }
  0x52   : > { %2139 = vsyncadd (%p2447_p7), %s645_s19, 4294967168 }
  0x53   : > { %2141 = dma.done.wait (%p66_p2), [#allocation7], 128  }
  0x54   : > { %2143 = vsyncadd (%p66_p2), [#allocation7], 4294967168  ;;  %s2502_s13 = sand.u32 1, %s2158_s22  }
  0x55   : > { %2145 = dma.done.wait (%p2453_p8), %s645_s19, 48  }
  0x56   : > { %2147 = vsyncadd (%p2453_p8), %s645_s19, 4294967248  ;;  %p777_p13 = scmp.lt.s32.totalorder %s2178_s27, 1  ;;  %s2814_s4 = sld [smem:[#allocation33_spill]] }
  0x57   : > { %s2815_s19 = sld [smem:[#allocation35_spill]]  ;;  %s671_s2 = scalar_lea.vmem [#allocation9], %s2502_s13 }
  0x58   : > { %s2511_s15 = scalar_select %p777_p13, %s2178_s27, 1 }
  0x59   : > { %s2817_s8 = sld [smem:[#allocation38_spill]]  ;;  %s680_s5 = scalar_lea.vmem [#allocation10], %s2502_s13 }
  0x5a   : > { %s1731_s11 = sshll.u32 %s2511_s15, 5  ;;  %s2818_s23 = sld [smem:[#allocation39_spill]] }
  0x5b   : > { %s1734_s9 = sshll.u32 %s2511_s15, 6  ;;  %s2820_s0 = sld [smem:[#allocation42_spill]] }
  0x5c   : > { %s2521_s21 = scalar_lea.vmem %s2814_s4, %s1731_s11  ;;  %s2819_s4 = sld [smem:[#allocation40_spill]] }
  0x5d   : > { %s2526_s30 = scalar_lea.vmem %s2815_s19, %s1731_s11  ;;  %s2821_s10 = sld [smem:[#allocation41_spill]] }
  0x5e   : > { %p1708_p0 = scmp.ne.s32.totalorder %s2178_s27, 0 }
  0x5f   : > { %s795_s29 = scalar_lea.vmem %s2817_s8, %s2511_s15  ;;  %s776_s8 = scalar_lea.vmem [#allocation11], %s2490_s18 }
  0x60   : > { %s2539_s22 = scalar_lea.vmem %s2818_s23, %s1731_s11  ;;  %815 = sbr.rel (%p1708_p0) target bundleno = 105 (0x69), region = 108 }
  0x61   : > { %s811_s6 = scalar_lea.vmem %s2820_s0, %s2511_s15 }
  0x62   : > { %s803_s24 = scalar_lea.vmem %s2819_s4, %s2511_s15 }
  0x63   : > { %s2553_s1 = scalar_lea.vmem %s2821_s10, %s1734_s9 }
  0x65   : > { %v816_v0 = vld [vmem:[#allocation6] sm:$0xff]  ;;  %v817_v1 = vld [vmem:[%s648_s14] sm:$0xff]  ;;  %vm819_vm0 = vcmask 261120  }
  0x66   : > { %v818_v2 = vadd.f32 %v817_v1, %v816_v0 }
  0x68   : > { %820 = vst.msk [vmem:[#allocation2] sm:$0xff] %vm819_vm0, %v818_v2 }
  0x69 PF: > { %vm850_vm1 = vcmask 261120   ;;  %v2197_v5 = vmov 32.0   ;;  %v826_v17 = vld [vmem:[%s2521_s21 + $0x18] sm:$0xff]  ;;  %v825_v18 = vld [vmem:[%s2521_s21 + $0x10] sm:$0xff]  ;;  %v824_v19 = vld [vmem:[%s2521_s21 + $0x8] sm:$0xff]  ;;  %s2822_s4 = scalar_lea.vmem [#allocation8], %s2502_s13  ;;  %s2823_s0 = scalar_lea.vmem %s2742_s3, %s2511_s15 }
  0x6a   : > { %1886 = vrcp.f32 %v2197_v5  ;;  %906 = vmatpush.msra.mxu0 %v826_v17  ;;  %v823_v20 = vld [vmem:[%s2521_s21] sm:$0xff]  ;;  %s2198_s14 = smov 64   ;;  %s2199_s20 = smov 96   ;;  %vm918_vm6 = vcmask 64512  }
  0x6b   : > { %v1878_v30 = vld [vmem:[%s2822_s4] ss:$0 sm:$0xff]  ;;  %s2200_s11 = smov 120   ;;  %s2201_s21 = smov 72  }
  0x6c   : > { %907 = vmatpush.msra.mxu0 %v825_v18  ;;  %v1879_v33 = vld [vmem:[%s2823_s0] ss:$0 sm:$0xff]  ;;  %s2202_s28 = smov 88   ;;  %s2203_s16 = smov 56  }
  0x6d   : > { %v1880_v36 = vld [vmem:[%s671_s2] ss:$0 sm:$0xff]  ;;  %s2204_s9 = smov 80   ;;  %s2205_s12 = smov 104  }
  0x6e   : > { %908 = vmatpush.msra.mxu0 %v824_v19  ;;  %s2206_s19 = smov 112   ;;  %s2207_s7 = smov 48  }
  0x6f   : > { %v2559_v3 = vld [vmem:[#allocation2] sm:$0xff]  ;;  %s2208_s17 = smov 8   ;;  %s2209_s10 = smov 40  }
  0x70   : > { %v851_v4 = vsel %vm850_vm1, %v2559_v3, 0.0  ;;  %v1887_v6 = vpop.eup %1886  ;;  %909 = vmatpush.msra.mxu0 %v823_v20  ;;  %s2210_s2 = smov 16   ;;  %s2211_s4 = smov 24  }
  0x71   : > { %852 = vadd.xlane.f32.xlu0 %v851_v4  ;;  %v855_v7 = vmul.f32 32.0, %v1887_v6  ;;  %vm859_vm2 = vweird.f32 %v1887_v6  ;;  %s2824_s0 = sld [smem:[#allocation36_spill]]  ;;  %p1726_p2 = scmp.ne.s32.totalorder %s2178_s27, 1 }
  0x72   : > { %s2829_s13 = sld [smem:[#allocation43_spill]] (!%p1726_p2) }
  0x73   : > { %v856_v8 = vsub.f32 1.0, %v855_v7 }
  0x75   : > { %v857_v9 = vmul.f32 %v1887_v6, %v856_v8 }
  0x77   : > { %v858_v10 = vadd.f32 %v1887_v6, %v857_v9 }
  0x79   : > { %v2563_v11 = vsel %vm859_vm2, %v1887_v6, %v858_v10 }
  0xe4   : > { %v853_v12 = vpop.xlane.xlu0 %852 }
  0xe5   : > { %v861_v13 = vmul.f32 %v2563_v11, %v853_v12 }
  0xe7   : > { %v862_v14 = vsub.f32 %v2559_v3, %v861_v13 }
  0xe9   : > { %v863_v15 = vmul.f32 %v862_v14, %v862_v14 }
  0xeb   : > { %v864_v16 = vsel %vm850_vm1, %v863_v15, 0.0 }
  0xec   : > { %865 = vadd.xlane.f32.xlu0 %v864_v16 }
 0x15f   : > { %v866_v21 = vpop.xlane.xlu0 %865 }
 0x160   : > { %v867_v22 = vmul.f32 %v866_v21, %v2563_v11 }
 0x162   : > { %v868_v23 = vadd.f32 1e-06, %v867_v22 }
 0x164   : > { %1888 = vrsqrt.f32 %v868_v23  ;;  %vm875_vm4 = vweird.f32 %v868_v23 }
 0x16a   : > { %v1889_v24 = vpop.eup %1888 }
 0x16b   : > { %v870_v25 = vmul.f32 %v1889_v24, %v868_v23  ;;  %vm876_vm3 = vweird.f32 %v1889_v24 }
 0x16c   : > { %vm877_vm5 = vmor %vm875_vm4, %vm876_vm3 }
 0x16d   : > { %v871_v26 = vmul.f32 %v1889_v24, %v870_v25 }
 0x16f   : > { %v872_v27 = vmul.f32 0.5, %v871_v26 }
 0x171   : > { %v873_v28 = vsub.f32 1.5, %v872_v27 }
 0x173   : > { %v874_v29 = vmul.f32 %v1889_v24, %v873_v28 }
 0x175   : > { %v878_v31 = vsel %vm877_vm5, %v1889_v24, %v874_v29 }
 0x176   : > { %v879_v32 = vmul.f32 %v878_v31, %v862_v14 }
 0x178   : > { %v883_v34 = vmul.f32 %v1878_v30, %v879_v32 }
 0x17a   : > { %v887_v35 = vadd.f32 %v1879_v33, %v883_v34 }
 0x17c   : > { %1709 = vmatmul.msk.f32.vlgmr.msra.gmra.mxu0 %vm850_vm1, %v887_v35 }
 0x1f9   : > { %v911_v37 = vpop.f32.mrf.mxu0 }
 0x1fa   : > { %v2583_v38 = vadd.f32 %v1880_v36, %v911_v37 }
 0x1fc   : > { %968 = vrot.lane.b32.xlu0 %v2583_v38, %s2198_s14  ;;  %916 = vrot.lane.b32.xlu1 %v2583_v38, %s2199_s20  ;;  %v914_v39 = vmul.f32 0.35355338, %v2583_v38  ;;  %s2825_s14 = scalar_lea.vmem %s2824_s0, %s2511_s15 }
 0x1fe   : > { %994 = vrot.lane.b32.xlu2 %v914_v39, %s2200_s11 }
 0x204   : > { %1152 = vrot.lane.b32.xlu0 %v2583_v38, %s2201_s21  ;;  %996 = vrot.lane.b32.xlu1 %v2583_v38, %s2202_s28 }
 0x258   : > { %v995_v43 = vpop.permute.xlu2 %994 }
 0x26e   : > { %v969_v40 = vpop.permute.xlu0 %968  ;;  %v917_v41 = vpop.permute.xlu1 %916 }
 0x26f   : > { %1710 = vmatpush.xpose.msk.msra.mxu1 %vm918_vm6, %v917_v41  ;;  %989 = vmatpush.msra.mxu2 %v969_v40 }
 0x272   : > { %1711 = vmatmul.msk.f32.vlgmr.msra.gmra.mxu1 %vm918_vm6, %v914_v39 }
 0x276   : > { %v997_v42 = vpop.permute.xlu1 %996  ;;  %v1153_v51 = vpop.permute.xlu0 %1152 }
 0x277   : > { %1713 = vmatpush.xpose.msk.msra.mxu3 %vm918_vm6, %v997_v42 }
 0x27a   : > { %1714 = vmatmul.msk.f32.vlgmr.msra.gmra.mxu3 %vm918_vm6, %v995_v43 }
 0x2ef   : > { %v941_v44 = vpop.f32.mrf.mxu1 }
 0x2f0   : > { %v944_v45 = vsel %vm918_vm6, %v941_v44, -inf }
 0x2f1   : > { %945 = vmax.xlane.f32.xlu2 %v944_v45 }
 0x2fd   : > { %v1019_v46 = vpop.f32.mrf.mxu3 }
 0x2fe   : > { %v1022_v47 = vsel %vm918_vm6, %v1019_v46, -inf }
 0x2ff   : > { %1023 = vmax.xlane.f32.xlu0 %v1022_v47 }
 0x309   : > { %1046 = vrot.lane.b32.xlu2 %v2583_v38, %s2203_s16  ;;  %s2830_s16 = sld [smem:[#allocation44_spill]] (!%p1726_p2) }
 0x313   : > { %1074 = vrot.lane.b32.xlu0 %v2583_v38, %s2204_s9 }
 0x364   : > { %v946_v48 = vpop.xlane.xlu2 %945 }
 0x365   : > { %v947_v49 = vsub.f32 %v941_v44, %v946_v48 }
 0x367   : > { %v948_v50 = vmul.f32 1.442695, %v947_v49 }
 0x369   : > { %1890 = vpow2.f32 %v948_v50 }
 0x36c   : > { %v1047_v52 = vpop.permute.xlu2 %1046 }
 0x36d   : > { %1067 = vmatpush.msrb.mxu2 %v1047_v52 }
 0x36f   : > { %v1891_v53 = vpop.eup %1890 }
 0x370   : > { %v950_v54 = vsel %vm918_vm6, %v1891_v53, 0.0 }
 0x371   : > { %951 = vadd.xlane.f32.xlu1 %v950_v54 }
 0x372   : > { %v1024_v55 = vpop.xlane.xlu0 %1023 }
 0x373   : > { %v1025_v56 = vsub.f32 %v1019_v46, %v1024_v55 }
 0x375   : > { %v1026_v57 = vmul.f32 1.442695, %v1025_v56 }
 0x377   : > { %1892 = vpow2.f32 %v1026_v57 }
 0x37d   : > { %v1893_v58 = vpop.eup %1892 }
 0x37e   : > { %v1028_v59 = vsel %vm918_vm6, %v1893_v58, 0.0 }
 0x37f   : > { %1029 = vadd.xlane.f32.xlu0 %v1028_v59 }
 0x385   : > { %v1075_v60 = vpop.permute.xlu0 %1074 }
 0x386   : > { %1716 = vmatpush.xpose.msk.msrb.mxu1 %vm918_vm6, %v1075_v60 }
 0x38a   : > { %1150 = vrot.lane.b32.xlu1 %v914_v39, %s2205_s12 }
 0x393   : > { %1072 = vrot.lane.b32.xlu0 %v914_v39, %s2206_s19 }
 0x3e4   : > { %v952_v61 = vpop.xlane.xlu1 %951 }
 0x3e5   : > { %1894 = vrcp.f32 %v952_v61  ;;  %v964_v1 = vand.u32 2147483648, %v952_v61  ;;  %v962_v4 = vand.u32 2147483647, %v952_v61  ;;  %vm958_vm8 = vweird.f32 %v952_v61 }
 0x3e7   : > { %v965_v7 = vor.u32 1.1754944e-38, %v964_v1  ;;  %vm963_vm10 = vcmp.eq.f32.partialorder %v962_v4, 8.507059e+37 }
 0x3eb   : > { %v1895_v62 = vpop.eup %1894 }
 0x3ec   : > { %v954_v63 = vmul.f32 %v1895_v62, %v952_v61  ;;  %vm959_vm7 = vweird.f32 %v1895_v62 }
 0x3ed   : > { %vm960_vm9 = vmor %vm958_vm8, %vm959_vm7 }
 0x3ee   : > { %v955_v0 = vsub.f32 1.0, %v954_v63 }
 0x3f0   : > { %v956_v2 = vmul.f32 %v1895_v62, %v955_v0 }
 0x3f2   : > { %v1030_v5 = vpop.xlane.xlu0 %1029  ;;  %v957_v6 = vadd.f32 %v1895_v62, %v956_v2 }
 0x3f3   : > { %1896 = vrcp.f32 %v1030_v5  ;;  %v1042_v15 = vand.u32 2147483648, %v1030_v5  ;;  %v1040_v17 = vand.u32 2147483647, %v1030_v5  ;;  %vm1036_vm12 = vweird.f32 %v1030_v5 }
 0x3f4   : > { %v961_v8 = vsel %vm960_vm9, %v1895_v62, %v957_v6  ;;  %v831_v6 = vld [vmem:[%s2526_s30 + $0x18] sm:$0xff]  ;;  %vm1241_vm9 = vcmask 130048  }
 0x3f5   : > { %v966_v9 = vsel %vm963_vm10, %v965_v7, %v961_v8  ;;  %v1043_v19 = vor.u32 1.1754944e-38, %v1042_v15  ;;  %vm1041_vm14 = vcmp.eq.f32.partialorder %v1040_v17, 8.507059e+37  ;;  %v830_v7 = vld [vmem:[%s2526_s30 + $0x10] sm:$0xff]  ;;  %1263 = vmatpush.msra.mxu1 %v831_v6  ;;  %v829_v8 = vld [vmem:[%s2526_s30 + $0x8] sm:$0xff]  ;;  %vm1243_vm10 = vcmask 195584  }
 0x3f6   : > { %v967_v10 = vmul.f32 %v1891_v53, %v966_v9  ;;  %v828_v9 = vld [vmem:[%s2526_s30] sm:$0xff] }
 0x3f7   : > { %1264 = vmatpush.msra.mxu1 %v830_v7  ;;  %v1881_v17 = vld [vmem:[%s2825_s14] ss:$0 sm:$0xff] }
 0x3f8   : > { %1712 = vmatmul.msk.f32.vlgmr.msra.gmra.mxu2 %vm918_vm6, %v967_v10  ;;  %v840_v7 = vld [vmem:[%s2553_s1] sm:$0xff] }
 0x3f9   : > { %v1897_v12 = vpop.eup %1896  ;;  %1719 = vmatpush.xpose.msk.msra.mxu2 %vm918_vm6, %v1153_v51  ;;  %1265 = vmatpush.msra.mxu1 %v829_v8 }
 0x3fa   : > { %v1032_v13 = vmul.f32 %v1897_v12, %v1030_v5  ;;  %vm1037_vm11 = vweird.f32 %v1897_v12 }
 0x3fb   : > { %vm1038_vm13 = vmor %vm1036_vm12, %vm1037_vm11  ;;  %1266 = vmatpush.msra.mxu1 %v828_v9 }
 0x3fc   : > { %v1033_v14 = vsub.f32 1.0, %v1032_v13  ;;  %v1151_v24 = vpop.permute.xlu1 %1150 }
 0x3fe   : > { %v1034_v16 = vmul.f32 %v1897_v12, %v1033_v14 }
 0x400   : > { %v1035_v18 = vadd.f32 %v1897_v12, %v1034_v16 }
 0x402   : > { %v1039_v20 = vsel %vm1038_vm13, %v1897_v12, %v1035_v18 }
 0x403   : > { %v1044_v21 = vsel %vm1041_vm14, %v1043_v19, %v1039_v20 }
 0x404   : > { %v1045_v22 = vmul.f32 %v1893_v58, %v1044_v21 }
 0x405   : > { %v1073_v23 = vpop.permute.xlu0 %1072 }
 0x406   : > { %1715 = vmatmul.msk.f32.vlgmr.msrb.gmra.mxu2 %vm918_vm6, %v1045_v22  ;;  %1717 = vmatmul.msk.f32.vlgmr.msrb.gmra.mxu1 %vm918_vm6, %v1073_v23 }
 0x40e   : > { %1720 = vmatmul.msk.f32.vlgmr.msra.gmra.mxu2 %vm918_vm6, %v1151_v24 }
 0x47b   : > { %v2606_v25 = vpop.f32.mrf.mxu2 }
 0x483   : > { %v1097_v26 = vpop.f32.mrf.mxu1 }
 0x484   : > { %v1100_v27 = vsel %vm918_vm6, %v1097_v26, -inf }
 0x485   : > { %1101 = vmax.xlane.f32.xlu2 %v1100_v27 }
 0x489   : > { %v1069_v28 = vpop.f32.mrf.mxu2 }
 0x491   : > { %v1175_v29 = vpop.f32.mrf.mxu2 }
 0x492   : > { %v1178_v30 = vsel %vm918_vm6, %v1175_v29, -inf }
 0x493   : > { %1179 = vmax.xlane.f32.xlu0 %v1178_v30  ;;  %v835_v30 = vld [vmem:[%s2539_s22] sm:$0xff] }
 0x4a7   : > { %1124 = vrot.lane.b32.xlu0 %v2583_v38, %s2207_s7 }
 0x4f8   : > { %v1102_v31 = vpop.xlane.xlu2 %1101 }
 0x4f9   : > { %v1103_v32 = vsub.f32 %v1097_v26, %v1102_v31 }
 0x4fb   : > { %v1104_v33 = vmul.f32 1.442695, %v1103_v32 }
 0x4fd   : > { %1898 = vpow2.f32 %v1104_v33 }
 0x503   : > { %v1899_v34 = vpop.eup %1898 }
 0x504   : > { %v1106_v35 = vsel %vm918_vm6, %v1899_v34, 0.0 }
 0x505   : > { %1107 = vadd.xlane.f32.xlu1 %v1106_v35 }
 0x506   : > { %v1180_v36 = vpop.xlane.xlu0 %1179 }
 0x507   : > { %v1181_v37 = vsub.f32 %v1175_v29, %v1180_v36  ;;  %v836_v29 = vld [vmem:[%s2539_s22 + $0x8] sm:$0xff] }
 0x509   : > { %v1182_v39 = vmul.f32 1.442695, %v1181_v37 }
 0x50b   : > { %1900 = vpow2.f32 %v1182_v39 }
 0x511   : > { %v1901_v40 = vpop.eup %1900 }
 0x512   : > { %v1184_v41 = vsel %vm918_vm6, %v1901_v40, 0.0 }
 0x513   : > { %1185 = vadd.xlane.f32.xlu2 %v1184_v41  ;;  %v1882_v41 = vld [vmem:[%s680_s5] ss:$0 sm:$0xff] }
 0x519   : > { %v1125_v42 = vpop.permute.xlu0 %1124 }
 0x51a   : > { %1145 = vmatpush.msrb.mxu3 %v1125_v42 }
 0x51e   : > { %1229 = vrot.lane.b32.xlu1 %v1069_v28, %s2208_s17  ;;  %v838_v28 = vld [vmem:[%s2539_s22 + $0x18] sm:$0xff] }
 0x51f   : > { %1322 = vmatpush.msra.mxu3 %v838_v28 }
 0x52b   : > { %1202 = vrot.lane.b32.xlu2 %v2583_v38, %s2209_s10 }
 0x578   : > { %v1108_v43 = vpop.xlane.xlu1 %1107 }
 0x579   : > { %1902 = vrcp.f32 %v1108_v43  ;;  %v1120_v47 = vand.u32 2147483648, %v1108_v43  ;;  %v1118_v49 = vand.u32 2147483647, %v1108_v43  ;;  %vm1114_vm0 = vweird.f32 %v1108_v43 }
 0x57b   : > { %v1121_v52 = vor.u32 1.1754944e-38, %v1120_v47  ;;  %vm1119_vm3 = vcmp.eq.f32.partialorder %v1118_v49, 8.507059e+37  ;;  %v1884_v47 = vld [vmem:[%s803_s24] ss:$0 sm:$0xff] }
 0x57f   : > { %v1903_v44 = vpop.eup %1902 }
 0x580   : > { %v1110_v45 = vmul.f32 %v1903_v44, %v1108_v43  ;;  %vm1115_vm15 = vweird.f32 %v1903_v44 }
 0x581   : > { %vm1116_vm2 = vmor %vm1114_vm0, %vm1115_vm15 }
 0x582   : > { %v1111_v46 = vsub.f32 1.0, %v1110_v45 }
 0x584   : > { %v1112_v48 = vmul.f32 %v1903_v44, %v1111_v46 }
 0x586   : > { %v1113_v50 = vadd.f32 %v1903_v44, %v1112_v48  ;;  %v1186_v51 = vpop.xlane.xlu2 %1185 }
 0x587   : > { %1904 = vrcp.f32 %v1186_v51  ;;  %v1198_v59 = vand.u32 2147483648, %v1186_v51  ;;  %v1196_v61 = vand.u32 2147483647, %v1186_v51  ;;  %vm1192_vm5 = vweird.f32 %v1186_v51 }
 0x588   : > { %v1117_v53 = vsel %vm1116_vm2, %v1903_v44, %v1113_v50  ;;  %v1883_v44 = vld [vmem:[%s795_s29] ss:$0 sm:$0xff]  ;;  %vm1377_vm2 = vcmask 523264  }
 0x589   : > { %v1122_v54 = vsel %vm1119_vm3, %v1121_v52, %v1117_v53  ;;  %v1199_v63 = vor.u32 1.1754944e-38, %v1198_v59  ;;  %vm1197_vm8 = vcmp.eq.f32.partialorder %v1196_v61, 8.507059e+37  ;;  %v847_v53 = vld [vmem:[%s2553_s1 + $0x38] sm:$0xff]  ;;  %v844_v61 = vld [vmem:[%s2553_s1 + $0x20] sm:$0xff] }
 0x58a   : > { %v1123_v55 = vmul.f32 %v1899_v34, %v1122_v54  ;;  %1389 = vmatpush.msrb.mxu0 %v847_v53 }
 0x58c   : > { %1718 = vmatmul.msk.f32.vlgmr.msrb.gmra.mxu3 %vm918_vm6, %v1123_v55 }
 0x58d   : > { %v1905_v38 = vpop.eup %1904 }
 0x58e   : > { %v1188_v56 = vmul.f32 %v1905_v38, %v1186_v51  ;;  %v1203_v57 = vpop.permute.xlu2 %1202  ;;  %vm1193_vm4 = vweird.f32 %v1905_v38 }
 0x58f   : > { %1223 = vmatpush.msrb.mxu2 %v1203_v57  ;;  %vm1194_vm7 = vmor %vm1192_vm5, %vm1193_vm4 }
 0x590   : > { %v1189_v58 = vsub.f32 1.0, %v1188_v56  ;;  %v1230_v12 = vpop.permute.xlu1 %1229 }
 0x591   : > { %v1240_v13 = vsel %vm918_vm6, %v2606_v25, %v1230_v12 }
 0x592   : > { %v1190_v60 = vmul.f32 %v1905_v38, %v1189_v58  ;;  %v845_v58 = vld [vmem:[%s2553_s1 + $0x28] sm:$0xff] }
 0x594   : > { %v1191_v62 = vadd.f32 %v1905_v38, %v1190_v60 }
 0x596   : > { %v1195_v0 = vsel %vm1194_vm7, %v1905_v38, %v1191_v62  ;;  %v846_v38 = vld [vmem:[%s2553_s1 + $0x30] sm:$0xff] }
 0x597   : > { %v1200_v1 = vsel %vm1197_vm8, %v1199_v63, %v1195_v0  ;;  %1390 = vmatpush.msrb.mxu0 %v846_v38  ;;  %v843_v63 = vld [vmem:[%s2553_s1 + $0x18] sm:$0xff] }
 0x598   : > { %v1201_v2 = vmul.f32 %v1901_v40, %v1200_v1 }
 0x599   : > { %1391 = vmatpush.msrb.mxu0 %v845_v58 }
 0x59a   : > { %1721 = vmatmul.msk.f32.vlgmr.msrb.gmra.mxu2 %vm918_vm6, %v1201_v2  ;;  %v842_v2 = vld [vmem:[%s2553_s1 + $0x10] sm:$0xff] }
 0x59b   : > { %1392 = vmatpush.msrb.mxu0 %v844_v61 }
 0x59d   : > { %1393 = vmatpush.msrb.mxu0 %v843_v63 }
 0x59f   : > { %1394 = vmatpush.msrb.mxu0 %v842_v2 }
 0x60f   : > { %v1147_v4 = vpop.f32.mrf.mxu3 }
 0x610   : > { %1233 = vrot.lane.b32.xlu0 %v1147_v4, %s2210_s2 }
 0x61d   : > { %v1225_v5 = vpop.f32.mrf.mxu2 }
 0x61e   : > { %1237 = vrot.lane.b32.xlu0 %v1225_v5, %s2211_s4  ;;  %v841_v5 = vld [vmem:[%s2553_s1 + $0x8] sm:$0xff] }
 0x61f   : > { %1395 = vmatpush.msrb.mxu0 %v841_v5 }
 0x621   : > { %1396 = vmatpush.msrb.mxu0 %v840_v7 }
 0x682   : > { %v1234_v10 = vpop.permute.xlu0 %1233 }
 0x683   : > { %v1242_v14 = vsel %vm1241_vm9, %v1240_v13, %v1234_v10 }
 0x690   : > { %v1238_v15 = vpop.permute.xlu0 %1237 }
 0x691   : > { %v1244_v16 = vsel %vm1243_vm10, %v1242_v14, %v1238_v15 }
 0x692   : > { %1722 = vmatmul.msk.f32.vlgmr.msra.gmra.mxu1 %vm850_vm1, %v1244_v16 }
 0x70f   : > { %v1268_v18 = vpop.f32.mrf.mxu1 }
 0x710   : > { %v1269_v19 = vadd.f32 %v1881_v17, %v1268_v18 }
 0x712   : > { %v1271_v20 = vadd.f32 %v1269_v19, %v2559_v3  ;;  %v837_v3 = vld [vmem:[%s2539_s22 + $0x10] sm:$0xff] }
 0x713   : > { %1323 = vmatpush.msra.mxu3 %v837_v3 }
 0x714   : > { %1272 = vst.msk [vmem:[#allocation2] sm:$0xff] %vm850_vm1, %v1271_v20 }
 0x715   : > { %1324 = vmatpush.msra.mxu3 %v836_v29 }
 0x717   : > { %1325 = vmatpush.msra.mxu3 %v835_v30 }
 0x71b   : > { %v2630_v21 = vld [vmem:[#allocation2] sm:$0xff] }
 0x71c   : > { %v1274_v22 = vsel %vm850_vm1, %v2630_v21, 0.0 }
 0x71d   : > { %1275 = vadd.xlane.f32.xlu2 %v1274_v22 }
 0x790   : > { %v1276_v23 = vpop.xlane.xlu2 %1275 }
 0x791   : > { %v1277_v24 = vmul.f32 %v1276_v23, %v2563_v11 }
 0x793   : > { %v1278_v25 = vsub.f32 %v2630_v21, %v1277_v24 }
 0x795   : > { %v1279_v26 = vmul.f32 %v1278_v25, %v1278_v25 }
 0x797   : > { %v1280_v27 = vsel %vm850_vm1, %v1279_v26, 0.0 }
 0x798   : > { %1281 = vadd.xlane.f32.xlu1 %v1280_v27 }
 0x80b   : > { %v1282_v31 = vpop.xlane.xlu1 %1281 }
 0x80c   : > { %v1283_v32 = vmul.f32 %v1282_v31, %v2563_v11 }
 0x80e   : > { %v1284_v33 = vadd.f32 1e-06, %v1283_v32 }
 0x810   : > { %1906 = vrsqrt.f32 %v1284_v33  ;;  %vm1291_vm11 = vweird.f32 %v1284_v33 }
 0x816   : > { %v1907_v34 = vpop.eup %1906 }
 0x817   : > { %v1286_v35 = vmul.f32 %v1907_v34, %v1284_v33  ;;  %vm1292_vm6 = vweird.f32 %v1907_v34 }
 0x818   : > { %vm1293_vm12 = vmor %vm1291_vm11, %vm1292_vm6 }
 0x819   : > { %v1287_v36 = vmul.f32 %v1907_v34, %v1286_v35 }
 0x81b   : > { %v1288_v37 = vmul.f32 0.5, %v1287_v36 }
 0x81d   : > { %v1289_v39 = vsub.f32 1.5, %v1288_v37 }
 0x81f   : > { %v1290_v40 = vmul.f32 %v1907_v34, %v1289_v39 }
 0x821   : > { %v1294_v42 = vsel %vm1293_vm12, %v1907_v34, %v1290_v40  ;;  %v1885_v34 = vld [vmem:[%s811_s6] ss:$0 sm:$0xff] }
 0x822   : > { %v1295_v43 = vmul.f32 %v1294_v42, %v1278_v25 }
 0x824   : > { %v1299_v45 = vmul.f32 %v1882_v41, %v1295_v43 }
 0x826   : > { %v1303_v46 = vadd.f32 %v1883_v44, %v1299_v45 }
 0x828   : > { %1723 = vmatmul.msk.f32.vlgmr.msra.gmra.mxu3 %vm850_vm1, %v1303_v46 }
 0x8ab   : > { %v1327_v48 = vpop.f32.mrf.mxu3 }
 0x8ac   : > { %v1328_v49 = vadd.f32 %v1884_v47, %v1327_v48 }
 0x8ae   : > { %v1331_v50 = vmul.f32 0.70710677, %v1328_v49  ;;  %v1330_v31 = vmul.f32 0.5, %v1328_v49 }
 0x8b0   : > { %v1332_v51 = vmul.f32 %v1331_v50, %v1331_v50 }
 0x8b2   : > { %v1333_v52 = vmin.f32 %v1332_v51, 16.0 }
 0x8b4   : > { %v1334_v54 = vmul.f32 2.1237322e-06, %v1333_v52  ;;  %v1345_v55 = vmul.f32 3.8918573e-05, %v1333_v52 }
 0x8b6   : > { %v1335_v56 = vadd.f32 0.00028619796, %v1334_v54  ;;  %v1346_v57 = vadd.f32 0.001143296, %v1345_v55 }
 0x8b8   : > { %v1336_v59 = vmul.f32 %v1335_v56, %v1333_v52  ;;  %v1347_v60 = vmul.f32 %v1346_v57, %v1333_v52 }
 0x8ba   : > { %v1348_v62 = vadd.f32 0.014752088, %v1347_v60  ;;  %v1337_v0 = vadd.f32 0.0036580483, %v1336_v59 }
 0x8bc   : > { %v1349_v1 = vmul.f32 %v1348_v62, %v1333_v52  ;;  %v1338_v6 = vmul.f32 %v1337_v0, %v1333_v52 }
 0x8be   : > { %v1350_v4 = vadd.f32 0.112945676, %v1349_v1  ;;  %v1339_v10 = vadd.f32 0.05243302, %v1338_v6 }
 0x8c0   : > { %v1351_v8 = vmul.f32 %v1350_v4, %v1333_v52  ;;  %v1340_v14 = vmul.f32 %v1339_v10, %v1333_v52 }
 0x8c2   : > { %v1352_v9 = vadd.f32 0.4994258, %v1351_v8  ;;  %v1341_v15 = vadd.f32 0.18741608, %v1340_v14 }
 0x8c4   : > { %v1353_v12 = vmul.f32 %v1352_v9, %v1333_v52  ;;  %v1342_v17 = vmul.f32 %v1341_v15, %v1333_v52 }
 0x8c6   : > { %v1354_v13 = vadd.f32 1.0, %v1353_v12  ;;  %v1343_v22 = vadd.f32 1.1283791, %v1342_v17 }
 0x8c8   : > { %1908 = vrcp.f32 %v1354_v13  ;;  %v1366_v20 = vand.u32 2147483648, %v1354_v13  ;;  %v1364_v24 = vand.u32 2147483647, %v1354_v13  ;;  %vm1360_vm14 = vweird.f32 %v1354_v13 }
 0x8c9   : > { %v1344_v27 = vmul.f32 %v1343_v22, %v1331_v50 }
 0x8ca   : > { %v1367_v26 = vor.u32 1.1754944e-38, %v1366_v20  ;;  %vm1365_vm0 = vcmp.eq.f32.partialorder %v1364_v24, 8.507059e+37 }
 0x8ce   : > { %v1909_v16 = vpop.eup %1908 }
 0x8cf   : > { %v1356_v18 = vmul.f32 %v1909_v16, %v1354_v13  ;;  %vm1361_vm13 = vweird.f32 %v1909_v16 }
 0x8d0   : > { %vm1362_vm15 = vmor %vm1360_vm14, %vm1361_vm13 }
 0x8d1   : > { %v1357_v19 = vsub.f32 1.0, %v1356_v18 }
 0x8d3   : > { %v1358_v23 = vmul.f32 %v1909_v16, %v1357_v19 }
 0x8d5   : > { %v1359_v25 = vadd.f32 %v1909_v16, %v1358_v23 }
 0x8d7   : > { %v1363_v28 = vsel %vm1362_vm15, %v1909_v16, %v1359_v25 }
 0x8d8   : > { %v1368_v3 = vsel %vm1365_vm0, %v1367_v26, %v1363_v28 }
 0x8d9   : > { %v1369_v29 = vmul.f32 %v1368_v3, %v1344_v27 }
 0x8db   : > { %v1724_v30 = vclamps-f32 %v1369_v29, 1.0 }
 0x8dd   : > { %v1372_v32 = vadd.f32 1.0, %v1724_v30 }
 0x8df   : > { %v1373_v33 = vmul.f32 %v1372_v32, %v1330_v31 }
 0x8e1   : > { %1725 = vmatmul.msk.f32.vlgmr.msrb.gmra.mxu0 %vm1377_vm2, %v1373_v33 }
 0x95e   : > { %v1398_v35 = vpop.f32.mrf.mxu0 }
 0x95f   : > { %v1399_v36 = vadd.f32 %v1885_v34, %v1398_v35  ;;  %1406 = sbr.rel (%p1726_p2) target bundleno = 2680 (0xa78), region = 112 }
 0x961   : > { %v1401_v37 = vadd.f32 %v1399_v36, %v2630_v21 }
 0x963   : > { %1402 = vst.msk [vmem:[#allocation2] sm:$0xff] %vm850_vm1, %v1401_v37 }
 0x964   : > { %v1910_v54 = vld [vmem:[%s2829_s13] ss:$0 sm:$0xff] }
 0x96a   : > { %v1409_v39 = vld [vmem:[#allocation2] sm:$0xff] }
 0x96b   : > { %v1410_v40 = vsel %vm850_vm1, %v1409_v39, 0.0 }
 0x96c   : > { %1411 = vadd.xlane.f32.xlu0 %v1410_v40 }
 0x9df   : > { %v1412_v41 = vpop.xlane.xlu0 %1411 }
 0x9e0   : > { %v1413_v42 = vmul.f32 %v1412_v41, %v2563_v11 }
 0x9e2   : > { %v1414_v43 = vsub.f32 %v1409_v39, %v1413_v42 }
 0x9e4   : > { %v1415_v44 = vmul.f32 %v1414_v43, %v1414_v43 }
 0x9e6   : > { %v1416_v45 = vsel %vm850_vm1, %v1415_v44, 0.0 }
 0x9e7   : > { %1417 = vadd.xlane.f32.xlu0 %v1416_v45 }
 0xa5a   : > { %v1418_v46 = vpop.xlane.xlu0 %1417 }
 0xa5b   : > { %v1419_v21 = vmul.f32 %v1418_v46, %v2563_v11  ;;  %v1911_v11 = vld [vmem:[%s2830_s16] ss:$0 sm:$0xff] }
 0xa5d   : > { %v1420_v47 = vadd.f32 1e-06, %v1419_v21 }
 0xa5f   : > { %1912 = vrsqrt.f32 %v1420_v47  ;;  %vm1427_vm4 = vweird.f32 %v1420_v47 }
 0xa65   : > { %v1913_v48 = vpop.eup %1912 }
 0xa66   : > { %v1422_v49 = vmul.f32 %v1913_v48, %v1420_v47  ;;  %vm1428_vm3 = vweird.f32 %v1913_v48 }
 0xa67   : > { %vm1429_vm5 = vmor %vm1427_vm4, %vm1428_vm3 }
 0xa68   : > { %v1423_v50 = vmul.f32 %v1913_v48, %v1422_v49 }
 0xa6a   : > { %v1424_v51 = vmul.f32 0.5, %v1423_v50 }
 0xa6c   : > { %v1425_v52 = vsub.f32 1.5, %v1424_v51 }
 0xa6e   : > { %v1426_v53 = vmul.f32 %v1913_v48, %v1425_v52 }
 0xa70   : > { %v1430_v55 = vsel %vm1429_vm5, %v1913_v48, %v1426_v53 }
 0xa71   : > { %v1431_v38 = vmul.f32 %v1430_v55, %v1414_v43 }
 0xa73   : > { %v1435_v56 = vmul.f32 %v1910_v54, %v1431_v38 }
 0xa75   : > { %v1439_v57 = vadd.f32 %v1911_v11, %v1435_v56 }
 0xa77   : > { %1440 = vst.msk [vmem:[%s776_s8] sm:$0xff] %vm850_vm1, %v1439_v57 }
 0xa78 PF: > { %s2831_s9 = sld [smem:[#allocation20_spill]]  ;;  %s1454_s4 = sshll.u32 %s776_s8, 4  ;;  %s1455_s4 = int_to_ptr.vmem [resolvable:$true] %s1454_s4 }
 0xa79   : > { %s2833_s10 = sld [smem:[#allocation45_spill]]  ;;  %s2834_s26 = sand.u32 1, %s2170_s25  }
 0xa7a   : > { %s1442_s0 = scalar_lea.sflag [#allocation5], %s2834_s26 }
 0xa7e   : > { %s1728_s19 = sshll.u32 %s2831_s9, 3 }
 0xa7f   : > { %s1452_s2 = scalar_lea.hbm %s2833_s10, %s1728_s19  ;;  %s2084_s11 = scalar_lea.hbm %s2833_s10, 16 }
 0xa80   : > { %s1456_s23 = sshll.u32 %s1452_s2, 4  ;;  %s1457_s23 = int_to_ptr.hbm [resolvable:$true] %s1456_s23 }
 0xa81   : > { %s2078_s14 = sshra.s32 %s1457_s23, 4  ;;  %s2079_s14 = int_to_ptr.hbm [resolvable:$true] %s2078_s14 }
 0xa82   : > { %s2080_s22 = scalar_lea.hbm %s2079_s14, 8  ;;  %p2085_p7 = scmp.lt.s32.totalorder %s2079_s14, %s2833_s10 }
 0xa83   : > { %p2081_p4 = scmp.ne.s32.totalorder %s2079_s14, %s2080_s22  ;;  %p2086_p8 = scmp.lt.s32.totalorder %s2084_s11, %s2080_s22 }
 0xa85   : > { %p2082_p5 = pnand %p2081_p4, %p2460_p9  ;;  %p2087_p10 = por %p2086_p8, %p2085_p7 }
 0xa87   : > { %p2083_p6 = pneg %p2082_p5 }
 0xa89   : > { %p2088_p3 = pnand %p2087_p10, %p2083_p6 }
 0xa8b   : > { %2091 = shalt.err (!%p2088_p3)
}
 0xa8c   : > { %1747 = dma.vmem_to_hbm [thread:$0]  (%p2460_p9), %s1455_s4, 128, %s1457_s23, %s1442_s0  }
 0xa8d PF: > { %s2835_s18 = sld [smem:[#allocation23_spill]] }
 0xa8e   : > { %s2836_s8 = sld [smem:[#allocation18_spill]] }
 0xa93   : > { %p1773_p12 = scmp.ge.s32.totalorder %s2835_s18, 2 }
 0xa94   : > { %s1468_s24 = sand.u32 1, %s2836_s8  }
 0xa95   : > { %p1767_p1 = pnand %p1773_p12, %p2393_p11  ;;  %s1469_s29 = scalar_lea.sflag [#allocation5], %s1468_s24 }
 0xa97   : > { %p1768_p13 = pneg %p1767_p1 }
 0xa99   : > { %2149 = dma.done.wait (%p1768_p13), %s1469_s29, 128  }
 0xa9a   : > { %2151 = vsyncadd (%p1768_p13), %s1469_s29, 4294967168  ;;  %s33_s0 = sadd.s32 1, %s2835_s18   ;;  %s2838_s21 = sld [smem:[#allocation16_spill]] }
 0xa9b   : > { %p30_p0 = scmp.ge.s32.totalorder %s33_s0, 6   ;;  %s2839_s22 = sld [smem:[#allocation17_spill]] }
 0xa9c   : > { %s2840_s23 = sld [smem:[#allocation26_spill]]  ;;  %s2847_s24 = smov %s2170_s25 }
 0xa9d   : > { %s2841_s27 = sld [smem:[#allocation19_spill]] }
 0xa9e   : > { %s2842_s26 = sld [smem:[#allocation27_spill]] }
 0xa9f   : > { %s2843_s6 = sld [smem:[#allocation21_spill]] }
 0xaa0   : > { %s2844_s28 = sld [smem:[#allocation22_spill]] }
 0xaa1   : > { %s2845_s29 = sld [smem:[#allocation24_spill]]  ;;  %32 = sbr.rel (!%p30_p0) target bundleno = 27 (0x1b), region = 201 }
 0xaa2   : > { %s2846_s30 = sld [smem:[#allocation25_spill]] }
 0xaa3   : > { %s2848_s25 = smov %s2841_s27 }
 0xaa5   : > { %s2849_s27 = smov %s2843_s6 }
 0xaa6   :  { %1475 = vsyncpa [#allocation4], 1 }
 0xaa7   :  { %1477 = vsyncpa [#allocation4 + $0x1], 1 }
 0xaa8   :  { %1478 = vsyncpa [#allocation7], 1 }
 0xaa9   :  { %1479 = vsyncpa [#allocation5], 1 }
 0xaaa   :  { %1481 = vsyncpa [#allocation5 + $0x1], 1 }

</bundles_post_ra>
